<compile_context>
chip_gen: v5e
topology: v5e:2x2
jax: 0.10.0
libtpu: 0.0.40
codegen_flags: <defaults>
</compile_context>

<pallas_src>
import functools

import jax
import jax.numpy as jnp
from jax import lax
from jax.experimental import pallas as pl
from jax.experimental.pallas import tpu as pltpu


# ------------------------------ helpers ------------------------------------ #

def _round_up(a: int, b: int) -> int:
    return ((a + b - 1) // b) * b


def _apply_act(y, act: str):
    if act == "silu":
        return y * (1.0 / (1.0 + jnp.exp(-y)))
    if act == "hswish":
        return y * (jnp.clip(y + 3.0, 0.0, 6.0) * (1.0 / 6.0))
    if act == "sigmoid":
        return 1.0 / (1.0 + jnp.exp(-y))
    if act == "hsigmoid":
        return jnp.clip(y + 3.0, 0.0, 6.0) * (1.0 / 6.0)
    return y


# ------------------ kernel 1: matmul + affine + activation ----------------- #

def _matmul_affine_act_kernel(x_ref, w_ref, s_ref, b_ref, o_ref, *, act):
    y = jnp.dot(x_ref[...], w_ref[...], preferred_element_type=jnp.float32)
    y = y * s_ref[...] + b_ref[...]
    o_ref[...] = _apply_act(y, act).astype(o_ref.dtype)


def matmul_affine_act(x, w, scale, bias, act, tm_max=512):
    """(M, K) @ (K, N) with per-output-column scale/bias + fused activation."""
    m, k = x.shape
    nout = w.shape[1]
    tm = min(tm_max, _round_up(m, 8))
    m_pad = _round_up(m, tm)
    x_p = jnp.pad(x, ((0, m_pad - m), (0, 0)))
    out = pl.pallas_call(
        functools.partial(_matmul_affine_act_kernel, act=act),
        out_shape=jax.ShapeDtypeStruct((m_pad, nout), x.dtype),
        grid=(m_pad // tm,),
        in_specs=[
            pl.BlockSpec((tm, k), lambda i: (i, 0)),
            pl.BlockSpec((k, nout), lambda i: (0, 0)),
            pl.BlockSpec((1, nout), lambda i: (0, 0)),
            pl.BlockSpec((1, nout), lambda i: (0, 0)),
        ],
        out_specs=pl.BlockSpec((tm, nout), lambda i: (i, 0)),
        compiler_params=pltpu.CompilerParams(
            dimension_semantics=("parallel",)),
    )(x_p, w, scale.reshape(1, nout), bias.reshape(1, nout))
    return out[:m]


def conv1x1_pallas(x, w, scale, bias, act):
    """1x1 conv (BN folded into scale/bias) + activation, NHWC input."""
    n, h, wd, cin = x.shape
    cout = w.shape[0]
    y = matmul_affine_act(x.reshape(n * h * wd, cin), w.T, scale, bias, act)
    return y.reshape(n, h, wd, cout)


def conv3x3_pallas(x, w, scale, bias, act):
    """3x3 / stride-1 / pad-1 conv via im2col + fused matmul epilogue, NHWC."""
    n, h, wd, cin = x.shape
    cout = w.shape[0]
    xp = jnp.pad(x, ((0, 0), (1, 1), (1, 1), (0, 0)))
    cols = [xp[:, dh:dh + h, dw:dw + wd, :]
            for dh in range(3) for dw in range(3)]
    patches = jnp.stack(cols, axis=-1)                  # (n, h, w, cin, 9)
    patches = patches.reshape(n * h * wd, cin * 9)      # index = c*9 + tap
    wmat = w.reshape(cout, cin * 9).T                   # (cin*9, cout)
    y = matmul_affine_act(patches, wmat, scale, bias, act)
    return y.reshape(n, h, wd, cout)


# --------------------- kernels 2/3: Coordinate Attention -------------------- #

def _ca_pool_kernel(x_ref, oh_ref, ow_ref):
    x = x_ref[...].astype(jnp.float32)                      # (1, H, W, C)
    oh_ref[...] = jnp.mean(x, axis=2).astype(oh_ref.dtype)  # mean over W
    ow_ref[...] = jnp.mean(x, axis=1).astype(ow_ref.dtype)  # mean over H


def _ca_apply_kernel(x_ref, ah_ref, aw_ref, o_ref):
    x = x_ref[...].astype(jnp.float32)        # (1, th, W, C)
    ah = ah_ref[...].astype(jnp.float32)      # (1, th, C)
    aw = aw_ref[...].astype(jnp.float32)      # (1, W, C)
    o_ref[...] = (x * ah[:, :, None, :] * aw[:, None, :, :]).astype(o_ref.dtype)


def ca_pool(x):
    """Means over W and over H of an NHWC map -> (n,H,C), (n,W,C)."""
    n, h, wd, c = x.shape
    if h * wd * c * 4 <= (4 << 20):
        tcc, c_pad = c, c
    else:  # tile channels for very large maps (128-aligned tiles)
        tcc = max(128, ((4 << 20) // (h * wd * 4)) // 128 * 128)
        c_pad = _round_up(c, tcc)
    xp = x if c_pad == c else jnp.pad(x, ((0, 0), (0, 0), (0, 0), (0, c_pad - c)))
    oh, ow = pl.pallas_call(
        _ca_pool_kernel,
        out_shape=(jax.ShapeDtypeStruct((n, h, c_pad), x.dtype),
                   jax.ShapeDtypeStruct((n, wd, c_pad), x.dtype)),
        grid=(n, c_pad // tcc),
        in_specs=[pl.BlockSpec((1, h, wd, tcc), lambda i, j: (i, 0, 0, j))],
        out_specs=(pl.BlockSpec((1, h, tcc), lambda i, j: (i, 0, j)),
                   pl.BlockSpec((1, wd, tcc), lambda i, j: (i, 0, j))),
        compiler_params=pltpu.CompilerParams(
            dimension_semantics=("parallel", "parallel")),
    )(xp)
    return oh[..., :c], ow[..., :c]


def ca_apply(x, a_h, a_w):
    """out[n,h,w,c] = x * a_h[n,h,c] * a_w[n,w,c]  (NHWC)."""
    n, h, wd, c = x.shape
    row_bytes = wd * c * 4
    if h * row_bytes <= (2 << 20):
        th = h
    else:
        th = max(8, ((2 << 20) // row_bytes) // 8 * 8)
    h_pad = _round_up(h, th)
    if h_pad != h:
        x = jnp.pad(x, ((0, 0), (0, h_pad - h), (0, 0), (0, 0)))
        a_h = jnp.pad(a_h, ((0, 0), (0, h_pad - h), (0, 0)))
    out = pl.pallas_call(
        _ca_apply_kernel,
        out_shape=jax.ShapeDtypeStruct((n, h_pad, wd, c), x.dtype),
        grid=(n, h_pad // th),
        in_specs=[pl.BlockSpec((1, th, wd, c), lambda i, j: (i, j, 0, 0)),
                  pl.BlockSpec((1, th, c), lambda i, j: (i, j, 0)),
                  pl.BlockSpec((1, wd, c), lambda i, j: (i, 0, 0))],
        out_specs=pl.BlockSpec((1, th, wd, c), lambda i, j: (i, j, 0, 0)),
        compiler_params=pltpu.CompilerParams(
            dimension_semantics=("parallel", "parallel")),
    )(x, a_h, a_w)
    return out[:, :h]


def coord_att_pallas(xcat, p, wn_chan):
    """CoordAtt over the (unweighted) NHWC concat; BiFPN weights folded in."""
    n, h, wd, c = xcat.shape
    pooled_h, pooled_w = ca_pool(xcat)                # (n,h,c), (n,wd,c)
    # BiFPN fusion weights are per-channel scalars and pooling is linear, so
    # fold them into the tiny pooled tensors instead of a full-map HBM pass.
    pooled_h = pooled_h * wn_chan[None, None, :]
    pooled_w = pooled_w * wn_chan[None, None, :]

    # conv1 (1x1, +bias) + bn1 folded + h_swish over the (H+W) pooled positions
    y = jnp.concatenate([pooled_h, pooled_w], axis=1)          # (n, h+wd, c)
    y = matmul_affine_act(y.reshape(n * (h + wd), c),
                          p["ca1_w"].T, p["ca1_s"], p["ca1_b"], "hswish")
    mip = y.shape[1]
    y = y.reshape(n, h + wd, mip)

    ones = jnp.ones((c,), jnp.float32)
    a_h = matmul_affine_act(y[:, :h, :].reshape(n * h, mip),
                            p["cah_w"].T, ones, p["cah_b"], "sigmoid")
    a_w = matmul_affine_act(y[:, h:, :].reshape(n * wd, mip),
                            p["caw_w"].T, ones, p["caw_b"], "sigmoid")
    # feats = wn_chan * xcat  =>  out = xcat * (wn_chan * a_h) * a_w
    a_h = a_h.reshape(n, h, c) * wn_chan[None, None, :]
    a_w = a_w.reshape(n, wd, c)
    return ca_apply(xcat, a_h, a_w)


# ------------------------- bilinear upsample (JAX) -------------------------- #
# TODO(synk): bilinear resize (nn.Upsample, align_corners=False) is a gather +
# lerp done in plain JAX; irregular clamped gathers don't map to a rectangular
# Pallas BlockSpec cleanly.

def bilinear_upsample(x, scale, h_axis, w_axis):
    in_h, in_w = x.shape[h_axis], x.shape[w_axis]

    def idx(out_size, in_size):
        src = (jnp.arange(out_size, dtype=jnp.float32) + 0.5) / scale - 0.5
        src = jnp.clip(src, 0.0, in_size - 1.0)
        i0 = jnp.floor(src).astype(jnp.int32)
        i1 = jnp.minimum(i0 + 1, in_size - 1)
        return i0, i1, src - i0.astype(jnp.float32)

    def expand(v, axis):
        shape = [1] * x.ndim
        shape[axis] = v.shape[0]
        return v.reshape(shape)

    h0, h1, fh = idx(in_h * scale, in_h)
    w0, w1, fw = idx(in_w * scale, in_w)
    top = (jnp.take(x, h0, axis=h_axis) * expand(1.0 - fh, h_axis)
           + jnp.take(x, h1, axis=h_axis) * expand(fh, h_axis))
    return (jnp.take(top, w0, axis=w_axis) * expand(1.0 - fw, w_axis)
            + jnp.take(top, w1, axis=w_axis) * expand(fw, w_axis))


# ------------------------------ full forward -------------------------------- #

@jax.jit
def asff_bifpnca3_forward(params, x1, x2, x3):
    """Level-0 forward of ASFF_BifpnCA_3 (inference, BatchNorm folded)."""
    # NCHW -> NHWC once at the boundary; everything below stays channel-last.
    x1n = jnp.transpose(x1, (0, 2, 3, 1))
    x2n = jnp.transpose(x2, (0, 2, 3, 1))
    x3n = jnp.transpose(x3, (0, 2, 3, 1))

    u2 = conv1x1_pallas(x2n, params["up2_w"], params["up2_s"],
                        params["up2_b"], "silu")
    u2 = bilinear_upsample(u2, 2, 1, 2)
    u3 = conv1x1_pallas(x3n, params["up3_w"], params["up3_s"],
                        params["up3_b"], "silu")
    u3 = bilinear_upsample(u3, 4, 1, 2)

    xcat = jnp.concatenate([x1n, u2, u3], axis=-1)          # (n, H, W, 3c)
    c0 = x1n.shape[-1]
    w = params["bifpn_w"]
    wn = w / (jnp.sum(w) + 1e-4)
    wn_chan = jnp.repeat(wn, c0)                            # (3c,) per-channel

    att = coord_att_pallas(xcat, params, wn_chan)
    out = conv3x3_pallas(att, params["cs_w"], params["cs_s"],
                         params["cs_b"], "silu")
    return jnp.transpose(out, (0, 3, 1, 2))                 # back to NCHW


# ------------------------- pure-JAX reference ------------------------------- #

def ref_forward(params, x1, x2, x3):
    hp = lax.Precision.HIGHEST

    def conv1x1(x, w, s, b, act):
        y = jnp.einsum("nchw,oc->nohw", x, w, precision=hp)
        y = y * s[None, :, None, None] + b[None, :, None, None]
        return _apply_act(y, act)

    u2 = bilinear_upsample(conv1x1(x2, params["up2_w"], params["up2_s"],
                                   params["up2_b"], "silu"), 2, 2, 3)
    u3 = bilinear_upsample(conv1x1(x3, params["up3_w"], params["up3_s"],
                                   params["up3_b"], "silu"), 4, 2, 3)
    w = params["bifpn_w"]
    wn = w / (jnp.sum(w) + 1e-4)
    feats = jnp.concatenate([wn[0] * x1, wn[1] * u2, wn[2] * u3], axis=1)

    n, c, h, wd = feats.shape
    xh = jnp.mean(feats, axis=3)
    xw = jnp.mean(feats, axis=2)
    y = jnp.concatenate([xh, xw], axis=2)                     # (n, c, h+wd)
    y = jnp.einsum("ncl,mc->nml", y, params["ca1_w"], precision=hp)
    y = y * params["ca1_s"][None, :, None] + params["ca1_b"][None, :, None]
    y = _apply_act(y, "hswish")
    yh, yw = y[:, :, :h], y[:, :, h:]
    a_h = _apply_act(jnp.einsum("nml,om->nol", yh, params["cah_w"],
                                precision=hp)
                     + params["cah_b"][None, :, None], "sigmoid")
    a_w = _apply_act(jnp.einsum("nml,om->nol", yw, params["caw_w"],
                                precision=hp)
                     + params["caw_b"][None, :, None], "sigmoid")
    att = feats * a_h[:, :, :, None] * a_w[:, :, None, :]

    y = lax.conv_general_dilated(att, params["cs_w"], (1, 1), "SAME",
                                 dimension_numbers=("NCHW", "OIHW", "NCHW"),
                                 precision=hp)
    y = (y * params["cs_s"][None, :, None, None]
         + params["cs_b"][None, :, None, None])
    return _apply_act(y, "silu")


# --------------------------------- params ----------------------------------- #

def init_params(key, inter_dim, channel):
    c0 = inter_dim                      # level-0: upsampled inputs -> channel[0]
    cat_c = 3 * c0
    mip = max(8, cat_c // 32)
    ks = jax.random.split(key, 14)

    def rnd(k, shape, s=0.25):
        return s * jax.random.normal(k, shape, jnp.float32)

    return {
        # Upsample 2x / 4x: Conv(k=1, bias=False) + BN + SiLU (BN folded).
        "up2_w": rnd(ks[0], (c0, channel[1])),
        "up2_s": 1.0 + rnd(ks[1], (c0,), 0.05),
        "up2_b": rnd(ks[2], (c0,), 0.05),
        "up3_w": rnd(ks[3], (c0, channel[2])),
        "up3_s": 1.0 + rnd(ks[4], (c0,), 0.05),
        "up3_b": rnd(ks[5], (c0,), 0.05),
        # BiFPN_Concat3 fusion weights.
        "bifpn_w": jnp.asarray([1.0, 0.5, 1.5], jnp.float32),
        # CoordAtt: conv1(+bias)+bn1 folded, then conv_h / conv_w (+bias).
        "ca1_w": rnd(ks[6], (mip, cat_c)),
        "ca1_s": 1.0 + rnd(ks[7], (mip,), 0.05),
        "ca1_b": rnd(ks[8], (mip,), 0.05),
        "cah_w": rnd(ks[9], (cat_c, mip)),
        "cah_b": rnd(ks[10], (cat_c,), 0.05),
        "caw_w": rnd(ks[11], (cat_c, mip)),
        "caw_b": rnd(ks[12], (cat_c,), 0.05),
        # conv_sample: Conv(3x3, bias=False) + BN + SiLU (BN folded).
        "cs_w": rnd(ks[13], (inter_dim, cat_c, 3, 3), 0.1),
        "cs_s": jnp.ones((inter_dim,), jnp.float32),
        "cs_b": jnp.zeros((inter_dim,), jnp.float32),
    }


if __name__ == "__main__":
    key = jax.random.PRNGKey(0)
    N, inter_dim = 2, 4
    channel = (4, 8, 16)           # level 0 requires channel[0] == inter_dim
    H = W = 16
    k0, k1, k2, k3 = jax.random.split(key, 4)
    x1 = jax.random.normal(k0, (N, channel[0], H, W), jnp.float32)
    x2 = jax.random.normal(k1, (N, channel[1], H // 2, W // 2), jnp.float32)
    x3 = jax.random.normal(k2, (N, channel[2], H // 4, W // 4), jnp.float32)
    params = init_params(k3, inter_dim, channel)

    out = asff_bifpnca3_forward(params, x1, x2, x3)
    jax.block_until_ready(out)

    ref = ref_forward(params, x1, x2, x3)
    assert out.shape == (N, inter_dim, H, W), out.shape
    assert bool(jnp.all(jnp.isfinite(out)))
    err = float(jnp.max(jnp.abs(out - ref)))
    assert err < 2e-2, f"max abs err vs reference: {err}"
    print("KERNEL_OK")
</pallas_src>

<mosaic_0001>
module attributes {stable_mosaic.version = 11 : i64} {
  func.func @_matmul_affine_act_kernel(%arg0: i32, %arg1: memref<128x8xf32, #tpu.memory_space<vmem>>, %arg2: memref<8x4xf32, #tpu.memory_space<vmem>>, %arg3: memref<1x4xf32, #tpu.memory_space<vmem>>, %arg4: memref<1x4xf32, #tpu.memory_space<vmem>>, %arg5: memref<128x4xf32, #tpu.memory_space<vmem>>) attributes {dimension_semantics = [#tpu.dimension_semantics<parallel>], iteration_bounds = array<i64: 1>, scalar_prefetch = 0 : i64, scratch_operands = 0 : i64, tpu.core_type = #tpu.core_type<tc>, window_params = [{transform_indices = @transform_0, window_bounds = array<i64: 128, 8>}, {pipeline_mode = #tpu.pipeline_mode<synchronous>, transform_indices = @transform_1, window_bounds = array<i64: 8, 4>}, {pipeline_mode = #tpu.pipeline_mode<synchronous>, transform_indices = @transform_2, window_bounds = array<i64: 1, 4>}, {pipeline_mode = #tpu.pipeline_mode<synchronous>, transform_indices = @transform_3, window_bounds = array<i64: 1, 4>}, {transform_indices = @transform_4, window_bounds = array<i64: 128, 4>}]} {
    %c0 = arith.constant 0 : index
    %c0_0 = arith.constant 0 : index
    %0 = vector.load %arg1[%c0, %c0_0] : memref<128x8xf32, #tpu.memory_space<vmem>>, vector<128x8xf32>
    %c0_1 = arith.constant 0 : index
    %c0_2 = arith.constant 0 : index
    %1 = vector.load %arg2[%c0_1, %c0_2] : memref<8x4xf32, #tpu.memory_space<vmem>>, vector<8x4xf32>
    %cst = arith.constant dense<0.000000e+00> : vector<128x4xf32>
    %2 = tpu.matmul %0, %1, %cst {dimension_numbers = #tpu.dot_dimension_numbers<[1], [0], [0], [1], [0, 0, 1, 1], [], []>} : vector<128x8xf32>, vector<8x4xf32>, vector<128x4xf32> -> vector<128x4xf32>
    %c0_3 = arith.constant 0 : index
    %c0_4 = arith.constant 0 : index
    %3 = vector.load %arg3[%c0_3, %c0_4] : memref<1x4xf32, #tpu.memory_space<vmem>>, vector<1x4xf32>
    %4 = vector.broadcast %3 : vector<1x4xf32> to vector<128x4xf32>
    %5 = arith.mulf %2, %4 : vector<128x4xf32>
    %c0_5 = arith.constant 0 : index
    %c0_6 = arith.constant 0 : index
    %6 = vector.load %arg4[%c0_5, %c0_6] : memref<1x4xf32, #tpu.memory_space<vmem>>, vector<1x4xf32>
    %7 = vector.broadcast %6 : vector<1x4xf32> to vector<128x4xf32>
    %8 = arith.addf %5, %7 : vector<128x4xf32>
    %cst_7 = arith.constant 0.000000e+00 : f32
    %9 = vector.broadcast %cst_7 : f32 to vector<128x4xf32>
    %10 = arith.subf %9, %8 : vector<128x4xf32>
    %11 = math.exp %10 : vector<128x4xf32>
    %cst_8 = arith.constant 1.000000e+00 : f32
    %12 = vector.broadcast %cst_8 : f32 to vector<128x4xf32>
    %13 = arith.addf %12, %11 : vector<128x4xf32>
    %cst_9 = arith.constant 1.000000e+00 : f32
    %14 = vector.broadcast %cst_9 : f32 to vector<128x4xf32>
    %15 = arith.divf %14, %13 : vector<128x4xf32>
    %16 = arith.mulf %8, %15 : vector<128x4xf32>
    %c0_10 = arith.constant 0 : index
    %c0_11 = arith.constant 0 : index
    %17 = vector.load %arg5[%c0_10, %c0_11] : memref<128x4xf32, #tpu.memory_space<vmem>>, vector<128x4xf32>
    tpu.vector_store %arg5[%c0_10, %c0_11], %16 {strides = array<i32>} : memref<128x4xf32, #tpu.memory_space<vmem>>, vector<128x4xf32>,
    return
  }
  func.func @transform_0(%arg0: i32) -> (i32, i32) {
    %c0_i32 = arith.constant 0 : i32
    %c0_i32_0 = arith.constant 0 : i32
    return %arg0, %c0_i32 : i32, i32
  }
  func.func @transform_1(%arg0: i32) -> (i32, i32) {
    %c0_i32 = arith.constant 0 : i32
    %c0_i32_0 = arith.constant 0 : i32
    %c0_i32_1 = arith.constant 0 : i32
    return %c0_i32, %c0_i32_0 : i32, i32
  }
  func.func @transform_2(%arg0: i32) -> (i32, i32) {
    %c0_i32 = arith.constant 0 : i32
    %c0_i32_0 = arith.constant 0 : i32
    %c0_i32_1 = arith.constant 0 : i32
    return %c0_i32, %c0_i32_0 : i32, i32
  }
  func.func @transform_3(%arg0: i32) -> (i32, i32) {
    %c0_i32 = arith.constant 0 : i32
    %c0_i32_0 = arith.constant 0 : i32
    %c0_i32_1 = arith.constant 0 : i32
    return %c0_i32, %c0_i32_0 : i32, i32
  }
  func.func @transform_4(%arg0: i32) -> (i32, i32) {
    %c0_i32 = arith.constant 0 : i32
    %c0_i32_0 = arith.constant 0 : i32
    return %arg0, %c0_i32 : i32, i32
  }
}

module attributes {stable_mosaic.version = 11 : i64} {
  func.func @_matmul_affine_act_kernel(%arg0: i32, %arg1: memref<32x16xf32, #tpu.memory_space<vmem>>, %arg2: memref<16x4xf32, #tpu.memory_space<vmem>>, %arg3: memref<1x4xf32, #tpu.memory_space<vmem>>, %arg4: memref<1x4xf32, #tpu.memory_space<vmem>>, %arg5: memref<32x4xf32, #tpu.memory_space<vmem>>) attributes {dimension_semantics = [#tpu.dimension_semantics<parallel>], iteration_bounds = array<i64: 1>, scalar_prefetch = 0 : i64, scratch_operands = 0 : i64, tpu.core_type = #tpu.core_type<tc>, window_params = [{transform_indices = @transform_0, window_bounds = array<i64: 32, 16>}, {pipeline_mode = #tpu.pipeline_mode<synchronous>, transform_indices = @transform_1, window_bounds = array<i64: 16, 4>}, {pipeline_mode = #tpu.pipeline_mode<synchronous>, transform_indices = @transform_2, window_bounds = array<i64: 1, 4>}, {pipeline_mode = #tpu.pipeline_mode<synchronous>, transform_indices = @transform_3, window_bounds = array<i64: 1, 4>}, {transform_indices = @transform_4, window_bounds = array<i64: 32, 4>}]} {
    %c0 = arith.constant 0 : index
    %c0_0 = arith.constant 0 : index
    %0 = vector.load %arg1[%c0, %c0_0] : memref<32x16xf32, #tpu.memory_space<vmem>>, vector<32x16xf32>
    %c0_1 = arith.constant 0 : index
    %c0_2 = arith.constant 0 : index
    %1 = vector.load %arg2[%c0_1, %c0_2] : memref<16x4xf32, #tpu.memory_space<vmem>>, vector<16x4xf32>
    %cst = arith.constant dense<0.000000e+00> : vector<32x4xf32>
    %2 = tpu.matmul %0, %1, %cst {dimension_numbers = #tpu.dot_dimension_numbers<[1], [0], [0], [1], [0, 0, 1, 1], [], []>} : vector<32x16xf32>, vector<16x4xf32>, vector<32x4xf32> -> vector<32x4xf32>
    %c0_3 = arith.constant 0 : index
    %c0_4 = arith.constant 0 : index
    %3 = vector.load %arg3[%c0_3, %c0_4] : memref<1x4xf32, #tpu.memory_space<vmem>>, vector<1x4xf32>
    %4 = vector.broadcast %3 : vector<1x4xf32> to vector<32x4xf32>
    %5 = arith.mulf %2, %4 : vector<32x4xf32>
    %c0_5 = arith.constant 0 : index
    %c0_6 = arith.constant 0 : index
    %6 = vector.load %arg4[%c0_5, %c0_6] : memref<1x4xf32, #tpu.memory_space<vmem>>, vector<1x4xf32>
    %7 = vector.broadcast %6 : vector<1x4xf32> to vector<32x4xf32>
    %8 = arith.addf %5, %7 : vector<32x4xf32>
    %cst_7 = arith.constant 0.000000e+00 : f32
    %9 = vector.broadcast %cst_7 : f32 to vector<32x4xf32>
    %10 = arith.subf %9, %8 : vector<32x4xf32>
    %11 = math.exp %10 : vector<32x4xf32>
    %cst_8 = arith.constant 1.000000e+00 : f32
    %12 = vector.broadcast %cst_8 : f32 to vector<32x4xf32>
    %13 = arith.addf %12, %11 : vector<32x4xf32>
    %cst_9 = arith.constant 1.000000e+00 : f32
    %14 = vector.broadcast %cst_9 : f32 to vector<32x4xf32>
    %15 = arith.divf %14, %13 : vector<32x4xf32>
    %16 = arith.mulf %8, %15 : vector<32x4xf32>
    %c0_10 = arith.constant 0 : index
    %c0_11 = arith.constant 0 : index
    %17 = vector.load %arg5[%c0_10, %c0_11] : memref<32x4xf32, #tpu.memory_space<vmem>>, vector<32x4xf32>
    tpu.vector_store %arg5[%c0_10, %c0_11], %16 {strides = array<i32>} : memref<32x4xf32, #tpu.memory_space<vmem>>, vector<32x4xf32>,
    return
  }
  func.func @transform_0(%arg0: i32) -> (i32, i32) {
    %c0_i32 = arith.constant 0 : i32
    %c0_i32_0 = arith.constant 0 : i32
    return %arg0, %c0_i32 : i32, i32
  }
  func.func @transform_1(%arg0: i32) -> (i32, i32) {
    %c0_i32 = arith.constant 0 : i32
    %c0_i32_0 = arith.constant 0 : i32
    %c0_i32_1 = arith.constant 0 : i32
    return %c0_i32, %c0_i32_0 : i32, i32
  }
  func.func @transform_2(%arg0: i32) -> (i32, i32) {
    %c0_i32 = arith.constant 0 : i32
    %c0_i32_0 = arith.constant 0 : i32
    %c0_i32_1 = arith.constant 0 : i32
    return %c0_i32, %c0_i32_0 : i32, i32
  }
  func.func @transform_3(%arg0: i32) -> (i32, i32) {
    %c0_i32 = arith.constant 0 : i32
    %c0_i32_0 = arith.constant 0 : i32
    %c0_i32_1 = arith.constant 0 : i32
    return %c0_i32, %c0_i32_0 : i32, i32
  }
  func.func @transform_4(%arg0: i32) -> (i32, i32) {
    %c0_i32 = arith.constant 0 : i32
    %c0_i32_0 = arith.constant 0 : i32
    return %arg0, %c0_i32 : i32, i32
  }
}

module attributes {stable_mosaic.version = 11 : i64} {
  func.func @_ca_pool_kernel(%arg0: i32, %arg1: i32, %arg2: memref<1x16x16x12xf32, #tpu.memory_space<vmem>>, %arg3: memref<1x16x12xf32, #tpu.memory_space<vmem>>, %arg4: memref<1x16x12xf32, #tpu.memory_space<vmem>>) attributes {dimension_semantics = [#tpu.dimension_semantics<parallel>, #tpu.dimension_semantics<parallel>], iteration_bounds = array<i64: 2, 1>, scalar_prefetch = 0 : i64, scratch_operands = 0 : i64, tpu.core_type = #tpu.core_type<tc>, window_params = [{transform_indices = @transform_0, window_bounds = array<i64: 1, 16, 16, 12>}, {transform_indices = @transform_1, window_bounds = array<i64: 1, 16, 12>}, {transform_indices = @transform_2, window_bounds = array<i64: 1, 16, 12>}]} {
    %c0 = arith.constant 0 : index
    %c0_0 = arith.constant 0 : index
    %c0_1 = arith.constant 0 : index
    %c0_2 = arith.constant 0 : index
    %0 = vector.load %arg2[%c0, %c0_0, %c0_1, %c0_2] : memref<1x16x16x12xf32, #tpu.memory_space<vmem>>, vector<1x16x16x12xf32>
    %cst = arith.constant dense<0.000000e+00> : vector<1x16x12xf32>
    %1 = vector.multi_reduction <add>, %0, %cst [2] : vector<1x16x16x12xf32> to vector<1x16x12xf32>
    %cst_3 = arith.constant 1.600000e+01 : f32
    %2 = vector.broadcast %cst_3 : f32 to vector<1x16x12xf32>
    %3 = arith.divf %1, %2 : vector<1x16x12xf32>
    %c0_4 = arith.constant 0 : index
    %c0_5 = arith.constant 0 : index
    %c0_6 = arith.constant 0 : index
    %4 = vector.load %arg3[%c0_4, %c0_5, %c0_6] : memref<1x16x12xf32, #tpu.memory_space<vmem>>, vector<1x16x12xf32>
    tpu.vector_store %arg3[%c0_4, %c0_5, %c0_6], %3 {strides = array<i32>} : memref<1x16x12xf32, #tpu.memory_space<vmem>>, vector<1x16x12xf32>,
    %cst_7 = arith.constant dense<0.000000e+00> : vector<1x16x12xf32>
    %5 = vector.multi_reduction <add>, %0, %cst_7 [1] : vector<1x16x16x12xf32> to vector<1x16x12xf32>
    %cst_8 = arith.constant 1.600000e+01 : f32
    %6 = vector.broadcast %cst_8 : f32 to vector<1x16x12xf32>
    %7 = arith.divf %5, %6 : vector<1x16x12xf32>
    %c0_9 = arith.constant 0 : index
    %c0_10 = arith.constant 0 : index
    %c0_11 = arith.constant 0 : index
    %8 = vector.load %arg4[%c0_9, %c0_10, %c0_11] : memref<1x16x12xf32, #tpu.memory_space<vmem>>, vector<1x16x12xf32>
    tpu.vector_store %arg4[%c0_9, %c0_10, %c0_11], %7 {strides = array<i32>} : memref<1x16x12xf32, #tpu.memory_space<vmem>>, vector<1x16x12xf32>,
    return
  }
  func.func @transform_0(%arg0: i32, %arg1: i32) -> (i32, i32, i32, i32) {
    %c0_i32 = arith.constant 0 : i32
    %c0_i32_0 = arith.constant 0 : i32
    %c0_i32_1 = arith.constant 0 : i32
    return %arg0, %c0_i32, %c0_i32_0, %arg1 : i32, i32, i32, i32
  }
  func.func @transform_1(%arg0: i32, %arg1: i32) -> (i32, i32, i32) {
    %c0_i32 = arith.constant 0 : i32
    %c0_i32_0 = arith.constant 0 : i32
    return %arg0, %c0_i32, %arg1 : i32, i32, i32
  }
  func.func @transform_2(%arg0: i32, %arg1: i32) -> (i32, i32, i32) {
    %c0_i32 = arith.constant 0 : i32
    %c0_i32_0 = arith.constant 0 : i32
    return %arg0, %c0_i32, %arg1 : i32, i32, i32
  }
}

module attributes {stable_mosaic.version = 11 : i64} {
  func.func @_matmul_affine_act_kernel(%arg0: i32, %arg1: memref<64x12xf32, #tpu.memory_space<vmem>>, %arg2: memref<12x8xf32, #tpu.memory_space<vmem>>, %arg3: memref<1x8xf32, #tpu.memory_space<vmem>>, %arg4: memref<1x8xf32, #tpu.memory_space<vmem>>, %arg5: memref<64x8xf32, #tpu.memory_space<vmem>>) attributes {dimension_semantics = [#tpu.dimension_semantics<parallel>], iteration_bounds = array<i64: 1>, scalar_prefetch = 0 : i64, scratch_operands = 0 : i64, tpu.core_type = #tpu.core_type<tc>, window_params = [{transform_indices = @transform_0, window_bounds = array<i64: 64, 12>}, {pipeline_mode = #tpu.pipeline_mode<synchronous>, transform_indices = @transform_1, window_bounds = array<i64: 12, 8>}, {pipeline_mode = #tpu.pipeline_mode<synchronous>, transform_indices = @transform_2, window_bounds = array<i64: 1, 8>}, {pipeline_mode = #tpu.pipeline_mode<synchronous>, transform_indices = @transform_3, window_bounds = array<i64: 1, 8>}, {transform_indices = @transform_4, window_bounds = array<i64: 64, 8>}]} {
    %c0 = arith.constant 0 : index
    %c0_0 = arith.constant 0 : index
    %0 = vector.load %arg1[%c0, %c0_0] : memref<64x12xf32, #tpu.memory_space<vmem>>, vector<64x12xf32>
    %c0_1 = arith.constant 0 : index
    %c0_2 = arith.constant 0 : index
    %1 = vector.load %arg2[%c0_1, %c0_2] : memref<12x8xf32, #tpu.memory_space<vmem>>, vector<12x8xf32>
    %cst = arith.constant dense<0.000000e+00> : vector<64x8xf32>
    %2 = tpu.matmul %0, %1, %cst {dimension_numbers = #tpu.dot_dimension_numbers<[1], [0], [0], [1], [0, 0, 1, 1], [], []>} : vector<64x12xf32>, vector<12x8xf32>, vector<64x8xf32> -> vector<64x8xf32>
    %c0_3 = arith.constant 0 : index
    %c0_4 = arith.constant 0 : index
    %3 = vector.load %arg3[%c0_3, %c0_4] : memref<1x8xf32, #tpu.memory_space<vmem>>, vector<1x8xf32>
    %4 = vector.broadcast %3 : vector<1x8xf32> to vector<64x8xf32>
    %5 = arith.mulf %2, %4 : vector<64x8xf32>
    %c0_5 = arith.constant 0 : index
    %c0_6 = arith.constant 0 : index
    %6 = vector.load %arg4[%c0_5, %c0_6] : memref<1x8xf32, #tpu.memory_space<vmem>>, vector<1x8xf32>
    %7 = vector.broadcast %6 : vector<1x8xf32> to vector<64x8xf32>
    %8 = arith.addf %5, %7 : vector<64x8xf32>
    %cst_7 = arith.constant 3.000000e+00 : f32
    %9 = vector.broadcast %cst_7 : f32 to vector<64x8xf32>
    %10 = arith.addf %8, %9 : vector<64x8xf32>
    %cst_8 = arith.constant 0.000000e+00 : f32
    %cst_9 = arith.constant 6.000000e+00 : f32
    %11 = vector.broadcast %cst_8 : f32 to vector<64x8xf32>
    %12 = arith.maximumf %11, %10 : vector<64x8xf32>
    %13 = vector.broadcast %cst_9 : f32 to vector<64x8xf32>
    %14 = arith.minimumf %13, %12 : vector<64x8xf32>
    %cst_10 = arith.constant 0.166666672 : f32
    %15 = vector.broadcast %cst_10 : f32 to vector<64x8xf32>
    %16 = arith.mulf %14, %15 : vector<64x8xf32>
    %17 = arith.mulf %8, %16 : vector<64x8xf32>
    %c0_11 = arith.constant 0 : index
    %c0_12 = arith.constant 0 : index
    %18 = vector.load %arg5[%c0_11, %c0_12] : memref<64x8xf32, #tpu.memory_space<vmem>>, vector<64x8xf32>
    tpu.vector_store %arg5[%c0_11, %c0_12], %17 {strides = array<i32>} : memref<64x8xf32, #tpu.memory_space<vmem>>, vector<64x8xf32>,
    return
  }
  func.func @transform_0(%arg0: i32) -> (i32, i32) {
    %c0_i32 = arith.constant 0 : i32
    %c0_i32_0 = arith.constant 0 : i32
    return %arg0, %c0_i32 : i32, i32
  }
  func.func @transform_1(%arg0: i32) -> (i32, i32) {
    %c0_i32 = arith.constant 0 : i32
    %c0_i32_0 = arith.constant 0 : i32
    %c0_i32_1 = arith.constant 0 : i32
    return %c0_i32, %c0_i32_0 : i32, i32
  }
  func.func @transform_2(%arg0: i32) -> (i32, i32) {
    %c0_i32 = arith.constant 0 : i32
    %c0_i32_0 = arith.constant 0 : i32
    %c0_i32_1 = arith.constant 0 : i32
    return %c0_i32, %c0_i32_0 : i32, i32
  }
  func.func @transform_3(%arg0: i32) -> (i32, i32) {
    %c0_i32 = arith.constant 0 : i32
    %c0_i32_0 = arith.constant 0 : i32
    %c0_i32_1 = arith.constant 0 : i32
    return %c0_i32, %c0_i32_0 : i32, i32
  }
  func.func @transform_4(%arg0: i32) -> (i32, i32) {
    %c0_i32 = arith.constant 0 : i32
    %c0_i32_0 = arith.constant 0 : i32
    return %arg0, %c0_i32 : i32, i32
  }
}

module attributes {stable_mosaic.version = 11 : i64} {
  func.func @_matmul_affine_act_kernel(%arg0: i32, %arg1: memref<32x8xf32, #tpu.memory_space<vmem>>, %arg2: memref<8x12xf32, #tpu.memory_space<vmem>>, %arg3: memref<1x12xf32, #tpu.memory_space<vmem>>, %arg4: memref<1x12xf32, #tpu.memory_space<vmem>>, %arg5: memref<32x12xf32, #tpu.memory_space<vmem>>) attributes {dimension_semantics = [#tpu.dimension_semantics<parallel>], iteration_bounds = array<i64: 1>, scalar_prefetch = 0 : i64, scratch_operands = 0 : i64, tpu.core_type = #tpu.core_type<tc>, window_params = [{transform_indices = @transform_0, window_bounds = array<i64: 32, 8>}, {pipeline_mode = #tpu.pipeline_mode<synchronous>, transform_indices = @transform_1, window_bounds = array<i64: 8, 12>}, {pipeline_mode = #tpu.pipeline_mode<synchronous>, transform_indices = @transform_2, window_bounds = array<i64: 1, 12>}, {pipeline_mode = #tpu.pipeline_mode<synchronous>, transform_indices = @transform_3, window_bounds = array<i64: 1, 12>}, {transform_indices = @transform_4, window_bounds = array<i64: 32, 12>}]} {
    %c0 = arith.constant 0 : index
    %c0_0 = arith.constant 0 : index
    %0 = vector.load %arg1[%c0, %c0_0] : memref<32x8xf32, #tpu.memory_space<vmem>>, vector<32x8xf32>
    %c0_1 = arith.constant 0 : index
    %c0_2 = arith.constant 0 : index
    %1 = vector.load %arg2[%c0_1, %c0_2] : memref<8x12xf32, #tpu.memory_space<vmem>>, vector<8x12xf32>
    %cst = arith.constant dense<0.000000e+00> : vector<32x12xf32>
    %2 = tpu.matmul %0, %1, %cst {dimension_numbers = #tpu.dot_dimension_numbers<[1], [0], [0], [1], [0, 0, 1, 1], [], []>} : vector<32x8xf32>, vector<8x12xf32>, vector<32x12xf32> -> vector<32x12xf32>
    %c0_3 = arith.constant 0 : index
    %c0_4 = arith.constant 0 : index
    %3 = vector.load %arg3[%c0_3, %c0_4] : memref<1x12xf32, #tpu.memory_space<vmem>>, vector<1x12xf32>
    %4 = vector.broadcast %3 : vector<1x12xf32> to vector<32x12xf32>
    %5 = arith.mulf %2, %4 : vector<32x12xf32>
    %c0_5 = arith.constant 0 : index
    %c0_6 = arith.constant 0 : index
    %6 = vector.load %arg4[%c0_5, %c0_6] : memref<1x12xf32, #tpu.memory_space<vmem>>, vector<1x12xf32>
    %7 = vector.broadcast %6 : vector<1x12xf32> to vector<32x12xf32>
    %8 = arith.addf %5, %7 : vector<32x12xf32>
    %cst_7 = arith.constant 0.000000e+00 : f32
    %9 = vector.broadcast %cst_7 : f32 to vector<32x12xf32>
    %10 = arith.subf %9, %8 : vector<32x12xf32>
    %11 = math.exp %10 : vector<32x12xf32>
    %cst_8 = arith.constant 1.000000e+00 : f32
    %12 = vector.broadcast %cst_8 : f32 to vector<32x12xf32>
    %13 = arith.addf %12, %11 : vector<32x12xf32>
    %cst_9 = arith.constant 1.000000e+00 : f32
    %14 = vector.broadcast %cst_9 : f32 to vector<32x12xf32>
    %15 = arith.divf %14, %13 : vector<32x12xf32>
    %c0_10 = arith.constant 0 : index
    %c0_11 = arith.constant 0 : index
    %16 = vector.load %arg5[%c0_10, %c0_11] : memref<32x12xf32, #tpu.memory_space<vmem>>, vector<32x12xf32>
    tpu.vector_store %arg5[%c0_10, %c0_11], %15 {strides = array<i32>} : memref<32x12xf32, #tpu.memory_space<vmem>>, vector<32x12xf32>,
    return
  }
  func.func @transform_0(%arg0: i32) -> (i32, i32) {
    %c0_i32 = arith.constant 0 : i32
    %c0_i32_0 = arith.constant 0 : i32
    return %arg0, %c0_i32 : i32, i32
  }
  func.func @transform_1(%arg0: i32) -> (i32, i32) {
    %c0_i32 = arith.constant 0 : i32
    %c0_i32_0 = arith.constant 0 : i32
    %c0_i32_1 = arith.constant 0 : i32
    return %c0_i32, %c0_i32_0 : i32, i32
  }
  func.func @transform_2(%arg0: i32) -> (i32, i32) {
    %c0_i32 = arith.constant 0 : i32
    %c0_i32_0 = arith.constant 0 : i32
    %c0_i32_1 = arith.constant 0 : i32
    return %c0_i32, %c0_i32_0 : i32, i32
  }
  func.func @transform_3(%arg0: i32) -> (i32, i32) {
    %c0_i32 = arith.constant 0 : i32
    %c0_i32_0 = arith.constant 0 : i32
    %c0_i32_1 = arith.constant 0 : i32
    return %c0_i32, %c0_i32_0 : i32, i32
  }
  func.func @transform_4(%arg0: i32) -> (i32, i32) {
    %c0_i32 = arith.constant 0 : i32
    %c0_i32_0 = arith.constant 0 : i32
    return %arg0, %c0_i32 : i32, i32
  }
}

module attributes {stable_mosaic.version = 11 : i64} {
  func.func @_ca_apply_kernel(%arg0: i32, %arg1: i32, %arg2: memref<1x16x16x12xf32, #tpu.memory_space<vmem>>, %arg3: memref<1x16x12xf32, #tpu.memory_space<vmem>>, %arg4: memref<1x16x12xf32, #tpu.memory_space<vmem>>, %arg5: memref<1x16x16x12xf32, #tpu.memory_space<vmem>>) attributes {dimension_semantics = [#tpu.dimension_semantics<parallel>, #tpu.dimension_semantics<parallel>], iteration_bounds = array<i64: 2, 1>, scalar_prefetch = 0 : i64, scratch_operands = 0 : i64, tpu.core_type = #tpu.core_type<tc>, window_params = [{transform_indices = @transform_0, window_bounds = array<i64: 1, 16, 16, 12>}, {transform_indices = @transform_1, window_bounds = array<i64: 1, 16, 12>}, {transform_indices = @transform_2, window_bounds = array<i64: 1, 16, 12>}, {transform_indices = @transform_3, window_bounds = array<i64: 1, 16, 16, 12>}]} {
    %c0 = arith.constant 0 : index
    %c0_0 = arith.constant 0 : index
    %c0_1 = arith.constant 0 : index
    %c0_2 = arith.constant 0 : index
    %0 = vector.load %arg2[%c0, %c0_0, %c0_1, %c0_2] : memref<1x16x16x12xf32, #tpu.memory_space<vmem>>, vector<1x16x16x12xf32>
    %c0_3 = arith.constant 0 : index
    %c0_4 = arith.constant 0 : index
    %c0_5 = arith.constant 0 : index
    %1 = vector.load %arg3[%c0_3, %c0_4, %c0_5] : memref<1x16x12xf32, #tpu.memory_space<vmem>>, vector<1x16x12xf32>
    %c0_6 = arith.constant 0 : index
    %c0_7 = arith.constant 0 : index
    %c0_8 = arith.constant 0 : index
    %2 = vector.load %arg4[%c0_6, %c0_7, %c0_8] : memref<1x16x12xf32, #tpu.memory_space<vmem>>, vector<1x16x12xf32>
    %3 = vector.shape_cast %1 : vector<1x16x12xf32> to vector<1x16x1x12xf32>
    %4 = vector.broadcast %3 : vector<1x16x1x12xf32> to vector<1x16x16x12xf32>
    %5 = arith.mulf %0, %4 : vector<1x16x16x12xf32>
    %6 = vector.shape_cast %2 : vector<1x16x12xf32> to vector<1x1x16x12xf32>
    %7 = vector.broadcast %6 : vector<1x1x16x12xf32> to vector<1x16x16x12xf32>
    %8 = arith.mulf %5, %7 : vector<1x16x16x12xf32>
    %c0_9 = arith.constant 0 : index
    %c0_10 = arith.constant 0 : index
    %c0_11 = arith.constant 0 : index
    %c0_12 = arith.constant 0 : index
    %9 = vector.load %arg5[%c0_9, %c0_10, %c0_11, %c0_12] : memref<1x16x16x12xf32, #tpu.memory_space<vmem>>, vector<1x16x16x12xf32>
    tpu.vector_store %arg5[%c0_9, %c0_10, %c0_11, %c0_12], %8 {strides = array<i32>} : memref<1x16x16x12xf32, #tpu.memory_space<vmem>>, vector<1x16x16x12xf32>,
    return
  }
  func.func @transform_0(%arg0: i32, %arg1: i32) -> (i32, i32, i32, i32) {
    %c0_i32 = arith.constant 0 : i32
    %c0_i32_0 = arith.constant 0 : i32
    %c0_i32_1 = arith.constant 0 : i32
    return %arg0, %arg1, %c0_i32, %c0_i32_0 : i32, i32, i32, i32
  }
  func.func @transform_1(%arg0: i32, %arg1: i32) -> (i32, i32, i32) {
    %c0_i32 = arith.constant 0 : i32
    %c0_i32_0 = arith.constant 0 : i32
    return %arg0, %arg1, %c0_i32 : i32, i32, i32
  }
  func.func @transform_2(%arg0: i32, %arg1: i32) -> (i32, i32, i32) {
    %c0_i32 = arith.constant 0 : i32
    %c0_i32_0 = arith.constant 0 : i32
    %c0_i32_1 = arith.constant 0 : i32
    return %arg0, %c0_i32, %c0_i32_0 : i32, i32, i32
  }
  func.func @transform_3(%arg0: i32, %arg1: i32) -> (i32, i32, i32, i32) {
    %c0_i32 = arith.constant 0 : i32
    %c0_i32_0 = arith.constant 0 : i32
    %c0_i32_1 = arith.constant 0 : i32
    return %arg0, %arg1, %c0_i32, %c0_i32_0 : i32, i32, i32, i32
  }
}

module attributes {stable_mosaic.version = 11 : i64} {
  func.func @_matmul_affine_act_kernel(%arg0: i32, %arg1: memref<512x108xf32, #tpu.memory_space<vmem>>, %arg2: memref<108x4xf32, #tpu.memory_space<vmem>>, %arg3: memref<1x4xf32, #tpu.memory_space<vmem>>, %arg4: memref<1x4xf32, #tpu.memory_space<vmem>>, %arg5: memref<512x4xf32, #tpu.memory_space<vmem>>) attributes {dimension_semantics = [#tpu.dimension_semantics<parallel>], iteration_bounds = array<i64: 1>, scalar_prefetch = 0 : i64, scratch_operands = 0 : i64, tpu.core_type = #tpu.core_type<tc>, window_params = [{transform_indices = @transform_0, window_bounds = array<i64: 512, 108>}, {pipeline_mode = #tpu.pipeline_mode<synchronous>, transform_indices = @transform_1, window_bounds = array<i64: 108, 4>}, {pipeline_mode = #tpu.pipeline_mode<synchronous>, transform_indices = @transform_2, window_bounds = array<i64: 1, 4>}, {pipeline_mode = #tpu.pipeline_mode<synchronous>, transform_indices = @transform_3, window_bounds = array<i64: 1, 4>}, {transform_indices = @transform_4, window_bounds = array<i64: 512, 4>}]} {
    %c0 = arith.constant 0 : index
    %c0_0 = arith.constant 0 : index
    %0 = vector.load %arg1[%c0, %c0_0] : memref<512x108xf32, #tpu.memory_space<vmem>>, vector<512x108xf32>
    %c0_1 = arith.constant 0 : index
    %c0_2 = arith.constant 0 : index
    %1 = vector.load %arg2[%c0_1, %c0_2] : memref<108x4xf32, #tpu.memory_space<vmem>>, vector<108x4xf32>
    %cst = arith.constant dense<0.000000e+00> : vector<512x4xf32>
    %2 = tpu.matmul %0, %1, %cst {dimension_numbers = #tpu.dot_dimension_numbers<[1], [0], [0], [1], [0, 0, 1, 1], [], []>} : vector<512x108xf32>, vector<108x4xf32>, vector<512x4xf32> -> vector<512x4xf32>
    %c0_3 = arith.constant 0 : index
    %c0_4 = arith.constant 0 : index
    %3 = vector.load %arg3[%c0_3, %c0_4] : memref<1x4xf32, #tpu.memory_space<vmem>>, vector<1x4xf32>
    %4 = vector.broadcast %3 : vector<1x4xf32> to vector<512x4xf32>
    %5 = arith.mulf %2, %4 : vector<512x4xf32>
    %c0_5 = arith.constant 0 : index
    %c0_6 = arith.constant 0 : index
    %6 = vector.load %arg4[%c0_5, %c0_6] : memref<1x4xf32, #tpu.memory_space<vmem>>, vector<1x4xf32>
    %7 = vector.broadcast %6 : vector<1x4xf32> to vector<512x4xf32>
    %8 = arith.addf %5, %7 : vector<512x4xf32>
    %cst_7 = arith.constant 0.000000e+00 : f32
    %9 = vector.broadcast %cst_7 : f32 to vector<512x4xf32>
    %10 = arith.subf %9, %8 : vector<512x4xf32>
    %11 = math.exp %10 : vector<512x4xf32>
    %cst_8 = arith.constant 1.000000e+00 : f32
    %12 = vector.broadcast %cst_8 : f32 to vector<512x4xf32>
    %13 = arith.addf %12, %11 : vector<512x4xf32>
    %cst_9 = arith.constant 1.000000e+00 : f32
    %14 = vector.broadcast %cst_9 : f32 to vector<512x4xf32>
    %15 = arith.divf %14, %13 : vector<512x4xf32>
    %16 = arith.mulf %8, %15 : vector<512x4xf32>
    %c0_10 = arith.constant 0 : index
    %c0_11 = arith.constant 0 : index
    %17 = vector.load %arg5[%c0_10, %c0_11] : memref<512x4xf32, #tpu.memory_space<vmem>>, vector<512x4xf32>
    tpu.vector_store %arg5[%c0_10, %c0_11], %16 {strides = array<i32>} : memref<512x4xf32, #tpu.memory_space<vmem>>, vector<512x4xf32>,
    return
  }
  func.func @transform_0(%arg0: i32) -> (i32, i32) {
    %c0_i32 = arith.constant 0 : i32
    %c0_i32_0 = arith.constant 0 : i32
    return %arg0, %c0_i32 : i32, i32
  }
  func.func @transform_1(%arg0: i32) -> (i32, i32) {
    %c0_i32 = arith.constant 0 : i32
    %c0_i32_0 = arith.constant 0 : i32
    %c0_i32_1 = arith.constant 0 : i32
    return %c0_i32, %c0_i32_0 : i32, i32
  }
  func.func @transform_2(%arg0: i32) -> (i32, i32) {
    %c0_i32 = arith.constant 0 : i32
    %c0_i32_0 = arith.constant 0 : i32
    %c0_i32_1 = arith.constant 0 : i32
    return %c0_i32, %c0_i32_0 : i32, i32
  }
  func.func @transform_3(%arg0: i32) -> (i32, i32) {
    %c0_i32 = arith.constant 0 : i32
    %c0_i32_0 = arith.constant 0 : i32
    %c0_i32_1 = arith.constant 0 : i32
    return %c0_i32, %c0_i32_0 : i32, i32
  }
  func.func @transform_4(%arg0: i32) -> (i32, i32) {
    %c0_i32 = arith.constant 0 : i32
    %c0_i32_0 = arith.constant 0 : i32
    return %arg0, %c0_i32 : i32, i32
  }
}

</mosaic_0001>

<bundles_post_ra>
// kernel: asff_bifpnca3_forward.8
= control target key start
LH: loop header
LB: loop body
LE: loop exit
PB: predicated region body
PF: predicated region fallthrough
CT: control target
= control target key end

     0   :  { %9 = vsyncpa [#allocation3], 0  ;;  %s1130_s0 = inlined_call_operand.vmem [shape: f32[128,8], index: 0, kind: input, shape index: {}]   ;;  %s1131_s1 = inlined_call_operand.vmem [shape: f32[8,4], index: 1, kind: input, shape index: {}]   ;;  %s1132_s2 = inlined_call_operand.hbm [shape: f32[1,4], index: 2, kind: input, shape index: {}]   ;;  %s1133_s3 = inlined_call_operand.hbm [shape: f32[1,4], index: 3, kind: input, shape index: {}]   ;;  %s1134_s4 = inlined_call_operand.vmem [shape: f32[128,4], index: 4, kind: output, shape index: {}]  }
   0x1   :  { %s20_s17 = sshll.u32 %s1132_s2, 4  ;;  %s21_s17 = int_to_ptr.hbm [resolvable:$true] %s20_s17 }
   0x2   :  { %10 = vsyncpa [#allocation5], 0  ;;  %s698_s18 = smov [#allocation2]   ;;  %s31_s22 = sshll.u32 %s1133_s3, 4  ;;  %s32_s22 = int_to_ptr.hbm [resolvable:$true] %s31_s22 }
   0x3   :  { %s22_s19 = sshll.u32 %s698_s18, 4  ;;  %s699_s23 = smov [#allocation4]   ;;  %s23_s19 = int_to_ptr.vmem [resolvable:$true] %s22_s19 }
   0x4   :  { %25 = dma.hbm_to_vmem [thread:$0]  %s21_s17, 16, %s23_s19, [#allocation3]  }
   0x5   :  { %s33_s24 = sshll.u32 %s699_s23, 4  ;;  %s34_s24 = int_to_ptr.vmem [resolvable:$true] %s33_s24 }
   0x6   :  { %36 = dma.hbm_to_vmem [thread:$0]  %s32_s22, 16, %s34_s24, [#allocation5]  }
   0x7   :  { %694 = dma.done.wait [#allocation3], 16  }
   0x8   :  { %695 = vsyncadd [#allocation3], 4294967280 }
   0x9   :  { %696 = dma.done.wait [#allocation5], 16  }
   0xa   :  { %697 = vsyncadd [#allocation5], 4294967280  ;;  %v61_v0 = vld [vmem:[%s1131_s1] sm:$0xff]  ;;  %vm62_vm0 = vcmask 64512   ;;  %v46_v5 = vld [vmem:[%s1130_s0 + $0x8] sm:$0xff]  ;;  %vm536_vm4 = vcmask 31744  }
   0xb   :  { %v45_v1 = vld [vmem:[%s1130_s0] sm:$0xff]  ;;  %126 = vmatpush.msra.mxu0 %v61_v0  ;;  %575 = vmatpush.msra.mxu1 %v61_v0  ;;  %v50_v6 = vld [vmem:[%s1130_s0 + $0x28] sm:$0xff]  ;;  %v47_v9 = vld [vmem:[%s1130_s0 + $0x10] sm:$0xff] }
   0xc   :  { %v49_v2 = vld [vmem:[%s1130_s0 + $0x20] sm:$0xff]  ;;  %576 = vmatpush.msra.mxu2 %v61_v0  ;;  %577 = vmatpush.msra.mxu3 %v61_v0  ;;  %v54_v7 = vld [vmem:[%s1130_s0 + $0x48] sm:$0xff]  ;;  %v51_v10 = vld [vmem:[%s1130_s0 + $0x30] sm:$0xff] }
   0xd   :  { %v53_v3 = vld [vmem:[%s1130_s0 + $0x40] sm:$0xff]  ;;  %559 = vmatmul.msk.f32.vlgmr.msra.gmra.mxu0 %vm62_vm0, %v45_v1  ;;  %563 = vmatmul.msk.f32.vlgmr.msra.gmra.mxu1 %vm62_vm0, %v49_v2  ;;  %v58_v8 = vld [vmem:[%s1130_s0 + $0x68] sm:$0xff]  ;;  %v55_v11 = vld [vmem:[%s1130_s0 + $0x50] sm:$0xff] }
   0xe   :  { %v57_v4 = vld [vmem:[%s1130_s0 + $0x60] sm:$0xff]  ;;  %567 = vmatmul.msk.f32.vlgmr.msra.gmra.mxu2 %vm62_vm0, %v53_v3  ;;  %v59_v12 = vld [vmem:[%s1130_s0 + $0x70] sm:$0xff]  ;;  %v48_v13 = vld [vmem:[%s1130_s0 + $0x18] sm:$0xff] }
   0xf   :  { %571 = vmatmul.msk.f32.vlgmr.msra.gmra.mxu3 %vm62_vm0, %v57_v4  ;;  %v52_v14 = vld [vmem:[%s1130_s0 + $0x38] sm:$0xff]  ;;  %v798_v17 = vld [vmem:[#allocation2] ss:$0 sm:$0xff]  ;;  %v800_v18 = vld [vmem:[#allocation4] ss:$0 sm:$0xff] }
  0x10   :  { %v56_v15 = vld [vmem:[%s1130_s0 + $0x58] sm:$0xff] }
  0x11   :  { %v60_v16 = vld [vmem:[%s1130_s0 + $0x78] sm:$0xff] }
  0x15   :  { %560 = vmatmul.msk.f32.gmra.mxu0 %vm62_vm0, %v46_v5  ;;  %564 = vmatmul.msk.f32.gmra.mxu1 %vm62_vm0, %v50_v6 }
  0x16   :  { %568 = vmatmul.msk.f32.gmra.mxu2 %vm62_vm0, %v54_v7 }
  0x17   :  { %572 = vmatmul.msk.f32.gmra.mxu3 %vm62_vm0, %v58_v8 }
  0x1d   :  { %561 = vmatmul.msk.f32.gmra.mxu0 %vm62_vm0, %v47_v9  ;;  %565 = vmatmul.msk.f32.gmra.mxu1 %vm62_vm0, %v51_v10 }
  0x1e   :  { %569 = vmatmul.msk.f32.gmra.mxu2 %vm62_vm0, %v55_v11 }
  0x1f   :  { %573 = vmatmul.msk.f32.gmra.mxu3 %vm62_vm0, %v59_v12 }
  0x25   :  { %562 = vmatmul.msk.f32.gmra.mxu0 %vm62_vm0, %v48_v13  ;;  %566 = vmatmul.msk.f32.gmra.mxu1 %vm62_vm0, %v52_v14 }
  0x26   :  { %570 = vmatmul.msk.f32.gmra.mxu2 %vm62_vm0, %v56_v15 }
  0x27   :  { %574 = vmatmul.msk.f32.gmra.mxu3 %vm62_vm0, %v60_v16 }
  0x8a   :  { %v128_v19 = vpop.f32.mrf.mxu0  ;;  %v140_v20 = vpop.f32.mrf.mxu1 }
  0x8b   :  { %v180_v21 = vmul.f32 %v798_v17, %v128_v19  ;;  %v184_v22 = vmul.f32 %v798_v17, %v140_v20 }
  0x8d   :  { %v805_v23 = vadd.f32 %v800_v18, %v180_v21  ;;  %v808_v24 = vadd.f32 %v800_v18, %v184_v22 }
  0x8f   :  { %v216_v25 = vsub.f32 0.0, %v805_v23  ;;  %v220_v26 = vsub.f32 0.0, %v808_v24 }
  0x91   :  { %v232_v27 = vmul.f32 1.442695, %v216_v25  ;;  %v240_v28 = vmul.f32 1.442695, %v220_v26  ;;  %v152_v29 = vpop.f32.mrf.mxu2 }
  0x92   :  { %v164_v30 = vpop.f32.mrf.mxu3  ;;  %v188_v31 = vmul.f32 %v798_v17, %v152_v29  ;;  %v131_v33 = vpop.f32.mrf.mxu0 }
  0x93   :  { %v192_v32 = vmul.f32 %v798_v17, %v164_v30  ;;  %v143_v34 = vpop.f32.mrf.mxu1  ;;  %582 = vpow2.f32 %v232_v27  ;;  %v181_v35 = vmul.f32 %v798_v17, %v131_v33 }
  0x94   :  { %v185_v36 = vmul.f32 %v798_v17, %v143_v34  ;;  %584 = vpow2.f32 %v240_v28  ;;  %v817_v37 = vadd.f32 %v800_v18, %v188_v31 }
  0x95   :  { %v820_v38 = vadd.f32 %v800_v18, %v192_v32  ;;  %v823_v39 = vadd.f32 %v800_v18, %v181_v35 }
  0x96   :  { %v826_v40 = vadd.f32 %v800_v18, %v185_v36  ;;  %v224_v41 = vsub.f32 0.0, %v817_v37 }
  0x97   :  { %v228_v42 = vsub.f32 0.0, %v820_v38  ;;  %v217_v43 = vsub.f32 0.0, %v823_v39 }
  0x98   :  { %v221_v44 = vsub.f32 0.0, %v826_v40  ;;  %v248_v45 = vmul.f32 1.442695, %v224_v41 }
  0x99   :  { %v256_v46 = vmul.f32 1.442695, %v228_v42  ;;  %v583_v47 = vpop.eup %582  ;;  %v155_v48 = vpop.f32.mrf.mxu2  ;;  %v234_v51 = vmul.f32 1.442695, %v217_v43 }
  0x9a   :  { %v585_v49 = vpop.eup %584  ;;  %v832_v50 = vadd.f32 1.0, %v583_v47  ;;  %586 = vpow2.f32 %v248_v45  ;;  %v189_v52 = vmul.f32 %v798_v17, %v155_v48  ;;  %v167_v53 = vpop.f32.mrf.mxu3  ;;  %v242_v55 = vmul.f32 1.442695, %v221_v44 }
  0x9b   :  { %v835_v54 = vadd.f32 1.0, %v585_v49  ;;  %588 = vpow2.f32 %v256_v46  ;;  %v134_v56 = vpop.f32.mrf.mxu0  ;;  %v193_v57 = vmul.f32 %v798_v17, %v167_v53  ;;  %v146_v58 = vpop.f32.mrf.mxu1 }
  0x9c   :  { %590 = vrcp.f32 %v832_v50  ;;  %v841_v59 = vadd.f32 %v800_v18, %v189_v52  ;;  %v182_v60 = vmul.f32 %v798_v17, %v134_v56  ;;  %v289_v61 = vand.u32 2147483647, %v832_v50 }
  0x9d   :  { %592 = vrcp.f32 %v835_v54  ;;  %v291_v62 = vand.u32 2147483648, %v832_v50  ;;  %v349_v0 = vand.u32 2147483647, %v835_v54  ;;  %v186_v2 = vmul.f32 %v798_v17, %v146_v58 }
  0x9e   :  { %594 = vpow2.f32 %v234_v51  ;;  %v225_v1 = vsub.f32 0.0, %v841_v59  ;;  %v351_v4 = vand.u32 2147483648, %v835_v54  ;;  %v853_v6 = vadd.f32 %v800_v18, %v193_v57 }
  0x9f   :  { %596 = vpow2.f32 %v242_v55  ;;  %vm285_vm1 = vweird.f32 %v832_v50  ;;  %vm345_vm2 = vweird.f32 %v835_v54  ;;  %v860_v9 = vadd.f32 %v800_v18, %v182_v60 }
  0xa0   :  { %v587_v63 = vpop.eup %586  ;;  %vm863_vm3 = vcmp.eq.f32.partialorder %v289_v61, 8.507059e+37  ;;  %v292_v13 = vor.u32 1.1754944e-38, %v291_v62  ;;  %vm869_vm5 = vcmp.eq.f32.partialorder %v349_v0, 8.507059e+37  ;;  %v250_v19 = vmul.f32 1.442695, %v225_v1 }
  0xa1   :  { %v589_v3 = vpop.eup %588  ;;  %v850_v5 = vadd.f32 1.0, %v587_v63  ;;  %v874_v20 = vadd.f32 %v800_v18, %v186_v2  ;;  %v352_v25 = vor.u32 1.1754944e-38, %v351_v4  ;;  %v229_v26 = vsub.f32 0.0, %v853_v6 }
  0xa2   :  { %v591_v7 = vpop.eup %590  ;;  %v857_v8 = vadd.f32 1.0, %v589_v3  ;;  %v218_v30 = vsub.f32 0.0, %v860_v9 }
  0xa3   :  { %v593_v10 = vpop.eup %592  ;;  %v281_v11 = vmul.f32 %v591_v7, %v832_v50  ;;  %598 = vrcp.f32 %v850_v5  ;;  %v409_v28 = vand.u32 2147483647, %v850_v5  ;;  %v411_v29 = vand.u32 2147483648, %v850_v5 }
  0xa4   :  { %v595_v14 = vpop.eup %594  ;;  %v341_v15 = vmul.f32 %v593_v10, %v835_v54  ;;  %600 = vrcp.f32 %v857_v8  ;;  %vm286_vm6 = vweird.f32 %v591_v7  ;;  %vm346_vm7 = vweird.f32 %v593_v10 }
  0xa5   :  { %v597_v21 = vpop.eup %596  ;;  %v282_v22 = vsub.f32 1.0, %v281_v11  ;;  %v881_v32 = vadd.f32 1.0, %v595_v14  ;;  %602 = vpow2.f32 %v250_v19  ;;  %v222_v35 = vsub.f32 0.0, %v874_v20  ;;  %vm287_vm9 = vmor %vm285_vm1, %vm286_vm6 }
  0xa6   :  { %v342_v27 = vsub.f32 1.0, %v341_v15  ;;  %v883_v33 = vadd.f32 1.0, %v597_v21  ;;  %vm405_vm8 = vweird.f32 %v850_v5  ;;  %v469_v42 = vand.u32 2147483647, %v857_v8  ;;  %vm347_vm12 = vmor %vm345_vm2, %vm346_vm7 }
  0xa7   :  { %v283_v31 = vmul.f32 %v591_v7, %v282_v22  ;;  %604 = vrcp.f32 %v881_v32  ;;  %vm892_vm10 = vcmp.eq.f32.partialorder %v409_v28, 8.507059e+37  ;;  %v412_v46 = vor.u32 1.1754944e-38, %v411_v29 }
  0xa8   :  { %v343_v34 = vmul.f32 %v593_v10, %v342_v27  ;;  %vm465_vm11 = vweird.f32 %v857_v8  ;;  %v471_v49 = vand.u32 2147483648, %v857_v8  ;;  %606 = vrcp.f32 %v883_v33  ;;  %v158_v27 = vpop.f32.mrf.mxu2 }
  0xa9   :  { %v599_v36 = vpop.eup %598  ;;  %v284_v41 = vadd.f32 %v591_v7, %v283_v31  ;;  %v258_v50 = vmul.f32 1.442695, %v229_v26  ;;  %vm908_vm13 = vcmp.eq.f32.partialorder %v469_v42, 8.507059e+37  ;;  %v304_v58 = vand.u32 2147483647, %v881_v32 }
  0xaa   :  { %v344_v43 = vadd.f32 %v593_v10, %v343_v34  ;;  %v401_v44 = vmul.f32 %v599_v36, %v850_v5  ;;  %v601_v47 = vpop.eup %600  ;;  %vm406_vm14 = vweird.f32 %v599_v36  ;;  %vm300_vm15 = vweird.f32 %v881_v32  ;;  %v170_v34 = vpop.f32.mrf.mxu3 }
  0xab   :  { %v288_v48 = vsel %vm287_vm9, %v591_v7, %v284_v41  ;;  %v461_v55 = vmul.f32 %v601_v47, %v857_v8  ;;  %v603_v60 = vpop.eup %602  ;;  %608 = vpow2.f32 %v258_v50  ;;  %vm466_vm0 = vweird.f32 %v601_v47  ;;  %vm407_vm1 = vmor %vm405_vm8, %vm406_vm14 }
  0xac   :  { %v293_v51 = vsel %vm863_vm3, %v292_v13, %v288_v48  ;;  %v348_v52 = vsel %vm347_vm12, %v593_v10, %v344_v43  ;;  %v402_v53 = vsub.f32 1.0, %v401_v44  ;;  %v919_v1 = vadd.f32 1.0, %v603_v60  ;;  %vm467_vm3 = vmor %vm465_vm11, %vm466_vm0  ;;  %v149_v60 = vpop.f32.mrf.mxu1 }
  0xad   :  { %v520_v56 = vmul.f32 %v293_v51, %v805_v23  ;;  %v353_v57 = vsel %vm869_vm5, %v352_v25, %v348_v52  ;;  %v462_v63 = vsub.f32 1.0, %v461_v55  ;;  %v605_v0 = vpop.eup %604  ;;  %v472_v23 = vor.u32 1.1754944e-38, %v471_v49 }
  0xae   :  { %v524_v61 = vmul.f32 %v353_v57, %v808_v24  ;;  %v403_v62 = vmul.f32 %v599_v36, %v402_v53  ;;  %v296_v3 = vmul.f32 %v605_v0, %v881_v32  ;;  %v607_v4 = vpop.eup %606  ;;  %vm928_vm2 = vcmp.eq.f32.partialorder %v304_v58, 8.507059e+37 }
  0xaf   :  { %537 = vst.msk [vmem:[%s1134_s4] sm:$0xff] %vm536_vm4, %v520_v56  ;;  %v463_v2 = vmul.f32 %v601_v47, %v462_v63  ;;  %v306_v10 = vand.u32 2147483648, %v881_v32  ;;  %610 = vrcp.f32 %v919_v1  ;;  %v236_v11 = vmul.f32 1.442695, %v218_v30 }
  0xb0   :  { %541 = vst.msk [vmem:[%s1134_s4 + $0x20] sm:$0xff] %vm536_vm4, %v524_v61  ;;  %v404_v24 = vadd.f32 %v599_v36, %v403_v62  ;;  %v297_v14 = vsub.f32 1.0, %v296_v3  ;;  %v356_v15 = vmul.f32 %v607_v4, %v883_v33  ;;  %vm301_vm5 = vweird.f32 %v605_v0 }
  0xb1   :  { %v464_v13 = vadd.f32 %v601_v47, %v463_v2  ;;  %v364_v5 = vand.u32 2147483647, %v883_v33  ;;  %v366_v19 = vand.u32 2147483648, %v883_v33  ;;  %v609_v28 = vpop.eup %608  ;;  %vm360_vm6 = vweird.f32 %v883_v33  ;;  %vm302_vm8 = vmor %vm300_vm15, %vm301_vm5 }
  0xb2   :  { %v408_v12 = vsel %vm407_vm1, %v599_v36, %v404_v24  ;;  %v298_v25 = vmul.f32 %v605_v0, %v297_v14  ;;  %v357_v26 = vsub.f32 1.0, %v356_v15  ;;  %vm361_vm7 = vweird.f32 %v607_v4  ;;  %v137_v36 = vpop.f32.mrf.mxu0 }
  0xb3   :  { %v413_v16 = vsel %vm892_vm10, %v412_v46, %v408_v12  ;;  %v468_v22 = vsel %vm467_vm3, %v601_v47, %v464_v13  ;;  %612 = vpow2.f32 %v236_v11  ;;  %v950_v31 = vadd.f32 1.0, %v609_v28  ;;  %vm362_vm10 = vmor %vm360_vm6, %vm361_vm7  ;;  %v161_v11 = vpop.f32.mrf.mxu2  ;;  %v173_v12 = vpop.f32.mrf.mxu3 }
  0xb4   :  { %v528_v21 = vmul.f32 %v413_v16, %v817_v37  ;;  %v473_v29 = vsel %vm908_vm13, %v472_v23, %v468_v22  ;;  %v299_v37 = vadd.f32 %v605_v0, %v298_v25  ;;  %v358_v30 = vmul.f32 %v607_v4, %v357_v26 }
  0xb5   :  { %v532_v8 = vmul.f32 %v473_v29, %v820_v38  ;;  %v611_v41 = vpop.eup %610  ;;  %v307_v42 = vor.u32 1.1754944e-38, %v306_v10  ;;  %vm955_vm9 = vcmp.eq.f32.partialorder %v364_v5, 8.507059e+37  ;;  %v244_v44 = vmul.f32 1.442695, %v222_v35 }
  0xb6   :  { %545 = vst.msk [vmem:[%s1134_s4 + $0x40] sm:$0xff] %vm536_vm4, %v528_v21  ;;  %v190_v38 = vmul.f32 %v798_v17, %v158_v27  ;;  %v303_v45 = vsel %vm302_vm8, %v605_v0, %v299_v37  ;;  %v359_v46 = vadd.f32 %v607_v4, %v358_v30  ;;  %v367_v47 = vor.u32 1.1754944e-38, %v366_v19 }
  0xb7   :  { %549 = vst.msk [vmem:[%s1134_s4 + $0x60] sm:$0xff] %vm536_vm4, %v532_v8  ;;  %v416_v32 = vmul.f32 %v611_v41, %v919_v1  ;;  %v308_v48 = vsel %vm928_vm2, %v307_v42, %v303_v45  ;;  %614 = vrcp.f32 %v950_v31  ;;  %v194_v35 = vmul.f32 %v798_v17, %v170_v34 }
  0xb8   :  { %v183_v49 = vmul.f32 %v798_v17, %v137_v36  ;;  %v521_v50 = vmul.f32 %v308_v48, %v823_v39  ;;  %v363_v51 = vsel %vm362_vm10, %v607_v4, %v359_v46  ;;  %v426_v53 = vand.u32 2147483648, %v919_v1 }
  0xb9   :  { %v417_v52 = vsub.f32 1.0, %v416_v32  ;;  %v613_v55 = vpop.eup %612  ;;  %v368_v56 = vsel %vm955_vm9, %v367_v47, %v363_v51  ;;  %v424_v57 = vand.u32 2147483647, %v919_v1  ;;  %616 = vpow2.f32 %v244_v44 }
  0xba   :  { %v981_v33 = vadd.f32 %v800_v18, %v190_v38  ;;  %538 = vst.msk [vmem:[%s1134_s4 + $0x8] sm:$0xff] %vm536_vm4, %v521_v50  ;;  %v525_v39 = vmul.f32 %v368_v56, %v826_v40  ;;  %vm421_vm11 = vweird.f32 %v611_v41  ;;  %v988_v58 = vadd.f32 1.0, %v613_v55 }
  0xbb   :  { %v418_v54 = vmul.f32 %v611_v41, %v417_v52  ;;  %v992_v62 = vadd.f32 %v800_v18, %v194_v35  ;;  %v995_v63 = vadd.f32 %v800_v18, %v183_v49  ;;  %vm420_vm12 = vweird.f32 %v919_v1 }
  0xbc   :  { %v226_v61 = vsub.f32 0.0, %v981_v33  ;;  %542 = vst.msk [vmem:[%s1134_s4 + $0x28] sm:$0xff] %vm536_vm4, %v525_v39  ;;  %v427_v40 = vor.u32 1.1754944e-38, %v426_v53  ;;  %618 = vrcp.f32 %v988_v58  ;;  %vm422_vm13 = vmor %vm420_vm12, %vm421_vm11  ;;  %v187_v4 = vmul.f32 %v798_v17, %v149_v60 }
  0xbd   :  { %v419_v0 = vadd.f32 %v611_v41, %v418_v54  ;;  %v615_v23 = vpop.eup %614  ;;  %v230_v2 = vsub.f32 0.0, %v992_v62  ;;  %v219_v3 = vsub.f32 0.0, %v995_v63  ;;  %vm425_vm14 = vcmp.eq.f32.partialorder %v424_v57, 8.507059e+37 }
  0xbe   :  { %v252_v24 = vmul.f32 1.442695, %v226_v61  ;;  %v476_v10 = vmul.f32 %v615_v23, %v950_v31  ;;  %v486_v14 = vand.u32 2147483648, %v950_v31  ;;  %v1012_v22 = vadd.f32 %v800_v18, %v187_v4 }
  0xbf   :  { %v423_v7 = vsel %vm422_vm13, %v611_v41, %v419_v0  ;;  %v617_v13 = vpop.eup %616  ;;  %v260_v15 = vmul.f32 1.442695, %v230_v2  ;;  %v238_v21 = vmul.f32 1.442695, %v219_v3  ;;  %v191_v25 = vmul.f32 %v798_v17, %v161_v11 }
  0xc0   :  { %v428_v1 = vsel %vm425_vm14, %v427_v40, %v423_v7  ;;  %620 = vpow2.f32 %v252_v24  ;;  %v477_v5 = vsub.f32 1.0, %v476_v10  ;;  %v1009_v19 = vadd.f32 1.0, %v617_v13 }
  0xc1   :  { %v529_v16 = vmul.f32 %v428_v1, %v841_v59  ;;  %622 = vpow2.f32 %v260_v15  ;;  %v195_v26 = vmul.f32 %v798_v17, %v173_v12  ;;  %vm481_vm15 = vweird.f32 %v615_v23 }
  0xc2   :  { %v619_v27 = vpop.eup %618  ;;  %v478_v28 = vmul.f32 %v615_v23, %v477_v5  ;;  %v484_v59 = vand.u32 2147483647, %v950_v31  ;;  %624 = vrcp.f32 %v1009_v19  ;;  %vm480_vm0 = vweird.f32 %v950_v31 }
  0xc3   :  { %546 = vst.msk [vmem:[%s1134_s4 + $0x48] sm:$0xff] %vm536_vm4, %v529_v16  ;;  %v311_v29 = vmul.f32 %v619_v27, %v988_v58  ;;  %626 = vpow2.f32 %v238_v21  ;;  %v487_v37 = vor.u32 1.1754944e-38, %v486_v14  ;;  %v223_v17 = vsub.f32 0.0, %v1012_v22  ;;  %vm482_vm1 = vmor %vm480_vm0, %vm481_vm15 }
  0xc4   :  { %v479_v8 = vadd.f32 %v615_v23, %v478_v28  ;;  %v1026_v30 = vadd.f32 %v800_v18, %v191_v25  ;;  %v319_v41 = vand.u32 2147483647, %v988_v58  ;;  %v321_v42 = vand.u32 2147483648, %v988_v58 }
  0xc5   :  { %v312_v36 = vsub.f32 1.0, %v311_v29  ;;  %v1031_v43 = vadd.f32 %v800_v18, %v195_v26  ;;  %vm485_vm2 = vcmp.eq.f32.partialorder %v484_v59, 8.507059e+37  ;;  %v246_v38 = vmul.f32 1.442695, %v223_v17 }
  0xc6   :  { %v621_v34 = vpop.eup %620  ;;  %v483_v31 = vsel %vm482_vm1, %v615_v23, %v479_v8  ;;  %vm315_vm3 = vweird.f32 %v988_v58  ;;  %vm316_vm5 = vweird.f32 %v619_v27  ;;  %v227_v35 = vsub.f32 0.0, %v1026_v30 }
  0xc7   :  { %v1033_v44 = vadd.f32 1.0, %v621_v34  ;;  %v623_v45 = vpop.eup %622  ;;  %v488_v46 = vsel %vm485_vm2, %v487_v37, %v483_v31  ;;  %v313_v47 = vmul.f32 %v619_v27, %v312_v36  ;;  %vm320_vm6 = vcmp.eq.f32.partialorder %v319_v41, 8.507059e+37  ;;  %vm317_vm7 = vmor %vm315_vm3, %vm316_vm5 }
  0xc8   :  { %v625_v32 = vpop.eup %624  ;;  %v533_v48 = vmul.f32 %v488_v46, %v853_v6  ;;  %v322_v50 = vor.u32 1.1754944e-38, %v321_v42  ;;  %vm375_vm8 = vweird.f32 %v1009_v19  ;;  %v1045_v52 = vadd.f32 1.0, %v623_v45 }
  0xc9   :  { %628 = vrcp.f32 %v1033_v44  ;;  %v627_v18 = vpop.eup %626  ;;  %v314_v49 = vadd.f32 %v619_v27, %v313_v47  ;;  %v371_v51 = vmul.f32 %v625_v32, %v1009_v19  ;;  %v379_v56 = vand.u32 2147483647, %v1009_v19 }
  0xca   :  { %550 = vst.msk [vmem:[%s1134_s4 + $0x68] sm:$0xff] %vm536_vm4, %v533_v48  ;;  %v1047_v6 = vadd.f32 1.0, %v627_v18  ;;  %630 = vpow2.f32 %v246_v38  ;;  %v381_v57 = vand.u32 2147483648, %v1009_v19  ;;  %v254_v54 = vmul.f32 1.442695, %v227_v35 }
  0xcb   :  { %v318_v53 = vsel %vm317_vm7, %v619_v27, %v314_v49  ;;  %v372_v55 = vsub.f32 1.0, %v371_v51  ;;  %632 = vrcp.f32 %v1045_v52  ;;  %v231_v58 = vsub.f32 0.0, %v1031_v43 }
  0xcc   :  { %v323_v39 = vsel %vm320_vm6, %v322_v50, %v318_v53  ;;  %vm376_vm9 = vweird.f32 %v625_v32  ;;  %634 = vrcp.f32 %v1047_v6  ;;  %vm380_vm10 = vcmp.eq.f32.partialorder %v379_v56, 8.507059e+37 }
  0xcd   :  { %v522_v60 = vmul.f32 %v323_v39, %v860_v9  ;;  %v373_v61 = vmul.f32 %v625_v32, %v372_v55  ;;  %vm377_vm11 = vmor %vm375_vm8, %vm376_vm9  ;;  %v382_v2 = vor.u32 1.1754944e-38, %v381_v57  ;;  %v439_v9 = vand.u32 2147483647, %v1033_v44 }
  0xce   :  { %636 = vpow2.f32 %v254_v54  ;;  %v262_v3 = vmul.f32 1.442695, %v231_v58  ;;  %v441_v10 = vand.u32 2147483648, %v1033_v44  ;;  %vm435_vm13 = vweird.f32 %v1033_v44 }
  0xcf   :  { %v629_v0 = vpop.eup %628  ;;  %539 = vst.msk [vmem:[%s1134_s4 + $0x10] sm:$0xff] %vm536_vm4, %v522_v60  ;;  %v374_v40 = vadd.f32 %v625_v32, %v373_v61  ;;  %vm1069_vm14 = vcmp.eq.f32.partialorder %v439_v9, 8.507059e+37  ;;  %v499_v26 = vand.u32 2147483647, %v1045_v52  ;;  %v501_v28 = vand.u32 2147483648, %v1045_v52 }
  0xd0   :  { %v431_v23 = vmul.f32 %v629_v0, %v1033_v44  ;;  %v631_v24 = vpop.eup %630  ;;  %638 = vpow2.f32 %v262_v3  ;;  %vm436_vm12 = vweird.f32 %v629_v0  ;;  %v442_v21 = vor.u32 1.1754944e-38, %v441_v10 }
  0xd1   :  { %v378_v4 = vsel %vm377_vm11, %v625_v32, %v374_v40  ;;  %v1064_v11 = vadd.f32 1.0, %v631_v24  ;;  %v633_v12 = vpop.eup %632  ;;  %vm437_vm15 = vmor %vm435_vm13, %vm436_vm12  ;;  %vm330_vm0 = vweird.f32 %v1047_v6  ;;  %v334_v29 = vand.u32 2147483647, %v1047_v6 }
  0xd2   :  { %v432_v7 = vsub.f32 1.0, %v431_v23  ;;  %v383_v13 = vsel %vm380_vm10, %v382_v2, %v378_v4  ;;  %v635_v1 = vpop.eup %634  ;;  %v491_v16 = vmul.f32 %v633_v12, %v1045_v52  ;;  %vm496_vm1 = vweird.f32 %v633_v12 }
  0xd3   :  { %v526_v14 = vmul.f32 %v383_v13, %v874_v20  ;;  %v326_v19 = vmul.f32 %v635_v1, %v1047_v6  ;;  %640 = vrcp.f32 %v1064_v11  ;;  %v336_v17 = vand.u32 2147483648, %v1047_v6 }
  0xd4   :  { %v433_v15 = vmul.f32 %v629_v0, %v432_v7  ;;  %v492_v25 = vsub.f32 1.0, %v491_v16  ;;  %v637_v27 = vpop.eup %636  ;;  %vm331_vm2 = vweird.f32 %v635_v1  ;;  %vm495_vm3 = vweird.f32 %v1045_v52 }
  0xd5   :  { %543 = vst.msk [vmem:[%s1134_s4 + $0x30] sm:$0xff] %vm536_vm4, %v526_v14  ;;  %v327_v59 = vsub.f32 1.0, %v326_v19  ;;  %v275_v42 = vadd.f32 1.0, %v637_v27  ;;  %vm497_vm5 = vmor %vm495_vm3, %vm496_vm1  ;;  %v502_v46 = vor.u32 1.1754944e-38, %v501_v28  ;;  %vm500_vm6 = vcmp.eq.f32.partialorder %v499_v26, 8.507059e+37 }
  0xd6   :  { %v434_v20 = vadd.f32 %v629_v0, %v433_v15  ;;  %v493_v37 = vmul.f32 %v633_v12, %v492_v25  ;;  %v639_v34 = vpop.eup %638  ;;  %vm332_vm7 = vmor %vm330_vm0, %vm331_vm2  ;;  %vm335_vm8 = vcmp.eq.f32.partialorder %v334_v29, 8.507059e+37  ;;  %v396_v53 = vand.u32 2147483648, %v1064_v11 }
  0xd7   :  { %v328_v41 = vmul.f32 %v635_v1, %v327_v59  ;;  %v1088_v38 = vadd.f32 1.0, %v639_v34  ;;  %642 = vrcp.f32 %v275_v42  ;;  %vm390_vm9 = vweird.f32 %v1064_v11 }
  0xd8   :  { %v438_v8 = vsel %vm437_vm15, %v629_v0, %v434_v20  ;;  %v494_v44 = vadd.f32 %v633_v12, %v493_v37  ;;  %v394_v55 = vand.u32 2147483647, %v1064_v11  ;;  %v397_v39 = vor.u32 1.1754944e-38, %v396_v53 }
  0xd9   :  { %v443_v36 = vsel %vm1069_vm14, %v442_v21, %v438_v8  ;;  %v641_v45 = vpop.eup %640  ;;  %v329_v47 = vadd.f32 %v635_v1, %v328_v41  ;;  %644 = vrcp.f32 %v1088_v38  ;;  %v454_v0 = vand.u32 2147483647, %v275_v42 }
  0xda   :  { %v530_v31 = vmul.f32 %v443_v36, %v981_v33  ;;  %v498_v32 = vsel %vm497_vm5, %v633_v12, %v494_v44  ;;  %v337_v33 = vor.u32 1.1754944e-38, %v336_v17  ;;  %v386_v48 = vmul.f32 %v641_v45, %v1064_v11 }
  0xdb   :  { %v503_v35 = vsel %vm500_vm6, %v502_v46, %v498_v32  ;;  %v333_v18 = vsel %vm332_vm7, %v635_v1, %v329_v47  ;;  %vm391_vm10 = vweird.f32 %v641_v45  ;;  %vm395_vm12 = vcmp.eq.f32.partialorder %v394_v55, 8.507059e+37 }
  0xdc   :  { %547 = vst.msk [vmem:[%s1134_s4 + $0x50] sm:$0xff] %vm536_vm4, %v530_v31  ;;  %v534_v49 = vmul.f32 %v503_v35, %v992_v62  ;;  %v338_v50 = vsel %vm335_vm8, %v337_v33, %v333_v18  ;;  %v387_v51 = vsub.f32 1.0, %v386_v48  ;;  %vm392_vm11 = vmor %vm390_vm9, %vm391_vm10  ;;  %v456_v40 = vand.u32 2147483648, %v275_v42 }
  0xdd   :  { %v523_v52 = vmul.f32 %v338_v50, %v995_v63  ;;  %v643_v56 = vpop.eup %642  ;;  %vm450_vm14 = vweird.f32 %v275_v42  ;;  %v516_v9 = vand.u32 2147483648, %v1088_v38  ;;  %v514_v7 = vand.u32 2147483647, %v1088_v38 }
  0xde   :  { %551 = vst.msk [vmem:[%s1134_s4 + $0x70] sm:$0xff] %vm536_vm4, %v534_v49  ;;  %v388_v6 = vmul.f32 %v641_v45, %v387_v51  ;;  %v446_v63 = vmul.f32 %v643_v56, %v275_v42  ;;  %vm451_vm13 = vweird.f32 %v643_v56  ;;  %v457_v10 = vor.u32 1.1754944e-38, %v456_v40 }
  0xdf   :  { %540 = vst.msk [vmem:[%s1134_s4 + $0x18] sm:$0xff] %vm536_vm4, %v523_v52  ;;  %v645_v57 = vpop.eup %644  ;;  %vm452_vm0 = vmor %vm450_vm14, %vm451_vm13  ;;  %vm455_vm1 = vcmp.eq.f32.partialorder %v454_v0, 8.507059e+37  ;;  %vm510_vm2 = vweird.f32 %v1088_v38  ;;  %v517_v13 = vor.u32 1.1754944e-38, %v516_v9  ;;  %vm515_vm5 = vcmp.eq.f32.partialorder %v514_v7, 8.507059e+37 }
  0xe0   :  { %v389_v62 = vadd.f32 %v641_v45, %v388_v6  ;;  %v447_v58 = vsub.f32 1.0, %v446_v63  ;;  %v506_v60 = vmul.f32 %v645_v57, %v1088_v38  ;;  %vm511_vm15 = vweird.f32 %v645_v57 }
  0xe1   :  { %vm512_vm3 = vmor %vm510_vm2, %vm511_vm15 }
  0xe2   :  { %v393_v54 = vsel %vm392_vm11, %v641_v45, %v389_v62  ;;  %v448_v24 = vmul.f32 %v643_v56, %v447_v58  ;;  %v507_v2 = vsub.f32 1.0, %v506_v60 }
  0xe3   :  { %v398_v61 = vsel %vm395_vm12, %v397_v39, %v393_v54 }
  0xe4   :  { %v527_v23 = vmul.f32 %v398_v61, %v1012_v22  ;;  %v449_v3 = vadd.f32 %v643_v56, %v448_v24  ;;  %v508_v4 = vmul.f32 %v645_v57, %v507_v2 }
  0xe6   :  { %544 = vst.msk [vmem:[%s1134_s4 + $0x38] sm:$0xff] %vm536_vm4, %v527_v23  ;;  %v453_v11 = vsel %vm452_vm0, %v643_v56, %v449_v3  ;;  %v509_v22 = vadd.f32 %v645_v57, %v508_v4 }
  0xe7   :  { %v458_v12 = vsel %vm455_vm1, %v457_v10, %v453_v11 }
  0xe8   :  { %v531_v1 = vmul.f32 %v458_v12, %v1026_v30  ;;  %v513_v14 = vsel %vm512_vm3, %v645_v57, %v509_v22 }
  0xe9   :  { %v518_v15 = vsel %vm515_vm5, %v517_v13, %v513_v14 }
  0xea   :  { %548 = vst.msk [vmem:[%s1134_s4 + $0x58] sm:$0xff] %vm536_vm4, %v531_v1  ;;  %v535_v16 = vmul.f32 %v518_v15, %v1031_v43 }
  0xec   :  { %552 = vst.msk [vmem:[%s1134_s4 + $0x78] sm:$0xff] %vm536_vm4, %v535_v16 }
  0xed   :  { %557 = vsyncpa [#allocation3], 1 }
  0xee   :  { %558 = vsyncpa [#allocation5], 1 }

// kernel: asff_bifpnca3_forward.9
= control target key start
LH: loop header
LB: loop body
LE: loop exit
PB: predicated region body
PF: predicated region fallthrough
CT: control target
= control target key end

     0   :  { %vm23_vm0 = vcmask 130048   ;;  %vm161_vm6 = vcmask 31744   ;;  %s286_s1 = inlined_call_operand.vmem [shape: f32[16,4], index: 1, kind: input, shape index: {}]   ;;  %s287_s0 = inlined_call_operand.vmem [shape: f32[32,16], index: 0, kind: input, shape index: {}]   ;;  %s288_s2 = inlined_call_operand.vmem [shape: f32[1,4], index: 2, kind: input, shape index: {}]   ;;  %s289_s3 = inlined_call_operand.vmem [shape: f32[1,4], index: 3, kind: input, shape index: {}]   ;;  %s290_s4 = inlined_call_operand.vmem [shape: f32[32,4], index: 4, kind: output, shape index: {}]  }
   0x1   :  { %v22_v0 = vld [vmem:[%s286_s1 + $0x8] sm:$0xff]  ;;  %v21_v1 = vld [vmem:[%s286_s1] sm:$0xff]  ;;  %v19_v4 = vld [vmem:[%s287_s0 + $0x10] sm:$0xff] }
   0x2   :  { %50 = vmatpush.msra.mxu0 %v22_v0  ;;  %174 = vmatpush.msra.mxu1 %v22_v0  ;;  %v17_v2 = vld [vmem:[%s287_s0] sm:$0xff]  ;;  %v18_v3 = vld [vmem:[%s287_s0 + $0x8] sm:$0xff]  ;;  %v20_v5 = vld [vmem:[%s287_s0 + $0x18] sm:$0xff] }
   0x3   :  { %175 = vmatpush.msra.mxu2 %v22_v0  ;;  %176 = vmatpush.msra.mxu3 %v22_v0  ;;  %v180_v6 = vld [vmem:[%s288_s2] ss:$0 sm:$0xff] }
   0x4   :  { %51 = vmatpush.msra.mxu0 %v21_v1  ;;  %177 = vmatpush.msra.mxu1 %v21_v1  ;;  %v181_v7 = vld [vmem:[%s289_s3] ss:$0 sm:$0xff] }
   0x5   :  { %178 = vmatpush.msra.mxu2 %v21_v1  ;;  %179 = vmatpush.msra.mxu3 %v21_v1 }
   0x6   :  { %170 = vmatmul.msk.f32.vlgmr.msra.gmra.mxu0 %vm23_vm0, %v17_v2  ;;  %171 = vmatmul.msk.f32.vlgmr.msra.gmra.mxu1 %vm23_vm0, %v18_v3 }
   0x7   :  { %172 = vmatmul.msk.f32.vlgmr.msra.gmra.mxu2 %vm23_vm0, %v19_v4  ;;  %173 = vmatmul.msk.f32.vlgmr.msra.gmra.mxu3 %vm23_vm0, %v20_v5 }
  0x83   :  { %v53_v8 = vpop.f32.mrf.mxu0  ;;  %v56_v9 = vpop.f32.mrf.mxu1 }
  0x84   :  { %v69_v10 = vmul.f32 %v180_v6, %v53_v8  ;;  %v70_v11 = vmul.f32 %v180_v6, %v56_v9 }
  0x86   :  { %v247_v12 = vadd.f32 %v181_v7, %v69_v10  ;;  %v249_v13 = vadd.f32 %v181_v7, %v70_v11 }
  0x88   :  { %v81_v14 = vsub.f32 0.0, %v247_v12  ;;  %v82_v15 = vsub.f32 0.0, %v249_v13 }
  0x8a   :  { %v85_v16 = vmul.f32 1.442695, %v81_v14  ;;  %v87_v17 = vmul.f32 1.442695, %v82_v15  ;;  %v59_v18 = vpop.f32.mrf.mxu2  ;;  %v62_v19 = vpop.f32.mrf.mxu3 }
  0x8b   :  { %v71_v20 = vmul.f32 %v180_v6, %v59_v18  ;;  %v72_v21 = vmul.f32 %v180_v6, %v62_v19 }
  0x8c   :  { %182 = vpow2.f32 %v85_v16 }
  0x8d   :  { %184 = vpow2.f32 %v87_v17  ;;  %v253_v22 = vadd.f32 %v181_v7, %v71_v20  ;;  %v255_v23 = vadd.f32 %v181_v7, %v72_v21 }
  0x8f   :  { %v83_v24 = vsub.f32 0.0, %v253_v22  ;;  %v84_v25 = vsub.f32 0.0, %v255_v23 }
  0x91   :  { %v89_v26 = vmul.f32 1.442695, %v83_v24  ;;  %v91_v27 = vmul.f32 1.442695, %v84_v25 }
  0x92   :  { %v183_v28 = vpop.eup %182 }
  0x93   :  { %v185_v29 = vpop.eup %184  ;;  %v93_v30 = vadd.f32 1.0, %v183_v28  ;;  %186 = vpow2.f32 %v89_v26 }
  0x94   :  { %v94_v31 = vadd.f32 1.0, %v185_v29  ;;  %188 = vpow2.f32 %v91_v27 }
  0x95   :  { %190 = vrcp.f32 %v93_v30  ;;  %vm102_vm1 = vweird.f32 %v93_v30  ;;  %v106_v41 = vand.u32 2147483647, %v93_v30  ;;  %v108_v42 = vand.u32 2147483648, %v93_v30 }
  0x96   :  { %192 = vrcp.f32 %v94_v31  ;;  %v121_v45 = vand.u32 2147483647, %v94_v31  ;;  %v123_v46 = vand.u32 2147483648, %v94_v31  ;;  %vm117_vm3 = vweird.f32 %v94_v31 }
  0x97   :  { %v109_v50 = vor.u32 1.1754944e-38, %v108_v42  ;;  %vm107_vm7 = vcmp.eq.f32.partialorder %v106_v41, 8.507059e+37 }
  0x98   :  { %vm122_vm9 = vcmp.eq.f32.partialorder %v121_v45, 8.507059e+37  ;;  %v124_v55 = vor.u32 1.1754944e-38, %v123_v46 }
  0x99   :  { %v187_v32 = vpop.eup %186 }
  0x9a   :  { %v189_v33 = vpop.eup %188  ;;  %v95_v34 = vadd.f32 1.0, %v187_v32 }
  0x9b   :  { %v191_v35 = vpop.eup %190  ;;  %v259_v36 = vadd.f32 1.0, %v189_v33 }
  0x9c   :  { %v193_v37 = vpop.eup %192  ;;  %v98_v38 = vmul.f32 %v191_v35, %v93_v30  ;;  %194 = vrcp.f32 %v95_v34  ;;  %vm103_vm2 = vweird.f32 %v191_v35  ;;  %v136_v62 = vand.u32 2147483647, %v95_v34 }
  0x9d   :  { %v113_v39 = vmul.f32 %v193_v37, %v94_v31  ;;  %196 = vrcp.f32 %v259_v36  ;;  %vm118_vm4 = vweird.f32 %v193_v37  ;;  %vm104_vm5 = vmor %vm102_vm1, %vm103_vm2  ;;  %v138_v63 = vand.u32 2147483648, %v95_v34 }
  0x9e   :  { %v99_v40 = vsub.f32 1.0, %v98_v38  ;;  %vm119_vm8 = vmor %vm117_vm3, %vm118_vm4  ;;  %vm132_vm11 = vweird.f32 %v95_v34  ;;  %v153_v3 = vand.u32 2147483648, %v259_v36  ;;  %v151_v6 = vand.u32 2147483647, %v259_v36 }
  0x9f   :  { %v114_v43 = vsub.f32 1.0, %v113_v39  ;;  %v139_v7 = vor.u32 1.1754944e-38, %v138_v63  ;;  %vm137_vm14 = vcmp.eq.f32.partialorder %v136_v62, 8.507059e+37  ;;  %vm147_vm15 = vweird.f32 %v259_v36 }
  0xa0   :  { %v100_v44 = vmul.f32 %v191_v35, %v99_v40  ;;  %v154_v11 = vor.u32 1.1754944e-38, %v153_v3  ;;  %vm152_vm1 = vcmp.eq.f32.partialorder %v151_v6, 8.507059e+37 }
  0xa1   :  { %v115_v47 = vmul.f32 %v193_v37, %v114_v43 }
  0xa2   :  { %v195_v48 = vpop.eup %194  ;;  %v101_v49 = vadd.f32 %v191_v35, %v100_v44 }
  0xa3   :  { %v116_v51 = vadd.f32 %v193_v37, %v115_v47  ;;  %v128_v52 = vmul.f32 %v195_v48, %v95_v34  ;;  %v197_v53 = vpop.eup %196  ;;  %vm133_vm10 = vweird.f32 %v195_v48 }
  0xa4   :  { %v105_v54 = vsel %vm104_vm5, %v191_v35, %v101_v49  ;;  %v143_v59 = vmul.f32 %v197_v53, %v259_v36  ;;  %vm148_vm12 = vweird.f32 %v197_v53  ;;  %vm134_vm13 = vmor %vm132_vm11, %vm133_vm10 }
  0xa5   :  { %v110_v56 = vsel %vm107_vm7, %v109_v50, %v105_v54  ;;  %v120_v57 = vsel %vm119_vm8, %v193_v37, %v116_v51  ;;  %v129_v58 = vsub.f32 1.0, %v128_v52  ;;  %vm149_vm0 = vmor %vm147_vm15, %vm148_vm12 }
  0xa6   :  { %v157_v60 = vmul.f32 %v110_v56, %v247_v12  ;;  %v125_v61 = vsel %vm122_vm9, %v124_v55, %v120_v57  ;;  %v144_v2 = vsub.f32 1.0, %v143_v59 }
  0xa7   :  { %v158_v0 = vmul.f32 %v125_v61, %v249_v13  ;;  %v130_v1 = vmul.f32 %v195_v48, %v129_v58 }
  0xa8   :  { %162 = vst.msk [vmem:[%s290_s4] sm:$0xff] %vm161_vm6, %v157_v60  ;;  %v145_v5 = vmul.f32 %v197_v53, %v144_v2 }
  0xa9   :  { %163 = vst.msk [vmem:[%s290_s4 + $0x8] sm:$0xff] %vm161_vm6, %v158_v0  ;;  %v131_v4 = vadd.f32 %v195_v48, %v130_v1 }
  0xaa   :  { %v146_v9 = vadd.f32 %v197_v53, %v145_v5 }
  0xab   :  { %v135_v8 = vsel %vm134_vm13, %v195_v48, %v131_v4 }
  0xac   :  { %v140_v10 = vsel %vm137_vm14, %v139_v7, %v135_v8  ;;  %v150_v13 = vsel %vm149_vm0, %v197_v53, %v146_v9 }
  0xad   :  { %v159_v12 = vmul.f32 %v140_v10, %v253_v22  ;;  %v155_v14 = vsel %vm152_vm1, %v154_v11, %v150_v13 }
  0xae   :  { %v160_v15 = vmul.f32 %v155_v14, %v255_v23 }
  0xaf   :  { %164 = vst.msk [vmem:[%s290_s4 + $0x10] sm:$0xff] %vm161_vm6, %v159_v12 }
  0xb0   :  { %165 = vst.msk [vmem:[%s290_s4 + $0x18] sm:$0xff] %vm161_vm6, %v160_v15 }

// kernel: mul.77
= control target key start
LH: loop header
LB: loop body
LE: loop exit
PB: predicated region body
PF: predicated region fallthrough
CT: control target
= control target key end

     0   :  { %s30_s8 = smov 4   ;;  %vm7_vm0 = vcmask 31744   ;;  %vm13_vm1 = vcmask 97344   ;;  %vm19_vm2 = vcmask 64544   ;;  %s47_s0 = inlined_call_operand.vmem [shape: f32[3,4], index: 0, kind: input, shape index: {}]   ;;  %s48_s1 = inlined_call_operand.vmem [shape: f32[12], index: 1, kind: output, shape index: {}]  }
   0x1   :  { %v4_v0 = vld [vmem:[%s47_s0] sm:$0xf]  ;;  %s29_s0 = smov 8  }
   0x2   :  { %5 = vst [vmem:[#allocation1] sm:$0xf] %v4_v0 }
   0x9   :  { %v10_v1 = vld [vmem:[#allocation1 + $0x2] sm:$0x1]   ;;  %v16_v2 = vld [vmem:[#allocation1 + $0x1] sm:$0x1]   ;;  %v6_v3 = vld [vmem:[#allocation1] sm:$0x1]  }
   0xa   :  { %11 = vrot.lane.b32.xlu0 %v10_v1, %s29_s0  ;;  %8 = vst.msk [vmem:[#allocation0] sm:$0x1] %vm7_vm0, %v6_v3  }
  0x12   :  { %17 = vrot.lane.b32.xlu0 %v16_v2, %s30_s8 }
  0x7c   :  { %v12_v4 = vpop.permute.xlu0 %11  }
  0x7d   :  { %14 = vst.msk [vmem:[#allocation0] sm:$0x1] %vm13_vm1, %v12_v4  }
  0x84   :  { %v18_v5 = vpop.permute.xlu0 %17  }
  0x85   :  { %20 = vst.msk [vmem:[#allocation0] sm:$0x1] %vm19_vm2, %v18_v5  }
  0x8c   :  { %v23_v6 = vld [vmem:[#allocation0] sm:$0x1] }
  0x8d   :  { %26 = vst [vmem:[%s48_s1] sm:$0x1] %v23_v6 }

// kernel: asff_bifpnca3_forward.10
= control target key start
LH: loop header
LB: loop body
LE: loop exit
PB: predicated region body
PF: predicated region fallthrough
CT: control target
= control target key end

     0   :  { %s684_s9 = smov 0   ;;  %s686_s10 = smov 0   ;;  %s985_s0 = inlined_call_operand.vmem [shape: f32[2,16,16,12], index: 0, kind: input, shape index: {}]   ;;  %s986_s1 = inlined_call_operand.vmem [shape: f32[2,16,12], index: 1, kind: output, shape index: {0}]   ;;  %s987_s2 = inlined_call_operand.vmem [shape: f32[2,16,12], index: 2, kind: output, shape index: {1}]  }
   0x1   :  { %s688_s11 = smov 0  }
   0x2 LB: > { %s25_s12 = sadd.s32 1, %s662_s10  ;;  %p605_p0 = scmp.ge.s32.totalorder %s666_s11, 1  ;;  %s666_s11 = sphi %s688_s11, %s13_s11   ;;  %s662_s10 = sphi %s686_s10, %s1019_s10   ;;  %s658_s9 = sphi %s684_s9, %s1018_s9  }
   0x3   : > { %p27_p1 = scmp.ge.s32.totalorder %s25_s12, 2  ;;  %p136_p2 = scmp.lt.s32.totalorder %s666_s11, 3 }
   0x5   : > { %s1021_s12 = smov (%p27_p1, %s25_s12), 0  ;;  %p137_p3 = pnand %p605_p0, %p136_p2 }
   0x7   : > { %140 = sbr.rel (%p137_p3) target bundleno = 93 (0x5d), region = 24 }
   0xc   : > { %p172_p4 = scmp.lt.s32.totalorder %s658_s9, 1  ;;  %vm228_vm0 = vcmask 97280   ;;  %vm412_vm2 = vcmask 1041409   ;;  %vm414_vm3 = vcmask 1042434   ;;  %vm416_vm4 = vcmask 1043459  }
   0xd   : > { %vm418_vm5 = vcmask 1044484   ;;  %vm420_vm6 = vcmask 1045509   ;;  %vm422_vm7 = vcmask 1046534   ;;  %vm424_vm8 = vcmask 1047559  }
   0xe   : > { %s1023_s9 = smov (!%p172_p4, %s658_s9), 1 }
   0xf   : > { %s614_s13 = sshll.u32 %s1023_s9, 8  ;;  %s615_s17 = sshll.u32 %s1023_s9, 4 }
  0x10   : > { %s708_s16 = scalar_lea.vmem %s985_s0, %s614_s13  ;;  %s187_s20 = scalar_lea.vmem %s986_s1, %s615_s17 }
  0x11   : > { %v196_v0 = vld [vmem:[%s708_s16] sm:$0xff]  ;;  %v197_v1 = vld [vmem:[%s708_s16 + $0x8] sm:$0xff]  ;;  %v198_v2 = vld [vmem:[%s708_s16 + $0x10] sm:$0xff]  ;;  %s195_s23 = scalar_lea.vmem %s987_s2, %s615_s17 }
  0x12   : > { %v199_v3 = vld [vmem:[%s708_s16 + $0x18] sm:$0xff]  ;;  %v200_v4 = vld [vmem:[%s708_s16 + $0x20] sm:$0xff]  ;;  %v201_v5 = vld [vmem:[%s708_s16 + $0x28] sm:$0xff]  ;;  %v717_v6 = vsel %vm228_vm0, %v196_v0, 0.0  ;;  %v720_v7 = vsel %vm228_vm0, %v197_v1, 0.0  ;;  %v723_v8 = vsel %vm228_vm0, %v198_v2, 0.0 }
  0x13   : > { %v202_v9 = vld [vmem:[%s708_s16 + $0x30] sm:$0xff]  ;;  %v203_v10 = vld [vmem:[%s708_s16 + $0x38] sm:$0xff]  ;;  %v204_v11 = vld [vmem:[%s708_s16 + $0x40] sm:$0xff]  ;;  %v231_v12 = vadd.f32 %v720_v7, %v717_v6  ;;  %v731_v13 = vsel %vm228_vm0, %v199_v3, 0.0  ;;  %v734_v14 = vsel %vm228_vm0, %v200_v4, 0.0  ;;  %v737_v15 = vsel %vm228_vm0, %v201_v5, 0.0 }
  0x14   : > { %v205_v16 = vld [vmem:[%s708_s16 + $0x48] sm:$0xff]  ;;  %v206_v17 = vld [vmem:[%s708_s16 + $0x50] sm:$0xff]  ;;  %v207_v18 = vld [vmem:[%s708_s16 + $0x58] sm:$0xff]  ;;  %v240_v19 = vadd.f32 %v731_v13, %v723_v8  ;;  %v249_v20 = vadd.f32 %v737_v15, %v734_v14  ;;  %v747_v21 = vsel %vm228_vm0, %v202_v9, 0.0  ;;  %v750_v22 = vsel %vm228_vm0, %v203_v10, 0.0 }
  0x15   : > { %v208_v23 = vld [vmem:[%s708_s16 + $0x60] sm:$0xff]  ;;  %v232_v24 = vrot.slane %v231_v12, 4  ;;  %v258_v25 = vadd.f32 %v750_v22, %v747_v21  ;;  %v756_v26 = vsel %vm228_vm0, %v204_v11, 0.0  ;;  %v759_v27 = vsel %vm228_vm0, %v205_v16, 0.0  ;;  %v209_v28 = vld [vmem:[%s708_s16 + $0x68] sm:$0xff]  ;;  %v210_v29 = vld [vmem:[%s708_s16 + $0x70] sm:$0xff] }
  0x16   : > { %v241_v30 = vrot.slane %v240_v19, 4  ;;  %v250_v31 = vrot.slane %v249_v20, 4  ;;  %v267_v32 = vadd.f32 %v759_v27, %v756_v26  ;;  %v766_v33 = vsel %vm228_vm0, %v206_v17, 0.0  ;;  %v211_v38 = vld [vmem:[%s708_s16 + $0x78] sm:$0xff]  ;;  %v212_v63 = vld [vmem:[%s708_s16 + $0x80] sm:$0xff]  ;;  %v213_v3 = vld [vmem:[%s708_s16 + $0x88] sm:$0xff] }
  0x17   : > { %v233_v34 = vadd.f32 %v232_v24, %v231_v12  ;;  %v259_v35 = vrot.slane %v258_v25, 4  ;;  %v769_v36 = vsel %vm228_vm0, %v207_v18, 0.0  ;;  %v772_v37 = vsel %vm228_vm0, %v208_v23, 0.0  ;;  %v214_v4 = vld [vmem:[%s708_s16 + $0x90] sm:$0xff]  ;;  %v215_v11 = vld [vmem:[%s708_s16 + $0x98] sm:$0xff]  ;;  %v216_v17 = vld [vmem:[%s708_s16 + $0xa0] sm:$0xff] }
  0x18   : > { %v242_v39 = vadd.f32 %v241_v30, %v240_v19  ;;  %v251_v40 = vadd.f32 %v250_v31, %v249_v20  ;;  %v268_v41 = vrot.slane %v267_v32, 4  ;;  %v276_v42 = vadd.f32 %v769_v36, %v766_v33  ;;  %v217_v18 = vld [vmem:[%s708_s16 + $0xa8] sm:$0xff]  ;;  %v218_v31 = vld [vmem:[%s708_s16 + $0xb0] sm:$0xff] }
  0x19   : > { %v234_v43 = vrot.slane %v233_v34, 2  ;;  %v260_v44 = vadd.f32 %v259_v35, %v258_v25  ;;  %v778_v45 = vsel %vm228_vm0, %v209_v28, 0.0  ;;  %v781_v46 = vsel %vm228_vm0, %v210_v29, 0.0 }
  0x1a   : > { %v243_v47 = vrot.slane %v242_v39, 2  ;;  %v252_v48 = vrot.slane %v251_v40, 2  ;;  %v269_v49 = vadd.f32 %v268_v41, %v267_v32  ;;  %v277_v50 = vrot.slane %v276_v42, 4  ;;  %v219_v32 = vld [vmem:[%s708_s16 + $0xb8] sm:$0xff] }
  0x1b   : > { %v235_v51 = vadd.f32 %v234_v43, %v233_v34  ;;  %v261_v52 = vrot.slane %v260_v44, 2  ;;  %v285_v53 = vadd.f32 %v778_v45, %v772_v37  ;;  %v786_v54 = vsel %vm228_vm0, %v211_v38, 0.0  ;;  %v220_v34 = vld [vmem:[%s708_s16 + $0xc0] sm:$0xff] }
  0x1c   : > { %v244_v55 = vadd.f32 %v243_v47, %v242_v39  ;;  %v253_v56 = vadd.f32 %v252_v48, %v251_v40  ;;  %v270_v57 = vrot.slane %v269_v49, 2  ;;  %v278_v58 = vadd.f32 %v277_v50, %v276_v42  ;;  %v221_v47 = vld [vmem:[%s708_s16 + $0xc8] sm:$0xff]  ;;  %v222_v48 = vld [vmem:[%s708_s16 + $0xd0] sm:$0xff] }
  0x1d   : > { %v236_v59 = vrot.slane %v235_v51, 1  ;;  %v262_v60 = vadd.f32 %v261_v52, %v260_v44  ;;  %v286_v61 = vrot.slane %v285_v53, 4  ;;  %v294_v62 = vadd.f32 %v786_v54, %v781_v46 }
  0x1e   : > { %v245_v0 = vrot.slane %v244_v55, 1  ;;  %v254_v1 = vrot.slane %v253_v56, 1  ;;  %v271_v2 = vadd.f32 %v270_v57, %v269_v49  ;;  %v279_v5 = vrot.slane %v278_v58, 2 }
  0x1f   : > { %v287_v9 = vadd.f32 %v286_v61, %v285_v53  ;;  %v295_v10 = vrot.slane %v294_v62, 4  ;;  %v263_v12 = vrot.slane %v262_v60, 1  ;;  %v668_v16 = vmov 16.0  }
  0x20   : > { %642 = vrcp.f32 %v668_v16  ;;  %v796_v19 = vadd.f32 %v236_v59, %v235_v51  ;;  %v272_v20 = vrot.slane %v271_v2, 1  ;;  %v799_v24 = vsel %vm228_vm0, %v212_v63, 0.0  ;;  %v223_v59 = vld [vmem:[%s708_s16 + $0xd8] sm:$0xff]  ;;  %v226_v16 = vld [vmem:[%s708_s16 + $0xf0] sm:$0xff] }
  0x21   : > { %v296_v23 = vadd.f32 %v295_v10, %v294_v62  ;;  %v801_v25 = vadd.f32 %v245_v0, %v244_v55  ;;  %v803_v28 = vadd.f32 %v254_v1, %v253_v56  ;;  %v806_v29 = vsel %vm228_vm0, %v213_v3, 0.0 }
  0x22   : > { %v809_v30 = vsel %vm228_vm0, %v214_v4, 0.0  ;;  %v280_v35 = vadd.f32 %v279_v5, %v278_v58  ;;  %v288_v38 = vrot.slane %v287_v9, 2  ;;  %v303_v39 = vadd.f32 %v806_v29, %v799_v24  ;;  %v225_v5 = vld [vmem:[%s708_s16 + $0xe8] sm:$0xff] }
  0x23   : > { %v817_v40 = vsel %vm228_vm0, %v215_v11, 0.0  ;;  %v819_v41 = vadd.f32 %v263_v12, %v262_v60  ;;  %v824_v43 = vsel %vm228_vm0, %v216_v17, 0.0  ;;  %v827_v44 = vsel %vm228_vm0, %v217_v18, 0.0  ;;  %v224_v60 = vld [vmem:[%s708_s16 + $0xe0] sm:$0xff] }
  0x24   : > { %v312_v42 = vadd.f32 %v817_v40, %v809_v30  ;;  %998 = vst [vmem:[#allocation2_spill] sm:$0xff] %v827_v44  ;;  %v831_v49 = vadd.f32 %v272_v20, %v271_v2  ;;  %v297_v50 = vrot.slane %v296_v23, 2  ;;  %v304_v51 = vrot.slane %v303_v39, 4 }
  0x25   : > { %v321_v52 = vadd.f32 %v827_v44, %v824_v43  ;;  %v838_v56 = vsel %vm228_vm0, %v218_v31, 0.0  ;;  %v841_v57 = vsel %vm228_vm0, %v219_v32, 0.0  ;;  %v844_v58 = vsel %vm228_vm0, %v220_v34, 0.0  ;;  %v227_v32 = vld [vmem:[%s708_s16 + $0xf8] sm:$0xff] }
  0x26   : > { %v835_v53 = vpop.eup %642  ;;  %v313_v55 = vrot.slane %v312_v42, 4  ;;  %999 = vst [vmem:[#allocation3_spill] sm:$0xff] %v838_v56  ;;  %v281_v61 = vrot.slane %v280_v35, 1  ;;  %v289_v62 = vadd.f32 %v288_v38, %v287_v9  ;;  %v305_v63 = vadd.f32 %v304_v51, %v303_v39 }
  0x27   : > { %1000 = vst [vmem:[#allocation4_spill] sm:$0xff] %v841_v57  ;;  %v322_v0 = vrot.slane %v321_v52, 4  ;;  %v330_v2 = vadd.f32 %v841_v57, %v838_v56  ;;  %v851_v3 = vsel %vm228_vm0, %v221_v47, 0.0  ;;  %v854_v4 = vsel %vm228_vm0, %v222_v48, 0.0 }
  0x28   : > { %1001 = vst [vmem:[#allocation5_spill] sm:$0xff] %v844_v58  ;;  %v314_v1 = vadd.f32 %v313_v55, %v312_v42  ;;  %v298_v10 = vadd.f32 %v297_v50, %v296_v23  ;;  %v306_v11 = vrot.slane %v305_v63, 2  ;;  %v339_v9 = vadd.f32 %v851_v3, %v844_v58 }
  0x29   : > { %1002 = vst [vmem:[#allocation6_spill] sm:$0xff] %v851_v3  ;;  %v323_v12 = vadd.f32 %v322_v0, %v321_v52  ;;  %v331_v18 = vrot.slane %v330_v2, 4  ;;  %v861_v20 = vsel %vm228_vm0, %v223_v59, 0.0  ;;  %v864_v31 = vsel %vm228_vm0, %v224_v60, 0.0 }
  0x2a   : > { %1003 = vst [vmem:[#allocation7_spill] sm:$0xff] %v854_v4  ;;  %v315_v17 = vrot.slane %v314_v1, 2  ;;  %v307_v34 = vadd.f32 %v306_v11, %v305_v63  ;;  %v340_v39 = vrot.slane %v339_v9, 4  ;;  %v348_v23 = vadd.f32 %v861_v20, %v854_v4 }
  0x2b   : > { %1004 = vst [vmem:[#allocation8_spill] sm:$0xff] %v861_v20  ;;  %v324_v38 = vrot.slane %v323_v12, 2  ;;  %v869_v42 = vadd.f32 %v281_v61, %v280_v35  ;;  %v332_v48 = vadd.f32 %v331_v18, %v330_v2  ;;  %v872_v50 = vsel %vm228_vm0, %v225_v5, 0.0 }
  0x2c   : > { %1005 = vst [vmem:[#allocation9_spill] sm:$0xff] %v864_v31  ;;  %v316_v47 = vadd.f32 %v315_v17, %v314_v1  ;;  %v341_v52 = vadd.f32 %v340_v39, %v339_v9  ;;  %v349_v55 = vrot.slane %v348_v23, 4  ;;  %v875_v59 = vsel %vm228_vm0, %v226_v16, 0.0 }
  0x2d   : > { %1006 = vst [vmem:[#allocation10_spill] sm:$0xff] %v872_v50  ;;  %v325_v51 = vadd.f32 %v324_v38, %v323_v12  ;;  %v290_v60 = vrot.slane %v289_v62, 1  ;;  %v333_v63 = vrot.slane %v332_v48, 2  ;;  %v357_v0 = vadd.f32 %v872_v50, %v864_v31 }
  0x2e   : > { %v880_v11 = vsel %vm228_vm0, %v227_v32, 0.0  ;;  %v299_v35 = vrot.slane %v298_v10, 1  ;;  %v308_v61 = vrot.slane %v307_v34, 1  ;;  %v342_v1 = vrot.slane %v341_v52, 2 }
  0x2f   : > { %1007 = vst [vmem:[#allocation11_spill] sm:$0xff] %v880_v11  ;;  %v350_v2 = vadd.f32 %v349_v55, %v348_v23  ;;  %v317_v5 = vrot.slane %v316_v47, 1  ;;  %v334_v17 = vadd.f32 %v333_v63, %v332_v48  ;;  %v358_v12 = vrot.slane %v357_v0, 4 }
  0x30   : > { %v366_v9 = vadd.f32 %v880_v11, %v875_v59  ;;  %v326_v16 = vrot.slane %v325_v51, 1  ;;  %v343_v18 = vadd.f32 %v342_v1, %v341_v52  ;;  %v374_v39 = vmul.f32 16.0, %v835_v53 }
  0x31   : > { %v351_v38 = vrot.slane %v350_v2, 2  ;;  %v291_v20 = vadd.f32 %v290_v60, %v289_v62  ;;  %v335_v50 = vrot.slane %v334_v17, 1  ;;  %v359_v31 = vadd.f32 %v358_v12, %v357_v0 }
  0x32   : > { %v367_v32 = vrot.slane %v366_v9, 4  ;;  %v300_v4 = vadd.f32 %v299_v35, %v298_v10  ;;  %v344_v3 = vrot.slane %v343_v18, 1  ;;  %v375_v57 = vsub.f32 1.0, %v374_v39 }
  0x33   : > { %v352_v58 = vadd.f32 %v351_v38, %v350_v2  ;;  %v309_v23 = vadd.f32 %v308_v61, %v307_v34  ;;  %v318_v55 = vadd.f32 %v317_v5, %v316_v47  ;;  %v360_v48 = vrot.slane %v359_v31, 2 }
  0x34   : > { %v368_v63 = vadd.f32 %v367_v32, %v366_v9  ;;  %v327_v56 = vadd.f32 %v326_v16, %v325_v51  ;;  %v376_v11 = vmul.f32 %v835_v53, %v375_v57  ;;  %vm378_vm1 = vweird.f32 %v835_v53 }
  0x35   : > { %v353_v44 = vrot.slane %v352_v58, 1  ;;  %v336_v52 = vadd.f32 %v335_v50, %v334_v17  ;;  %v361_v1 = vadd.f32 %v360_v48, %v359_v31  ;;  %v345_v60 = vadd.f32 %v344_v3, %v343_v18 }
  0x36   : > { %v369_v62 = vrot.slane %v368_v63, 2  ;;  %v377_v10 = vadd.f32 %v835_v53, %v376_v11  ;;  %v437_v50 = vadd.f32 %v723_v8, %v717_v6 }
  0x37   : > { %v362_v0 = vrot.slane %v361_v1, 1  ;;  %v354_v47 = vadd.f32 %v353_v44, %v352_v58  ;;  %v452_v58 = vadd.f32 %v731_v13, %v720_v7 }
  0x38   : > { %v370_v34 = vadd.f32 %v369_v62, %v368_v63  ;;  %v889_v51 = vsel %vm378_vm1, %v835_v53, %v377_v10  ;;  %v438_v5 = vadd.f32 %v437_v50, %v734_v14 }
  0x39   : > { %v380_v31 = vmul.f32 %v889_v51, %v796_v19  ;;  %v381_v3 = vmul.f32 %v889_v51, %v801_v25  ;;  %v363_v11 = vadd.f32 %v362_v0, %v361_v1  ;;  %v382_v44 = vmul.f32 %v889_v51, %v803_v28 }
  0x3a   : > { %v371_v57 = vrot.slane %v370_v34, 1  ;;  %v383_v53 = vmul.f32 %v889_v51, %v819_v41  ;;  %v384_v19 = vmul.f32 %v889_v51, %v831_v49  ;;  %v385_v25 = vmul.f32 %v889_v51, %v869_v42 }
  0x3b   : > { %v388_v6 = vmul.f32 %v889_v51, %v309_v23  ;;  %v386_v8 = vmul.f32 %v889_v51, %v291_v20  ;;  %v389_v61 = vmul.f32 %v889_v51, %v318_v55  ;;  %v390_v28 = vmul.f32 %v889_v51, %v327_v56 }
  0x3c   : > { %v372_v35 = vadd.f32 %v371_v57, %v370_v34  ;;  %v391_v41 = vmul.f32 %v889_v51, %v336_v52  ;;  %v387_v2 = vmul.f32 %v889_v51, %v300_v4  ;;  %v392_v7 = vmul.f32 %v889_v51, %v345_v60 }
  0x3d   : > { %v393_v13 = vmul.f32 %v889_v51, %v354_v47  ;;  %v413_v49 = vsel %vm412_vm2, %v381_v3, %v380_v31  ;;  %v426_v20 = vsel %vm412_vm2, %v389_v61, %v388_v6  ;;  %v453_v56 = vadd.f32 %v452_v58, %v737_v15  ;;  %v1008_v47 = vld [vmem:[#allocation2_spill] sm:$0xff]  ;;  %v1015_v58 = vld [vmem:[#allocation9_spill] sm:$0xff] }
  0x3e   : > { %v415_v42 = vsel %vm414_vm3, %v382_v44, %v413_v49  ;;  %v394_v17 = vmul.f32 %v889_v51, %v363_v11  ;;  %v395_v4 = vmul.f32 %v889_v51, %v372_v35  ;;  %v427_v9 = vsel %vm414_vm3, %v390_v28, %v426_v20  ;;  %v1016_v35 = vld [vmem:[#allocation10_spill] sm:$0xff] }
  0x3f   : > { %v417_v12 = vsel %vm416_vm4, %v383_v53, %v415_v42  ;;  %v428_v18 = vsel %vm416_vm4, %v391_v41, %v427_v9  ;;  %v439_v38 = vadd.f32 %v438_v5, %v747_v21  ;;  %v454_v39 = vadd.f32 %v453_v56, %v750_v22  ;;  %v1014_v53 = vld [vmem:[#allocation8_spill] sm:$0xff] }
  0x40   : > { %v419_v16 = vsel %vm418_vm5, %v384_v19, %v417_v12  ;;  %v429_v15 = vsel %vm418_vm5, %v392_v7, %v428_v18  ;;  %v1017_v19 = vld [vmem:[#allocation11_spill] sm:$0xff] }
  0x41   : > { %v421_v14 = vsel %vm420_vm6, %v385_v25, %v419_v16  ;;  %v430_v23 = vsel %vm420_vm6, %v393_v13, %v429_v15  ;;  %v440_v55 = vadd.f32 %v439_v38, %v756_v26  ;;  %v455_v48 = vadd.f32 %v454_v39, %v759_v27 }
  0x42   : > { %v423_v32 = vsel %vm422_vm7, %v386_v8, %v421_v14  ;;  %v431_v22 = vsel %vm422_vm7, %v394_v17, %v430_v23 }
  0x43   : > { %v425_v21 = vsel %vm424_vm8, %v387_v2, %v423_v32  ;;  %v432_v63 = vsel %vm424_vm8, %v395_v4, %v431_v22  ;;  %v441_v52 = vadd.f32 %v440_v55, %v766_v33  ;;  %v456_v1 = vadd.f32 %v455_v48, %v769_v36 }
  0x44   : > { %435 = vst.msk [vmem:[%s187_s20] sm:$0xff] %vm228_vm0, %v425_v21 }
  0x45   : > { %436 = vst.msk [vmem:[%s187_s20 + $0x8] sm:$0xff] %vm228_vm0, %v432_v63  ;;  %v442_v62 = vadd.f32 %v441_v52, %v772_v37  ;;  %v457_v26 = vadd.f32 %v456_v1, %v778_v45  ;;  %v1009_v37 = vld [vmem:[#allocation3_spill] sm:$0xff]  ;;  %v1010_v45 = vld [vmem:[#allocation4_spill] sm:$0xff] }
  0x47   : > { %v443_v27 = vadd.f32 %v442_v62, %v781_v46  ;;  %v458_v60 = vadd.f32 %v457_v26, %v786_v54  ;;  %v1011_v46 = vld [vmem:[#allocation5_spill] sm:$0xff]  ;;  %v1012_v54 = vld [vmem:[#allocation6_spill] sm:$0xff] }
  0x49   : > { %v444_v10 = vadd.f32 %v443_v27, %v799_v24  ;;  %v459_v0 = vadd.f32 %v458_v60, %v806_v29  ;;  %v1013_v24 = vld [vmem:[#allocation7_spill] sm:$0xff] }
  0x4b   : > { %v445_v34 = vadd.f32 %v444_v10, %v809_v30  ;;  %v460_v33 = vadd.f32 %v459_v0, %v817_v40 }
  0x4d   : > { %v446_v36 = vadd.f32 %v445_v34, %v824_v43  ;;  %v461_v57 = vadd.f32 %v460_v33, %v1008_v47 }
  0x4f   : > { %v447_v31 = vadd.f32 %v446_v36, %v1009_v37  ;;  %v462_v3 = vadd.f32 %v461_v57, %v1010_v45 }
  0x51   : > { %v448_v50 = vadd.f32 %v447_v31, %v1011_v46  ;;  %v463_v11 = vadd.f32 %v462_v3, %v1012_v54 }
  0x53   : > { %v449_v44 = vadd.f32 %v448_v50, %v1013_v24  ;;  %v464_v29 = vadd.f32 %v463_v11, %v1014_v53 }
  0x55   : > { %v450_v30 = vadd.f32 %v449_v44, %v1015_v58  ;;  %v465_v40 = vadd.f32 %v464_v29, %v1016_v35 }
  0x57   : > { %v451_v43 = vadd.f32 %v450_v30, %v875_v59  ;;  %v466_v25 = vadd.f32 %v465_v40, %v1017_v19 }
  0x59   : > { %v467_v6 = vmul.f32 %v451_v43, %v889_v51  ;;  %v468_v8 = vmul.f32 %v466_v25, %v889_v51 }
  0x5b   : > { %469 = vst.msk [vmem:[%s195_s23] sm:$0xff] %vm228_vm0, %v467_v6 }
  0x5c   : > { %470 = vst.msk [vmem:[%s195_s23 + $0x8] sm:$0xff] %vm228_vm0, %v468_v8 }
  0x5d PF: > { %s13_s11 = sadd.s32 1, %s666_s11   ;;  %s1018_s9 = smov %s662_s10 }
  0x5e   : > { %p10_p5 = scmp.ge.s32.totalorder %s13_s11, 4   ;;  %s1019_s10 = smov %s1021_s12 }
  0x60   :  { %12 = sbr.rel (!%p10_p5) target bundleno = 2 (0x2), region = 66 }

// kernel: asff_bifpnca3_forward.12
= control target key start
LH: loop header
LB: loop body
LE: loop exit
PB: predicated region body
PF: predicated region fallthrough
CT: control target
= control target key end

     0   :  { %vm22_vm0 = vcmask 64512   ;;  %vm156_vm6 = vcmask 97280   ;;  %s252_s1 = inlined_call_operand.vmem [shape: f32[8,12], index: 1, kind: input, shape index: {}]   ;;  %s253_s0 = inlined_call_operand.vmem [shape: f32[32,8], index: 0, kind: input, shape index: {}]   ;;  %s254_s2 = inlined_call_operand.vmem [shape: f32[1,12], index: 2, kind: input, shape index: {}]   ;;  %s255_s3 = inlined_call_operand.vmem [shape: f32[1,12], index: 3, kind: input, shape index: {}]   ;;  %s256_s4 = inlined_call_operand.vmem [shape: f32[32,12], index: 4, kind: output, shape index: {}]  }
   0x1   :  { %v21_v0 = vld [vmem:[%s252_s1] sm:$0xff]  ;;  %v18_v2 = vld [vmem:[%s253_s0 + $0x8] sm:$0xff]  ;;  %v19_v3 = vld [vmem:[%s253_s0 + $0x10] sm:$0xff] }
   0x2   :  { %v17_v1 = vld [vmem:[%s253_s0] sm:$0xff]  ;;  %50 = vmatpush.msra.mxu0 %v21_v0  ;;  %169 = vmatpush.msra.mxu1 %v21_v0  ;;  %v20_v4 = vld [vmem:[%s253_s0 + $0x18] sm:$0xff] }
   0x3   :  { %170 = vmatpush.msra.mxu2 %v21_v0  ;;  %171 = vmatpush.msra.mxu3 %v21_v0  ;;  %v172_v5 = vld [vmem:[%s254_s2] ss:$0 sm:$0xff] }
   0x4   :  { %165 = vmatmul.msk.f32.vlgmr.msra.gmra.mxu0 %vm22_vm0, %v17_v1  ;;  %166 = vmatmul.msk.f32.vlgmr.msra.gmra.mxu1 %vm22_vm0, %v18_v2  ;;  %v173_v6 = vld [vmem:[%s255_s3] ss:$0 sm:$0xff] }
   0x5   :  { %167 = vmatmul.msk.f32.vlgmr.msra.gmra.mxu2 %vm22_vm0, %v19_v3  ;;  %168 = vmatmul.msk.f32.vlgmr.msra.gmra.mxu3 %vm22_vm0, %v20_v4 }
  0x81   :  { %v52_v7 = vpop.f32.mrf.mxu0  ;;  %v55_v8 = vpop.f32.mrf.mxu1 }
  0x82   :  { %v68_v9 = vmul.f32 %v172_v5, %v52_v7  ;;  %v69_v10 = vmul.f32 %v172_v5, %v55_v8 }
  0x84   :  { %v76_v11 = vadd.f32 %v173_v6, %v68_v9  ;;  %v77_v12 = vadd.f32 %v173_v6, %v69_v10 }
  0x86   :  { %v80_v13 = vsub.f32 0.0, %v76_v11  ;;  %v81_v14 = vsub.f32 0.0, %v77_v12 }
  0x88   :  { %v84_v15 = vmul.f32 1.442695, %v80_v13  ;;  %v86_v16 = vmul.f32 1.442695, %v81_v14  ;;  %v58_v17 = vpop.f32.mrf.mxu2  ;;  %v61_v18 = vpop.f32.mrf.mxu3 }
  0x89   :  { %v70_v19 = vmul.f32 %v172_v5, %v58_v17  ;;  %v71_v20 = vmul.f32 %v172_v5, %v61_v18 }
  0x8a   :  { %174 = vpow2.f32 %v84_v15 }
  0x8b   :  { %176 = vpow2.f32 %v86_v16  ;;  %v78_v21 = vadd.f32 %v173_v6, %v70_v19  ;;  %v79_v22 = vadd.f32 %v173_v6, %v71_v20 }
  0x8d   :  { %v82_v23 = vsub.f32 0.0, %v78_v21  ;;  %v83_v24 = vsub.f32 0.0, %v79_v22 }
  0x8f   :  { %v88_v25 = vmul.f32 1.442695, %v82_v23  ;;  %v90_v26 = vmul.f32 1.442695, %v83_v24 }
  0x90   :  { %v175_v27 = vpop.eup %174 }
  0x91   :  { %v177_v28 = vpop.eup %176  ;;  %v92_v29 = vadd.f32 1.0, %v175_v27  ;;  %178 = vpow2.f32 %v88_v25 }
  0x92   :  { %v93_v30 = vadd.f32 1.0, %v177_v28  ;;  %180 = vpow2.f32 %v90_v26 }
  0x93   :  { %182 = vrcp.f32 %v92_v29  ;;  %vm101_vm1 = vweird.f32 %v92_v29  ;;  %v105_v40 = vand.u32 2147483647, %v92_v29  ;;  %v107_v41 = vand.u32 2147483648, %v92_v29 }
  0x94   :  { %184 = vrcp.f32 %v93_v30  ;;  %v120_v44 = vand.u32 2147483647, %v93_v30  ;;  %v122_v45 = vand.u32 2147483648, %v93_v30  ;;  %vm116_vm3 = vweird.f32 %v93_v30 }
  0x95   :  { %v108_v49 = vor.u32 1.1754944e-38, %v107_v41  ;;  %vm106_vm7 = vcmp.eq.f32.partialorder %v105_v40, 8.507059e+37 }
  0x96   :  { %vm121_vm9 = vcmp.eq.f32.partialorder %v120_v44, 8.507059e+37  ;;  %v123_v54 = vor.u32 1.1754944e-38, %v122_v45 }
  0x97   :  { %v179_v31 = vpop.eup %178 }
  0x98   :  { %v181_v32 = vpop.eup %180  ;;  %v94_v33 = vadd.f32 1.0, %v179_v31 }
  0x99   :  { %v183_v34 = vpop.eup %182  ;;  %v95_v35 = vadd.f32 1.0, %v181_v32 }
  0x9a   :  { %v185_v36 = vpop.eup %184  ;;  %v97_v37 = vmul.f32 %v183_v34, %v92_v29  ;;  %186 = vrcp.f32 %v94_v33  ;;  %vm102_vm2 = vweird.f32 %v183_v34  ;;  %v137_v60 = vand.u32 2147483648, %v94_v33 }
  0x9b   :  { %v112_v38 = vmul.f32 %v185_v36, %v93_v30  ;;  %188 = vrcp.f32 %v95_v35  ;;  %vm117_vm4 = vweird.f32 %v185_v36  ;;  %vm103_vm5 = vmor %vm101_vm1, %vm102_vm2  ;;  %v135_v62 = vand.u32 2147483647, %v94_v33 }
  0x9c   :  { %v98_v39 = vsub.f32 1.0, %v97_v37  ;;  %vm118_vm8 = vmor %vm116_vm3, %vm117_vm4  ;;  %vm131_vm11 = vweird.f32 %v94_v33  ;;  %v152_v0 = vand.u32 2147483648, %v95_v35  ;;  %v150_v3 = vand.u32 2147483647, %v95_v35 }
  0x9d   :  { %v113_v42 = vsub.f32 1.0, %v112_v38  ;;  %v138_v4 = vor.u32 1.1754944e-38, %v137_v60  ;;  %vm136_vm14 = vcmp.eq.f32.partialorder %v135_v62, 8.507059e+37  ;;  %vm146_vm15 = vweird.f32 %v95_v35 }
  0x9e   :  { %v99_v43 = vmul.f32 %v183_v34, %v98_v39  ;;  %v153_v8 = vor.u32 1.1754944e-38, %v152_v0  ;;  %vm151_vm1 = vcmp.eq.f32.partialorder %v150_v3, 8.507059e+37 }
  0x9f   :  { %v114_v46 = vmul.f32 %v185_v36, %v113_v42 }
  0xa0   :  { %v187_v47 = vpop.eup %186  ;;  %v100_v48 = vadd.f32 %v183_v34, %v99_v43 }
  0xa1   :  { %v115_v50 = vadd.f32 %v185_v36, %v114_v46  ;;  %v127_v51 = vmul.f32 %v187_v47, %v94_v33  ;;  %v189_v52 = vpop.eup %188  ;;  %vm132_vm10 = vweird.f32 %v187_v47 }
  0xa2   :  { %v104_v53 = vsel %vm103_vm5, %v183_v34, %v100_v48  ;;  %v142_v58 = vmul.f32 %v189_v52, %v95_v35  ;;  %vm147_vm12 = vweird.f32 %v189_v52  ;;  %vm133_vm13 = vmor %vm131_vm11, %vm132_vm10 }
  0xa3   :  { %v109_v55 = vsel %vm106_vm7, %v108_v49, %v104_v53  ;;  %v119_v56 = vsel %vm118_vm8, %v185_v36, %v115_v50  ;;  %v128_v57 = vsub.f32 1.0, %v127_v51  ;;  %vm148_vm0 = vmor %vm146_vm15, %vm147_vm12 }
  0xa4   :  { %157 = vst.msk [vmem:[%s256_s4] sm:$0xff] %vm156_vm6, %v109_v55  ;;  %v124_v59 = vsel %vm121_vm9, %v123_v54, %v119_v56  ;;  %v143_v63 = vsub.f32 1.0, %v142_v58 }
  0xa5   :  { %158 = vst.msk [vmem:[%s256_s4 + $0x8] sm:$0xff] %vm156_vm6, %v124_v59  ;;  %v129_v61 = vmul.f32 %v187_v47, %v128_v57 }
  0xa6   :  { %v144_v2 = vmul.f32 %v189_v52, %v143_v63 }
  0xa7   :  { %v130_v1 = vadd.f32 %v187_v47, %v129_v61 }
  0xa8   :  { %v145_v6 = vadd.f32 %v189_v52, %v144_v2 }
  0xa9   :  { %v134_v5 = vsel %vm133_vm13, %v187_v47, %v130_v1 }
  0xaa   :  { %v139_v7 = vsel %vm136_vm14, %v138_v4, %v134_v5  ;;  %v149_v9 = vsel %vm148_vm0, %v189_v52, %v145_v6 }
  0xab   :  { %159 = vst.msk [vmem:[%s256_s4 + $0x10] sm:$0xff] %vm156_vm6, %v139_v7  ;;  %v154_v10 = vsel %vm151_vm1, %v153_v8, %v149_v9 }
  0xac   :  { %160 = vst.msk [vmem:[%s256_s4 + $0x18] sm:$0xff] %vm156_vm6, %v154_v10 }

// kernel: asff_bifpnca3_forward.11
= control target key start
LH: loop header
LB: loop body
LE: loop exit
PB: predicated region body
PF: predicated region fallthrough
CT: control target
= control target key end

     0   :  { %vm52_vm0 = vcmask 1043456   ;;  %vm27_vm1 = vcmask 97280   ;;  %vm161_vm2 = vcmask 64512   ;;  %s292_s1 = inlined_call_operand.vmem [shape: f32[12,8], index: 1, kind: input, shape index: {}]   ;;  %s293_s0 = inlined_call_operand.vmem [shape: f32[64,12], index: 0, kind: input, shape index: {}]   ;;  %s294_s2 = inlined_call_operand.vmem [shape: f32[1,8], index: 2, kind: input, shape index: {}]   ;;  %s295_s3 = inlined_call_operand.vmem [shape: f32[1,8], index: 3, kind: input, shape index: {}]   ;;  %s296_s4 = inlined_call_operand.vmem [shape: f32[64,8], index: 4, kind: output, shape index: {}]  }
   0x1   :  { %v26_v0 = vld [vmem:[%s292_s1 + $0x8] sm:$0xf]  ;;  %v25_v1 = vld [vmem:[%s292_s1] sm:$0xff]  ;;  %v19_v3 = vld [vmem:[%s293_s0 + $0x10] sm:$0xff] }
   0x2   :  { %174 = vmatpush.msk.msra.mxu0 %vm52_vm0, %v26_v0  ;;  %183 = vmatpush.msk.msra.mxu1 %vm52_vm0, %v26_v0  ;;  %v17_v2 = vld [vmem:[%s293_s0] sm:$0xff]  ;;  %v23_v5 = vld [vmem:[%s293_s0 + $0x30] sm:$0xff]  ;;  %v18_v6 = vld [vmem:[%s293_s0 + $0x8] sm:$0xff] }
   0x3   :  { %184 = vmatpush.msk.msra.mxu2 %vm52_vm0, %v26_v0  ;;  %185 = vmatpush.msk.msra.mxu3 %vm52_vm0, %v26_v0  ;;  %v21_v4 = vld [vmem:[%s293_s0 + $0x20] sm:$0xff]  ;;  %v20_v7 = vld [vmem:[%s293_s0 + $0x18] sm:$0xff]  ;;  %v22_v8 = vld [vmem:[%s293_s0 + $0x28] sm:$0xff] }
   0x4   :  { %71 = vmatpush.msra.mxu0 %v25_v1  ;;  %186 = vmatpush.msra.mxu1 %v25_v1  ;;  %v24_v9 = vld [vmem:[%s293_s0 + $0x38] sm:$0xff]  ;;  %v189_v10 = vld [vmem:[%s294_s2] ss:$0 sm:$0xff] }
   0x5   :  { %187 = vmatpush.msra.mxu2 %v25_v1  ;;  %188 = vmatpush.msra.mxu3 %v25_v1  ;;  %v190_v11 = vld [vmem:[%s295_s3] ss:$0 sm:$0xff] }
   0x6   :  { %175 = vmatmul.msk.f32.vlgmr.msra.gmra.mxu0 %vm27_vm1, %v17_v2  ;;  %177 = vmatmul.msk.f32.vlgmr.msra.gmra.mxu1 %vm27_vm1, %v19_v3 }
   0x7   :  { %179 = vmatmul.msk.f32.vlgmr.msra.gmra.mxu2 %vm27_vm1, %v21_v4  ;;  %181 = vmatmul.msk.f32.vlgmr.msra.gmra.mxu3 %vm27_vm1, %v23_v5 }
   0xe   :  { %176 = vmatmul.msk.f32.gmra.mxu0 %vm27_vm1, %v18_v6  ;;  %178 = vmatmul.msk.f32.gmra.mxu1 %vm27_vm1, %v20_v7 }
   0xf   :  { %180 = vmatmul.msk.f32.gmra.mxu2 %vm27_vm1, %v22_v8  ;;  %182 = vmatmul.msk.f32.gmra.mxu3 %vm27_vm1, %v24_v9 }
  0x83   :  { %v73_v12 = vpop.f32.mrf.mxu0  ;;  %v79_v13 = vpop.f32.mrf.mxu1 }
  0x84   :  { %v101_v14 = vmul.f32 %v189_v10, %v73_v12  ;;  %v103_v15 = vmul.f32 %v189_v10, %v79_v13 }
  0x86   :  { %v113_v16 = vadd.f32 %v190_v11, %v101_v14  ;;  %v115_v17 = vadd.f32 %v190_v11, %v103_v15 }
  0x88   :  { %v121_v18 = vadd.f32 3.0, %v113_v16  ;;  %v123_v19 = vadd.f32 3.0, %v115_v17 }
  0x8a   :  { %v129_v20 = vmax.f32 %v121_v18, 0.0  ;;  %v131_v21 = vmax.f32 %v123_v19, 0.0  ;;  %v85_v22 = vpop.f32.mrf.mxu2  ;;  %v91_v23 = vpop.f32.mrf.mxu3 }
  0x8b   :  { %v105_v24 = vmul.f32 %v189_v10, %v85_v22  ;;  %v107_v25 = vmul.f32 %v189_v10, %v91_v23  ;;  %v76_v26 = vpop.f32.mrf.mxu0  ;;  %v82_v27 = vpop.f32.mrf.mxu1 }
  0x8c   :  { %v137_v28 = vmin.f32 %v129_v20, 6.0  ;;  %v139_v29 = vmin.f32 %v131_v21, 6.0  ;;  %v102_v30 = vmul.f32 %v189_v10, %v76_v26  ;;  %v104_v31 = vmul.f32 %v189_v10, %v82_v27 }
  0x8d   :  { %v117_v32 = vadd.f32 %v190_v11, %v105_v24  ;;  %v119_v33 = vadd.f32 %v190_v11, %v107_v25 }
  0x8e   :  { %v145_v34 = vmul.f32 0.16666667, %v137_v28  ;;  %v147_v35 = vmul.f32 0.16666667, %v139_v29  ;;  %v114_v36 = vadd.f32 %v190_v11, %v102_v30  ;;  %v116_v37 = vadd.f32 %v190_v11, %v104_v31 }
  0x8f   :  { %v125_v38 = vadd.f32 3.0, %v117_v32  ;;  %v127_v39 = vadd.f32 3.0, %v119_v33 }
  0x90   :  { %v153_v40 = vmul.f32 %v145_v34, %v113_v16  ;;  %v155_v41 = vmul.f32 %v147_v35, %v115_v17  ;;  %v122_v42 = vadd.f32 3.0, %v114_v36  ;;  %v124_v43 = vadd.f32 3.0, %v116_v37 }
  0x91   :  { %v133_v44 = vmax.f32 %v125_v38, 0.0  ;;  %v135_v45 = vmax.f32 %v127_v39, 0.0 }
  0x92   :  { %162 = vst.msk [vmem:[%s296_s4] sm:$0xff] %vm161_vm2, %v153_v40  ;;  %v130_v46 = vmax.f32 %v122_v42, 0.0  ;;  %v132_v47 = vmax.f32 %v124_v43, 0.0  ;;  %v88_v48 = vpop.f32.mrf.mxu2  ;;  %v94_v49 = vpop.f32.mrf.mxu3 }
  0x93   :  { %164 = vst.msk [vmem:[%s296_s4 + $0x10] sm:$0xff] %vm161_vm2, %v155_v41  ;;  %v141_v50 = vmin.f32 %v133_v44, 6.0  ;;  %v143_v51 = vmin.f32 %v135_v45, 6.0  ;;  %v106_v52 = vmul.f32 %v189_v10, %v88_v48  ;;  %v108_v53 = vmul.f32 %v189_v10, %v94_v49 }
  0x94   :  { %v138_v54 = vmin.f32 %v130_v46, 6.0  ;;  %v140_v55 = vmin.f32 %v132_v47, 6.0 }
  0x95   :  { %v149_v56 = vmul.f32 0.16666667, %v141_v50  ;;  %v151_v57 = vmul.f32 0.16666667, %v143_v51  ;;  %v118_v58 = vadd.f32 %v190_v11, %v106_v52  ;;  %v120_v59 = vadd.f32 %v190_v11, %v108_v53 }
  0x96   :  { %v146_v60 = vmul.f32 0.16666667, %v138_v54  ;;  %v148_v61 = vmul.f32 0.16666667, %v140_v55 }
  0x97   :  { %v157_v62 = vmul.f32 %v149_v56, %v117_v32  ;;  %v159_v63 = vmul.f32 %v151_v57, %v119_v33  ;;  %v126_v0 = vadd.f32 3.0, %v118_v58  ;;  %v128_v1 = vadd.f32 3.0, %v120_v59 }
  0x98   :  { %v154_v2 = vmul.f32 %v146_v60, %v114_v36  ;;  %v156_v3 = vmul.f32 %v148_v61, %v116_v37 }
  0x99   :  { %166 = vst.msk [vmem:[%s296_s4 + $0x20] sm:$0xff] %vm161_vm2, %v157_v62  ;;  %v134_v4 = vmax.f32 %v126_v0, 0.0  ;;  %v136_v5 = vmax.f32 %v128_v1, 0.0 }
  0x9a   :  { %168 = vst.msk [vmem:[%s296_s4 + $0x30] sm:$0xff] %vm161_vm2, %v159_v63 }
  0x9b   :  { %163 = vst.msk [vmem:[%s296_s4 + $0x8] sm:$0xff] %vm161_vm2, %v154_v2  ;;  %v142_v6 = vmin.f32 %v134_v4, 6.0  ;;  %v144_v7 = vmin.f32 %v136_v5, 6.0 }
  0x9c   :  { %165 = vst.msk [vmem:[%s296_s4 + $0x18] sm:$0xff] %vm161_vm2, %v156_v3 }
  0x9d   :  { %v150_v8 = vmul.f32 0.16666667, %v142_v6  ;;  %v152_v9 = vmul.f32 0.16666667, %v144_v7 }
  0x9f   :  { %v158_v10 = vmul.f32 %v150_v8, %v118_v58  ;;  %v160_v11 = vmul.f32 %v152_v9, %v120_v59 }
  0xa1   :  { %167 = vst.msk [vmem:[%s296_s4 + $0x28] sm:$0xff] %vm161_vm2, %v158_v10 }
  0xa2   :  { %169 = vst.msk [vmem:[%s296_s4 + $0x38] sm:$0xff] %vm161_vm2, %v160_v11 }

// kernel: asff_bifpnca3_forward.14
= control target key start
LH: loop header
LB: loop body
LE: loop exit
PB: predicated region body
PF: predicated region fallthrough
CT: control target
= control target key end

     0   :  { %s665_s12 = smov 0   ;;  %s667_s13 = smov 0   ;;  %s864_s0 = inlined_call_operand.vmem [shape: f32[2,16,16,12], index: 0, kind: input, shape index: {}]   ;;  %s865_s1 = inlined_call_operand.vmem [shape: f32[2,16,12], index: 1, kind: input, shape index: {}]   ;;  %s866_s2 = inlined_call_operand.vmem [shape: f32[2,16,12], index: 2, kind: input, shape index: {}]   ;;  %s867_s3 = inlined_call_operand.vmem [shape: f32[2,16,16,12], index: 3, kind: output, shape index: {}]  }
   0x1   :  { %s669_s14 = smov 0  }
   0x2 LB: > { %s25_s15 = sadd.s32 1, %s639_s13  ;;  %p582_p0 = scmp.ge.s32.totalorder %s643_s14, 1  ;;  %s643_s14 = sphi %s669_s14, %s13_s14   ;;  %s639_s13 = sphi %s667_s13, %s869_s13   ;;  %s635_s12 = sphi %s665_s12, %s868_s12  }
   0x3   : > { %p27_p1 = scmp.ge.s32.totalorder %s25_s15, 2  ;;  %p186_p2 = scmp.lt.s32.totalorder %s643_s14, 3 }
   0x5   : > { %s871_s15 = smov (%p27_p1, %s25_s15), 0  ;;  %p187_p3 = pnand %p582_p0, %p186_p2 }
   0x6   : > { %p235_p4 = scmp.lt.s32.totalorder (!%p187_p3), %s635_s12, 1 }
   0x7   : > { %190 = sbr.rel (%p187_p3) target bundleno = 55 (0x37), region = 32 }
   0xc   : > { %s873_s12 = smov (!%p235_p4, %s635_s12), 1  ;;  %vm419_vm0 = vcmask 97280  }
   0xd   : > { %s593_s16 = sshll.u32 %s873_s12, 8  ;;  %s594_s17 = sshll.u32 %s873_s12, 4 }
   0xe   : > { %s686_s20 = scalar_lea.vmem %s864_s0, %s593_s16  ;;  %s691_s23 = scalar_lea.vmem %s865_s1, %s594_s17 }
   0xf   : > { %s259_s26 = scalar_lea.vmem %s866_s2, %s594_s17  ;;  %v271_v0 = vld [vmem:[%s686_s20] sm:$0xff]  ;;  %v272_v2 = vld [vmem:[%s686_s20 + $0x8] sm:$0xff]  ;;  %v273_v8 = vld [vmem:[%s686_s20 + $0x10] sm:$0xff]  ;;  %s720_s29 = scalar_lea.vmem %s867_s3, %s593_s16 }
  0x10   : > { %v698_v1 = vld [vmem:[%s691_s23] sm:$0xff]  ;;  %v703_v4 = vld [vmem:[%s259_s26 + $0x8] sm:$0xff]  ;;  %v274_v9 = vld [vmem:[%s686_s20 + $0x18] sm:$0xff] }
  0x11   : > { %v701_v3 = vld [vmem:[%s259_s26] sm:$0xff]  ;;  %v323_v5 = vperm.slane %v698_v1, 0  ;;  %v309_v6 = vrot.slane %v698_v1, 1  ;;  %v310_v7 = vrot.slane %v698_v1, 2  ;;  %v311_v11 = vrot.slane %v698_v1, 3  ;;  %v276_v18 = vld [vmem:[%s686_s20 + $0x28] sm:$0xff] }
  0x12   : > { %v275_v10 = vld [vmem:[%s686_s20 + $0x20] sm:$0xff]  ;;  %v312_v12 = vrot.slane %v698_v1, 4  ;;  %v313_v13 = vrot.slane %v698_v1, 5  ;;  %v277_v19 = vld [vmem:[%s686_s20 + $0x30] sm:$0xff]  ;;  %v278_v20 = vld [vmem:[%s686_s20 + $0x38] sm:$0xff]  ;;  %v314_v48 = vrot.slane %v698_v1, 6 }
  0x13   : > { %v355_v14 = vmul.f32 %v323_v5, %v271_v0  ;;  %v356_v15 = vmul.f32 %v323_v5, %v272_v2  ;;  %v324_v16 = vperm.slane %v309_v6, 0  ;;  %v325_v17 = vperm.slane %v310_v7, 0  ;;  %v279_v22 = vld [vmem:[%s686_s20 + $0x40] sm:$0xff]  ;;  %v280_v29 = vld [vmem:[%s686_s20 + $0x48] sm:$0xff]  ;;  %v281_v34 = vld [vmem:[%s686_s20 + $0x50] sm:$0xff] }
  0x14   : > { %v326_v21 = vperm.slane %v311_v11, 0  ;;  %v327_v23 = vperm.slane %v312_v12, 0  ;;  %v328_v24 = vperm.slane %v313_v13, 0  ;;  %v282_v35 = vld [vmem:[%s686_s20 + $0x58] sm:$0xff]  ;;  %v733_v39 = vld [vmem:[%s691_s23 + $0x8] sm:$0xff]  ;;  %v283_v47 = vld [vmem:[%s686_s20 + $0x60] sm:$0xff] }
  0x15   : > { %v387_v25 = vmul.f32 %v355_v14, %v701_v3  ;;  %v388_v26 = vmul.f32 %v356_v15, %v703_v4  ;;  %v357_v27 = vmul.f32 %v324_v16, %v273_v8  ;;  %v358_v28 = vmul.f32 %v324_v16, %v274_v9  ;;  %v284_v52 = vld [vmem:[%s686_s20 + $0x68] sm:$0xff]  ;;  %v285_v53 = vld [vmem:[%s686_s20 + $0x70] sm:$0xff]  ;;  %v286_v54 = vld [vmem:[%s686_s20 + $0x78] sm:$0xff] }
  0x16   : > { %v359_v30 = vmul.f32 %v325_v17, %v275_v10  ;;  %v360_v31 = vmul.f32 %v325_v17, %v276_v18  ;;  %v361_v32 = vmul.f32 %v326_v21, %v277_v19  ;;  %v362_v33 = vmul.f32 %v326_v21, %v278_v20  ;;  %v287_v60 = vld [vmem:[%s686_s20 + $0x80] sm:$0xff]  ;;  %v288_v63 = vld [vmem:[%s686_s20 + $0x88] sm:$0xff]  ;;  %v289_v8 = vld [vmem:[%s686_s20 + $0x90] sm:$0xff] }
  0x17   : > { %420 = vst.msk [vmem:[%s720_s29] sm:$0xff] %vm419_vm0, %v387_v25  ;;  %v389_v36 = vmul.f32 %v357_v27, %v701_v3  ;;  %v390_v37 = vmul.f32 %v358_v28, %v703_v4  ;;  %v363_v38 = vmul.f32 %v327_v23, %v279_v22  ;;  %v364_v42 = vmul.f32 %v327_v23, %v280_v29  ;;  %v290_v10 = vld [vmem:[%s686_s20 + $0x98] sm:$0xff]  ;;  %v291_v16 = vld [vmem:[%s686_s20 + $0xa0] sm:$0xff]  ;;  %v292_v19 = vld [vmem:[%s686_s20 + $0xa8] sm:$0xff] }
  0x18   : > { %421 = vst.msk [vmem:[%s720_s29 + $0x8] sm:$0xff] %vm419_vm0, %v388_v26  ;;  %v391_v40 = vmul.f32 %v359_v30, %v701_v3  ;;  %v392_v41 = vmul.f32 %v360_v31, %v703_v4  ;;  %v393_v43 = vmul.f32 %v361_v32, %v701_v3  ;;  %v365_v44 = vmul.f32 %v328_v24, %v281_v34  ;;  %v293_v23 = vld [vmem:[%s686_s20 + $0xb0] sm:$0xff]  ;;  %v294_v27 = vld [vmem:[%s686_s20 + $0xb8] sm:$0xff]  ;;  %v295_v32 = vld [vmem:[%s686_s20 + $0xc0] sm:$0xff] }
  0x19   : > { %422 = vst.msk [vmem:[%s720_s29 + $0x10] sm:$0xff] %vm419_vm0, %v389_v36  ;;  %v366_v45 = vmul.f32 %v328_v24, %v282_v35  ;;  %v394_v46 = vmul.f32 %v362_v33, %v703_v4  ;;  %v315_v49 = vrot.slane %v698_v1, 7  ;;  %v316_v50 = vrot.slane %v733_v39, 1  ;;  %v296_v35 = vld [vmem:[%s686_s20 + $0xc8] sm:$0xff] }
  0x1a   : > { %423 = vst.msk [vmem:[%s720_s29 + $0x18] sm:$0xff] %vm419_vm0, %v390_v37  ;;  %v395_v51 = vmul.f32 %v363_v38, %v701_v3  ;;  %v331_v55 = vperm.slane %v733_v39, 0  ;;  %v317_v56 = vrot.slane %v733_v39, 2  ;;  %v396_v57 = vmul.f32 %v364_v42, %v703_v4 }
  0x1b   : > { %424 = vst.msk [vmem:[%s720_s29 + $0x20] sm:$0xff] %vm419_vm0, %v391_v40  ;;  %v329_v58 = vperm.slane %v314_v48, 0  ;;  %v330_v59 = vperm.slane %v315_v49, 0  ;;  %v397_v61 = vmul.f32 %v365_v44, %v701_v3  ;;  %v398_v62 = vmul.f32 %v366_v45, %v703_v4  ;;  %v298_v44 = vld [vmem:[%s686_s20 + $0xd8] sm:$0xff] }
  0x1c   : > { %425 = vst.msk [vmem:[%s720_s29 + $0x28] sm:$0xff] %vm419_vm0, %v392_v41  ;;  %v332_v0 = vperm.slane %v316_v50, 0  ;;  %v318_v1 = vrot.slane %v733_v39, 3  ;;  %v371_v9 = vmul.f32 %v331_v55, %v287_v60  ;;  %v333_v11 = vperm.slane %v317_v56, 0  ;;  %v297_v41 = vld [vmem:[%s686_s20 + $0xd0] sm:$0xff]  ;;  %v300_v50 = vld [vmem:[%s686_s20 + $0xe8] sm:$0xff] }
  0x1d   : > { %426 = vst.msk [vmem:[%s720_s29 + $0x30] sm:$0xff] %vm419_vm0, %v393_v43  ;;  %v367_v2 = vmul.f32 %v329_v58, %v283_v47  ;;  %v368_v5 = vmul.f32 %v329_v58, %v284_v52  ;;  %v369_v6 = vmul.f32 %v330_v59, %v285_v53  ;;  %v370_v7 = vmul.f32 %v330_v59, %v286_v54  ;;  %v299_v47 = vld [vmem:[%s686_s20 + $0xe0] sm:$0xff]  ;;  %v301_v54 = vld [vmem:[%s686_s20 + $0xf0] sm:$0xff] }
  0x1e   : > { %427 = vst.msk [vmem:[%s720_s29 + $0x38] sm:$0xff] %vm419_vm0, %v394_v46  ;;  %v319_v12 = vrot.slane %v733_v39, 4  ;;  %v372_v15 = vmul.f32 %v331_v55, %v288_v63  ;;  %v373_v18 = vmul.f32 %v332_v0, %v289_v8  ;;  %v334_v20 = vperm.slane %v318_v1, 0 }
  0x1f   : > { %428 = vst.msk [vmem:[%s720_s29 + $0x40] sm:$0xff] %vm419_vm0, %v395_v51  ;;  %v399_v13 = vmul.f32 %v367_v2, %v701_v3  ;;  %v400_v14 = vmul.f32 %v368_v5, %v703_v4  ;;  %v401_v17 = vmul.f32 %v369_v6, %v701_v3  ;;  %v402_v21 = vmul.f32 %v370_v7, %v703_v4 }
  0x20   : > { %429 = vst.msk [vmem:[%s720_s29 + $0x48] sm:$0xff] %vm419_vm0, %v396_v57  ;;  %v374_v22 = vmul.f32 %v332_v0, %v290_v10  ;;  %v320_v24 = vrot.slane %v733_v39, 5  ;;  %v403_v25 = vmul.f32 %v371_v9, %v701_v3  ;;  %v375_v26 = vmul.f32 %v333_v11, %v291_v16  ;;  %v302_v57 = vld [vmem:[%s686_s20 + $0xf8] sm:$0xff] }
  0x21   : > { %430 = vst.msk [vmem:[%s720_s29 + $0x50] sm:$0xff] %vm419_vm0, %v397_v61  ;;  %v335_v28 = vperm.slane %v319_v12, 0  ;;  %v321_v29 = vrot.slane %v733_v39, 6  ;;  %v404_v30 = vmul.f32 %v372_v15, %v703_v4  ;;  %v376_v31 = vmul.f32 %v333_v11, %v292_v19 }
  0x22   : > { %431 = vst.msk [vmem:[%s720_s29 + $0x58] sm:$0xff] %vm419_vm0, %v398_v62  ;;  %v405_v33 = vmul.f32 %v373_v18, %v701_v3  ;;  %v377_v34 = vmul.f32 %v334_v20, %v293_v23  ;;  %v336_v36 = vperm.slane %v320_v24, 0  ;;  %v322_v37 = vrot.slane %v733_v39, 7 }
  0x23   : > { %432 = vst.msk [vmem:[%s720_s29 + $0x60] sm:$0xff] %vm419_vm0, %v399_v13  ;;  %v406_v38 = vmul.f32 %v374_v22, %v703_v4  ;;  %v378_v40 = vmul.f32 %v334_v20, %v294_v27  ;;  %v407_v42 = vmul.f32 %v375_v26, %v701_v3  ;;  %v379_v43 = vmul.f32 %v335_v28, %v295_v32 }
  0x24   : > { %433 = vst.msk [vmem:[%s720_s29 + $0x68] sm:$0xff] %vm419_vm0, %v400_v14  ;;  %v337_v45 = vperm.slane %v321_v29, 0  ;;  %v408_v39 = vmul.f32 %v376_v31, %v703_v4  ;;  %v380_v46 = vmul.f32 %v335_v28, %v296_v35  ;;  %v409_v48 = vmul.f32 %v377_v34, %v701_v3 }
  0x25   : > { %434 = vst.msk [vmem:[%s720_s29 + $0x70] sm:$0xff] %vm419_vm0, %v401_v17  ;;  %v381_v49 = vmul.f32 %v336_v36, %v297_v41  ;;  %v338_v51 = vperm.slane %v322_v37, 0  ;;  %v410_v52 = vmul.f32 %v378_v40, %v703_v4  ;;  %v382_v53 = vmul.f32 %v336_v36, %v298_v44 }
  0x26   : > { %435 = vst.msk [vmem:[%s720_s29 + $0x78] sm:$0xff] %vm419_vm0, %v402_v21  ;;  %v411_v55 = vmul.f32 %v379_v43, %v701_v3  ;;  %v383_v56 = vmul.f32 %v337_v45, %v299_v47  ;;  %v412_v58 = vmul.f32 %v380_v46, %v703_v4  ;;  %v384_v59 = vmul.f32 %v337_v45, %v300_v50 }
  0x27   : > { %436 = vst.msk [vmem:[%s720_s29 + $0x80] sm:$0xff] %vm419_vm0, %v403_v25  ;;  %v413_v60 = vmul.f32 %v381_v49, %v701_v3  ;;  %v385_v61 = vmul.f32 %v338_v51, %v301_v54  ;;  %v414_v62 = vmul.f32 %v382_v53, %v703_v4  ;;  %v386_v63 = vmul.f32 %v338_v51, %v302_v57 }
  0x28   : > { %437 = vst.msk [vmem:[%s720_s29 + $0x88] sm:$0xff] %vm419_vm0, %v404_v30  ;;  %v415_v0 = vmul.f32 %v383_v56, %v701_v3  ;;  %v416_v1 = vmul.f32 %v384_v59, %v703_v4 }
  0x29   : > { %438 = vst.msk [vmem:[%s720_s29 + $0x90] sm:$0xff] %vm419_vm0, %v405_v33  ;;  %v417_v2 = vmul.f32 %v385_v61, %v701_v3  ;;  %v418_v5 = vmul.f32 %v386_v63, %v703_v4 }
  0x2a   : > { %439 = vst.msk [vmem:[%s720_s29 + $0x98] sm:$0xff] %vm419_vm0, %v406_v38 }
  0x2b   : > { %440 = vst.msk [vmem:[%s720_s29 + $0xa0] sm:$0xff] %vm419_vm0, %v407_v42 }
  0x2c   : > { %441 = vst.msk [vmem:[%s720_s29 + $0xa8] sm:$0xff] %vm419_vm0, %v408_v39 }
  0x2d   : > { %442 = vst.msk [vmem:[%s720_s29 + $0xb0] sm:$0xff] %vm419_vm0, %v409_v48 }
  0x2e   : > { %443 = vst.msk [vmem:[%s720_s29 + $0xb8] sm:$0xff] %vm419_vm0, %v410_v52 }
  0x2f   : > { %444 = vst.msk [vmem:[%s720_s29 + $0xc0] sm:$0xff] %vm419_vm0, %v411_v55 }
  0x30   : > { %445 = vst.msk [vmem:[%s720_s29 + $0xc8] sm:$0xff] %vm419_vm0, %v412_v58 }
  0x31   : > { %446 = vst.msk [vmem:[%s720_s29 + $0xd0] sm:$0xff] %vm419_vm0, %v413_v60 }
  0x32   : > { %447 = vst.msk [vmem:[%s720_s29 + $0xd8] sm:$0xff] %vm419_vm0, %v414_v62 }
  0x33   : > { %448 = vst.msk [vmem:[%s720_s29 + $0xe0] sm:$0xff] %vm419_vm0, %v415_v0 }
  0x34   : > { %449 = vst.msk [vmem:[%s720_s29 + $0xe8] sm:$0xff] %vm419_vm0, %v416_v1 }
  0x35   : > { %450 = vst.msk [vmem:[%s720_s29 + $0xf0] sm:$0xff] %vm419_vm0, %v417_v2 }
  0x36   : > { %451 = vst.msk [vmem:[%s720_s29 + $0xf8] sm:$0xff] %vm419_vm0, %v418_v5 }
  0x37 PF: > { %s13_s14 = sadd.s32 1, %s643_s14   ;;  %s868_s12 = smov %s639_s13 }
  0x38   : > { %p10_p5 = scmp.ge.s32.totalorder %s13_s14, 4   ;;  %s869_s13 = smov %s871_s15 }
  0x3a   :  { %12 = sbr.rel (!%p10_p5) target bundleno = 2 (0x2), region = 68 }

// kernel: asff_bifpnca3_forward.15
= control target key start
LH: loop header
LB: loop body
LE: loop exit
PB: predicated region body
PF: predicated region fallthrough
CT: control target
= control target key end

     0   :  { %vm288_vm0 = vcmask 1043456   ;;  %vm95_vm1 = vcmask 883712   ;;  %vm1917_vm5 = vcmask 31744   ;;  %s4228_s1 = inlined_call_operand.vmem [shape: f32[108,4], index: 1, kind: input, shape index: {}]   ;;  %s4229_s2 = inlined_call_operand.vmem [shape: f32[1,4], index: 2, kind: input, shape index: {}]   ;;  %s4230_s3 = inlined_call_operand.vmem [shape: f32[1,4], index: 3, kind: input, shape index: {}]   ;;  %s4231_s0 = inlined_call_operand.vmem [shape: f32[512,108], index: 0, kind: input, shape index: {}]   ;;  %s4232_s4 = inlined_call_operand.vmem [shape: f32[512,4], index: 4, kind: output, shape index: {}]  }
   0x1   :  { %v94_v0 = vld [vmem:[%s4228_s1 + $0x68] sm:$0xf]  ;;  %v93_v1 = vld [vmem:[%s4228_s1 + $0x60] sm:$0xff]  ;;  %v92_v2 = vld [vmem:[%s4228_s1 + $0x58] sm:$0xff] }
   0x2   :  { %1986 = vmatpush.msk.msra.mxu0 %vm288_vm0, %v94_v0  ;;  %2051 = vmatpush.msk.msra.mxu1 %vm288_vm0, %v94_v0  ;;  %v91_v3 = vld [vmem:[%s4228_s1 + $0x50] sm:$0xff]  ;;  %v90_v4 = vld [vmem:[%s4228_s1 + $0x48] sm:$0xff]  ;;  %v89_v5 = vld [vmem:[%s4228_s1 + $0x40] sm:$0xff] }
   0x3   :  { %2052 = vmatpush.msk.msra.mxu2 %vm288_vm0, %v94_v0  ;;  %2053 = vmatpush.msk.msra.mxu3 %vm288_vm0, %v94_v0  ;;  %v88_v6 = vld [vmem:[%s4228_s1 + $0x38] sm:$0xff]  ;;  %v87_v7 = vld [vmem:[%s4228_s1 + $0x30] sm:$0xff]  ;;  %v86_v8 = vld [vmem:[%s4228_s1 + $0x28] sm:$0xff] }
   0x4   :  { %295 = vmatpush.msra.mxu0 %v93_v1  ;;  %2054 = vmatpush.msra.mxu1 %v93_v1  ;;  %v85_v9 = vld [vmem:[%s4228_s1 + $0x20] sm:$0xff]  ;;  %v84_v10 = vld [vmem:[%s4228_s1 + $0x18] sm:$0xff]  ;;  %v83_v11 = vld [vmem:[%s4228_s1 + $0x10] sm:$0xff] }
   0x5   :  { %2055 = vmatpush.msra.mxu2 %v93_v1  ;;  %2056 = vmatpush.msra.mxu3 %v93_v1  ;;  %v82_v12 = vld [vmem:[%s4228_s1 + $0x8] sm:$0xff]  ;;  %v81_v13 = vld [vmem:[%s4228_s1] sm:$0xff]  ;;  %v19_v22 = vld [vmem:[%s4231_s0 + $0x10] sm:$0xff] }
   0x6   :  { %296 = vmatpush.msra.mxu0 %v92_v2  ;;  %2057 = vmatpush.msra.mxu1 %v92_v2  ;;  %v17_v14 = vld [vmem:[%s4231_s0] sm:$0xff]  ;;  %v18_v18 = vld [vmem:[%s4231_s0 + $0x8] sm:$0xff]  ;;  %v35_v23 = vld [vmem:[%s4231_s0 + $0x90] sm:$0xff] }
   0x7   :  { %2058 = vmatpush.msra.mxu2 %v92_v2  ;;  %2059 = vmatpush.msra.mxu3 %v92_v2  ;;  %v33_v15 = vld [vmem:[%s4231_s0 + $0x80] sm:$0xff]  ;;  %v34_v19 = vld [vmem:[%s4231_s0 + $0x88] sm:$0xff]  ;;  %v51_v24 = vld [vmem:[%s4231_s0 + $0x110] sm:$0xff] }
   0x8   :  { %297 = vmatpush.msra.mxu0 %v91_v3  ;;  %2060 = vmatpush.msra.mxu1 %v91_v3  ;;  %v49_v16 = vld [vmem:[%s4231_s0 + $0x100] sm:$0xff]  ;;  %v50_v20 = vld [vmem:[%s4231_s0 + $0x108] sm:$0xff]  ;;  %v67_v25 = vld [vmem:[%s4231_s0 + $0x190] sm:$0xff] }
   0x9   :  { %2061 = vmatpush.msra.mxu2 %v91_v3  ;;  %2062 = vmatpush.msra.mxu3 %v91_v3  ;;  %v65_v17 = vld [vmem:[%s4231_s0 + $0x180] sm:$0xff]  ;;  %v66_v21 = vld [vmem:[%s4231_s0 + $0x188] sm:$0xff]  ;;  %v20_v26 = vld [vmem:[%s4231_s0 + $0x18] sm:$0xff] }
   0xa   :  { %298 = vmatpush.msra.mxu0 %v90_v4  ;;  %2063 = vmatpush.msra.mxu1 %v90_v4  ;;  %v36_v27 = vld [vmem:[%s4231_s0 + $0x98] sm:$0xff]  ;;  %v21_v30 = vld [vmem:[%s4231_s0 + $0x20] sm:$0xff]  ;;  %v22_v34 = vld [vmem:[%s4231_s0 + $0x28] sm:$0xff] }
   0xb   :  { %2064 = vmatpush.msra.mxu2 %v90_v4  ;;  %2065 = vmatpush.msra.mxu3 %v90_v4  ;;  %v52_v28 = vld [vmem:[%s4231_s0 + $0x118] sm:$0xff]  ;;  %v37_v31 = vld [vmem:[%s4231_s0 + $0xa0] sm:$0xff]  ;;  %v38_v35 = vld [vmem:[%s4231_s0 + $0xa8] sm:$0xff] }
   0xc   :  { %299 = vmatpush.msra.mxu0 %v89_v5  ;;  %2066 = vmatpush.msra.mxu1 %v89_v5  ;;  %v68_v29 = vld [vmem:[%s4231_s0 + $0x198] sm:$0xff]  ;;  %v53_v32 = vld [vmem:[%s4231_s0 + $0x120] sm:$0xff]  ;;  %v54_v36 = vld [vmem:[%s4231_s0 + $0x128] sm:$0xff] }
   0xd   :  { %2067 = vmatpush.msra.mxu2 %v89_v5  ;;  %2068 = vmatpush.msra.mxu3 %v89_v5  ;;  %v69_v33 = vld [vmem:[%s4231_s0 + $0x1a0] sm:$0xff]  ;;  %v70_v37 = vld [vmem:[%s4231_s0 + $0x1a8] sm:$0xff]  ;;  %v23_v38 = vld [vmem:[%s4231_s0 + $0x30] sm:$0xff] }
   0xe   :  { %300 = vmatpush.msra.mxu0 %v88_v6  ;;  %2069 = vmatpush.msra.mxu1 %v88_v6  ;;  %v39_v39 = vld [vmem:[%s4231_s0 + $0xb0] sm:$0xff]  ;;  %v24_v42 = vld [vmem:[%s4231_s0 + $0x38] sm:$0xff]  ;;  %v25_v46 = vld [vmem:[%s4231_s0 + $0x40] sm:$0xff] }
   0xf   :  { %2070 = vmatpush.msra.mxu2 %v88_v6  ;;  %2071 = vmatpush.msra.mxu3 %v88_v6  ;;  %v55_v40 = vld [vmem:[%s4231_s0 + $0x130] sm:$0xff]  ;;  %v40_v43 = vld [vmem:[%s4231_s0 + $0xb8] sm:$0xff]  ;;  %v41_v47 = vld [vmem:[%s4231_s0 + $0xc0] sm:$0xff] }
  0x10   :  { %301 = vmatpush.msra.mxu0 %v87_v7  ;;  %2072 = vmatpush.msra.mxu1 %v87_v7  ;;  %v71_v41 = vld [vmem:[%s4231_s0 + $0x1b0] sm:$0xff]  ;;  %v56_v44 = vld [vmem:[%s4231_s0 + $0x138] sm:$0xff]  ;;  %v57_v48 = vld [vmem:[%s4231_s0 + $0x140] sm:$0xff] }
  0x11   :  { %2073 = vmatpush.msra.mxu2 %v87_v7  ;;  %2074 = vmatpush.msra.mxu3 %v87_v7  ;;  %v72_v45 = vld [vmem:[%s4231_s0 + $0x1b8] sm:$0xff]  ;;  %v73_v49 = vld [vmem:[%s4231_s0 + $0x1c0] sm:$0xff]  ;;  %v26_v50 = vld [vmem:[%s4231_s0 + $0x48] sm:$0xff] }
  0x12   :  { %302 = vmatpush.msra.mxu0 %v86_v8  ;;  %2075 = vmatpush.msra.mxu1 %v86_v8  ;;  %v42_v51 = vld [vmem:[%s4231_s0 + $0xc8] sm:$0xff]  ;;  %v27_v54 = vld [vmem:[%s4231_s0 + $0x50] sm:$0xff]  ;;  %v28_v58 = vld [vmem:[%s4231_s0 + $0x58] sm:$0xff] }
  0x13   :  { %2076 = vmatpush.msra.mxu2 %v86_v8  ;;  %2077 = vmatpush.msra.mxu3 %v86_v8  ;;  %v58_v52 = vld [vmem:[%s4231_s0 + $0x148] sm:$0xff]  ;;  %v43_v55 = vld [vmem:[%s4231_s0 + $0xd0] sm:$0xff]  ;;  %v44_v59 = vld [vmem:[%s4231_s0 + $0xd8] sm:$0xff] }
  0x14   :  { %303 = vmatpush.msra.mxu0 %v85_v9  ;;  %2078 = vmatpush.msra.mxu1 %v85_v9  ;;  %v74_v53 = vld [vmem:[%s4231_s0 + $0x1c8] sm:$0xff]  ;;  %v59_v56 = vld [vmem:[%s4231_s0 + $0x150] sm:$0xff]  ;;  %v60_v60 = vld [vmem:[%s4231_s0 + $0x158] sm:$0xff] }
  0x15   :  { %2079 = vmatpush.msra.mxu2 %v85_v9  ;;  %2080 = vmatpush.msra.mxu3 %v85_v9  ;;  %v75_v57 = vld [vmem:[%s4231_s0 + $0x1d0] sm:$0xff]  ;;  %v76_v61 = vld [vmem:[%s4231_s0 + $0x1d8] sm:$0xff]  ;;  %v29_v62 = vld [vmem:[%s4231_s0 + $0x60] sm:$0xff] }
  0x16   :  { %304 = vmatpush.msra.mxu0 %v84_v10  ;;  %2081 = vmatpush.msra.mxu1 %v84_v10  ;;  %v45_v63 = vld [vmem:[%s4231_s0 + $0xe0] sm:$0xff]  ;;  %v30_v2 = vld [vmem:[%s4231_s0 + $0x68] sm:$0xff]  ;;  %v31_v6 = vld [vmem:[%s4231_s0 + $0x70] sm:$0xff] }
  0x17   :  { %2082 = vmatpush.msra.mxu2 %v84_v10  ;;  %2083 = vmatpush.msra.mxu3 %v84_v10  ;;  %v61_v0 = vld [vmem:[%s4231_s0 + $0x160] sm:$0xff]  ;;  %v46_v3 = vld [vmem:[%s4231_s0 + $0xe8] sm:$0xff]  ;;  %v47_v7 = vld [vmem:[%s4231_s0 + $0xf0] sm:$0xff] }
  0x18   :  { %305 = vmatpush.msra.mxu0 %v83_v11  ;;  %2084 = vmatpush.msra.mxu1 %v83_v11  ;;  %v77_v1 = vld [vmem:[%s4231_s0 + $0x1e0] sm:$0xff]  ;;  %v62_v4 = vld [vmem:[%s4231_s0 + $0x168] sm:$0xff]  ;;  %v63_v8 = vld [vmem:[%s4231_s0 + $0x170] sm:$0xff] }
  0x19   :  { %2085 = vmatpush.msra.mxu2 %v83_v11  ;;  %2086 = vmatpush.msra.mxu3 %v83_v11  ;;  %v78_v5 = vld [vmem:[%s4231_s0 + $0x1e8] sm:$0xff]  ;;  %v79_v9 = vld [vmem:[%s4231_s0 + $0x1f0] sm:$0xff]  ;;  %v32_v10 = vld [vmem:[%s4231_s0 + $0x78] sm:$0xff] }
  0x1a   :  { %306 = vmatpush.msra.mxu0 %v82_v12  ;;  %2087 = vmatpush.msra.mxu1 %v82_v12  ;;  %v48_v11 = vld [vmem:[%s4231_s0 + $0xf8] sm:$0xff] }
  0x1b   :  { %2088 = vmatpush.msra.mxu2 %v82_v12  ;;  %2089 = vmatpush.msra.mxu3 %v82_v12  ;;  %v64_v12 = vld [vmem:[%s4231_s0 + $0x178] sm:$0xff] }
  0x1c   :  { %307 = vmatpush.msra.mxu0 %v81_v13  ;;  %2090 = vmatpush.msra.mxu1 %v81_v13 }
  0x1d   :  { %2091 = vmatpush.msra.mxu2 %v81_v13  ;;  %2092 = vmatpush.msra.mxu3 %v81_v13  ;;  %v80_v13 = vld [vmem:[%s4231_s0 + $0x1f8] sm:$0xff] }
  0x1e   :  { %1987 = vmatmul.msk.f32.vlgmr.msra.gmra.mxu0 %vm95_vm1, %v17_v14  ;;  %2003 = vmatmul.msk.f32.vlgmr.msra.gmra.mxu1 %vm95_vm1, %v33_v15  ;;  %v2681_v14 = vld [vmem:[%s4229_s2] ss:$0 sm:$0xff] }
  0x1f   :  { %2019 = vmatmul.msk.f32.vlgmr.msra.gmra.mxu2 %vm95_vm1, %v49_v16  ;;  %2035 = vmatmul.msk.f32.vlgmr.msra.gmra.mxu3 %vm95_vm1, %v65_v17  ;;  %v2686_v15 = vld [vmem:[%s4230_s3] ss:$0 sm:$0xff] }
  0x26   :  { %1988 = vmatmul.msk.f32.gmra.mxu0 %vm95_vm1, %v18_v18  ;;  %2004 = vmatmul.msk.f32.gmra.mxu1 %vm95_vm1, %v34_v19 }
  0x27   :  { %2020 = vmatmul.msk.f32.gmra.mxu2 %vm95_vm1, %v50_v20  ;;  %2036 = vmatmul.msk.f32.gmra.mxu3 %vm95_vm1, %v66_v21 }
  0x2e   :  { %1989 = vmatmul.msk.f32.gmra.mxu0 %vm95_vm1, %v19_v22  ;;  %2005 = vmatmul.msk.f32.gmra.mxu1 %vm95_vm1, %v35_v23 }
  0x2f   :  { %2021 = vmatmul.msk.f32.gmra.mxu2 %vm95_vm1, %v51_v24  ;;  %2037 = vmatmul.msk.f32.gmra.mxu3 %vm95_vm1, %v67_v25 }
  0x36   :  { %1990 = vmatmul.msk.f32.gmra.mxu0 %vm95_vm1, %v20_v26  ;;  %2006 = vmatmul.msk.f32.gmra.mxu1 %vm95_vm1, %v36_v27 }
  0x37   :  { %2022 = vmatmul.msk.f32.gmra.mxu2 %vm95_vm1, %v52_v28  ;;  %2038 = vmatmul.msk.f32.gmra.mxu3 %vm95_vm1, %v68_v29 }
  0x3e   :  { %1991 = vmatmul.msk.f32.gmra.mxu0 %vm95_vm1, %v21_v30  ;;  %2007 = vmatmul.msk.f32.gmra.mxu1 %vm95_vm1, %v37_v31 }
  0x3f   :  { %2023 = vmatmul.msk.f32.gmra.mxu2 %vm95_vm1, %v53_v32  ;;  %2039 = vmatmul.msk.f32.gmra.mxu3 %vm95_vm1, %v69_v33 }
  0x46   :  { %1992 = vmatmul.msk.f32.gmra.mxu0 %vm95_vm1, %v22_v34  ;;  %2008 = vmatmul.msk.f32.gmra.mxu1 %vm95_vm1, %v38_v35 }
  0x47   :  { %2024 = vmatmul.msk.f32.gmra.mxu2 %vm95_vm1, %v54_v36  ;;  %2040 = vmatmul.msk.f32.gmra.mxu3 %vm95_vm1, %v70_v37 }
  0x4e   :  { %1993 = vmatmul.msk.f32.gmra.mxu0 %vm95_vm1, %v23_v38  ;;  %2009 = vmatmul.msk.f32.gmra.mxu1 %vm95_vm1, %v39_v39 }
  0x4f   :  { %2025 = vmatmul.msk.f32.gmra.mxu2 %vm95_vm1, %v55_v40  ;;  %2041 = vmatmul.msk.f32.gmra.mxu3 %vm95_vm1, %v71_v41 }
  0x56   :  { %1994 = vmatmul.msk.f32.gmra.mxu0 %vm95_vm1, %v24_v42  ;;  %2010 = vmatmul.msk.f32.gmra.mxu1 %vm95_vm1, %v40_v43 }
  0x57   :  { %2026 = vmatmul.msk.f32.gmra.mxu2 %vm95_vm1, %v56_v44  ;;  %2042 = vmatmul.msk.f32.gmra.mxu3 %vm95_vm1, %v72_v45 }
  0x5e   :  { %1995 = vmatmul.msk.f32.gmra.mxu0 %vm95_vm1, %v25_v46  ;;  %2011 = vmatmul.msk.f32.gmra.mxu1 %vm95_vm1, %v41_v47 }
  0x5f   :  { %2027 = vmatmul.msk.f32.gmra.mxu2 %vm95_vm1, %v57_v48  ;;  %2043 = vmatmul.msk.f32.gmra.mxu3 %vm95_vm1, %v73_v49 }
  0x66   :  { %1996 = vmatmul.msk.f32.gmra.mxu0 %vm95_vm1, %v26_v50  ;;  %2012 = vmatmul.msk.f32.gmra.mxu1 %vm95_vm1, %v42_v51 }
  0x67   :  { %2028 = vmatmul.msk.f32.gmra.mxu2 %vm95_vm1, %v58_v52  ;;  %2044 = vmatmul.msk.f32.gmra.mxu3 %vm95_vm1, %v74_v53 }
  0x6e   :  { %1997 = vmatmul.msk.f32.gmra.mxu0 %vm95_vm1, %v27_v54  ;;  %2013 = vmatmul.msk.f32.gmra.mxu1 %vm95_vm1, %v43_v55 }
  0x6f   :  { %2029 = vmatmul.msk.f32.gmra.mxu2 %vm95_vm1, %v59_v56  ;;  %2045 = vmatmul.msk.f32.gmra.mxu3 %vm95_vm1, %v75_v57 }
  0x76   :  { %1998 = vmatmul.msk.f32.gmra.mxu0 %vm95_vm1, %v28_v58  ;;  %2014 = vmatmul.msk.f32.gmra.mxu1 %vm95_vm1, %v44_v59 }
  0x77   :  { %2030 = vmatmul.msk.f32.gmra.mxu2 %vm95_vm1, %v60_v60  ;;  %2046 = vmatmul.msk.f32.gmra.mxu3 %vm95_vm1, %v76_v61 }
  0x7e   :  { %1999 = vmatmul.msk.f32.gmra.mxu0 %vm95_vm1, %v29_v62  ;;  %2015 = vmatmul.msk.f32.gmra.mxu1 %vm95_vm1, %v45_v63 }
  0x7f   :  { %2031 = vmatmul.msk.f32.gmra.mxu2 %vm95_vm1, %v61_v0  ;;  %2047 = vmatmul.msk.f32.gmra.mxu3 %vm95_vm1, %v77_v1 }
  0x86   :  { %2000 = vmatmul.msk.f32.gmra.mxu0 %vm95_vm1, %v30_v2  ;;  %2016 = vmatmul.msk.f32.gmra.mxu1 %vm95_vm1, %v46_v3 }
  0x87   :  { %2032 = vmatmul.msk.f32.gmra.mxu2 %vm95_vm1, %v62_v4  ;;  %2048 = vmatmul.msk.f32.gmra.mxu3 %vm95_vm1, %v78_v5 }
  0x8e   :  { %2001 = vmatmul.msk.f32.gmra.mxu0 %vm95_vm1, %v31_v6  ;;  %2017 = vmatmul.msk.f32.gmra.mxu1 %vm95_vm1, %v47_v7 }
  0x8f   :  { %2033 = vmatmul.msk.f32.gmra.mxu2 %vm95_vm1, %v63_v8  ;;  %2049 = vmatmul.msk.f32.gmra.mxu3 %vm95_vm1, %v79_v9 }
  0x96   :  { %2002 = vmatmul.msk.f32.gmra.mxu0 %vm95_vm1, %v32_v10  ;;  %2018 = vmatmul.msk.f32.gmra.mxu1 %vm95_vm1, %v48_v11 }
  0x97   :  { %2034 = vmatmul.msk.f32.gmra.mxu2 %vm95_vm1, %v64_v12  ;;  %2050 = vmatmul.msk.f32.gmra.mxu3 %vm95_vm1, %v80_v13 }
  0x9b   :  { %v309_v16 = vpop.f32.mrf.mxu0  ;;  %v357_v17 = vpop.f32.mrf.mxu1 }
  0x9c   :  { %v505_v18 = vmul.f32 %v2681_v14, %v309_v16  ;;  %v521_v19 = vmul.f32 %v2681_v14, %v357_v17 }
  0x9e   :  { %v2691_v20 = vadd.f32 %v2686_v15, %v505_v18  ;;  %v2694_v21 = vadd.f32 %v2686_v15, %v521_v19 }
  0xa0   :  { %v637_v22 = vsub.f32 0.0, %v2691_v20  ;;  %v653_v23 = vsub.f32 0.0, %v2694_v21 }
  0xa2   :  { %v701_v24 = vmul.f32 1.442695, %v637_v22  ;;  %v733_v25 = vmul.f32 1.442695, %v653_v23  ;;  %v405_v26 = vpop.f32.mrf.mxu2  ;;  %v453_v27 = vpop.f32.mrf.mxu3 }
  0xa3   :  { %v537_v28 = vmul.f32 %v2681_v14, %v405_v26  ;;  %v553_v29 = vmul.f32 %v2681_v14, %v453_v27  ;;  %v312_v30 = vpop.f32.mrf.mxu0  ;;  %v360_v31 = vpop.f32.mrf.mxu1 }
  0xa4   :  { %2095 = vpow2.f32 %v701_v24  ;;  %v506_v32 = vmul.f32 %v2681_v14, %v312_v30  ;;  %v522_v33 = vmul.f32 %v2681_v14, %v360_v31 }
  0xa5   :  { %2097 = vpow2.f32 %v733_v25  ;;  %v2703_v34 = vadd.f32 %v2686_v15, %v537_v28  ;;  %v2706_v35 = vadd.f32 %v2686_v15, %v553_v29 }
  0xa6   :  { %v2709_v36 = vadd.f32 %v2686_v15, %v506_v32  ;;  %v2712_v37 = vadd.f32 %v2686_v15, %v522_v33 }
  0xa7   :  { %v669_v38 = vsub.f32 0.0, %v2703_v34  ;;  %v685_v39 = vsub.f32 0.0, %v2706_v35 }
  0xa8   :  { %v638_v40 = vsub.f32 0.0, %v2709_v36  ;;  %v654_v41 = vsub.f32 0.0, %v2712_v37 }
  0xa9   :  { %v765_v42 = vmul.f32 1.442695, %v669_v38  ;;  %v797_v43 = vmul.f32 1.442695, %v685_v39 }
  0xaa   :  { %v2096_v44 = vpop.eup %2095  ;;  %v408_v45 = vpop.f32.mrf.mxu2  ;;  %v703_v48 = vmul.f32 1.442695, %v638_v40  ;;  %v735_v52 = vmul.f32 1.442695, %v654_v41 }
  0xab   :  { %v2098_v46 = vpop.eup %2097  ;;  %v2718_v47 = vadd.f32 1.0, %v2096_v44  ;;  %2099 = vpow2.f32 %v765_v42  ;;  %v538_v49 = vmul.f32 %v2681_v14, %v408_v45  ;;  %v456_v50 = vpop.f32.mrf.mxu3 }
  0xac   :  { %v2721_v51 = vadd.f32 1.0, %v2098_v46  ;;  %2101 = vpow2.f32 %v797_v43  ;;  %v315_v53 = vpop.f32.mrf.mxu0  ;;  %v554_v54 = vmul.f32 %v2681_v14, %v456_v50  ;;  %v363_v55 = vpop.f32.mrf.mxu1 }
  0xad   :  { %2103 = vrcp.f32 %v2718_v47  ;;  %v2727_v56 = vadd.f32 %v2686_v15, %v538_v49  ;;  %v507_v57 = vmul.f32 %v2681_v14, %v315_v53  ;;  %v902_v58 = vand.u32 2147483647, %v2718_v47 }
  0xae   :  { %2105 = vrcp.f32 %v2721_v51  ;;  %v904_v59 = vand.u32 2147483648, %v2718_v47  ;;  %v1142_v61 = vand.u32 2147483647, %v2721_v51  ;;  %v523_v63 = vmul.f32 %v2681_v14, %v363_v55 }
  0xaf   :  { %2107 = vpow2.f32 %v703_v48  ;;  %v670_v62 = vsub.f32 0.0, %v2727_v56  ;;  %v1144_v1 = vand.u32 2147483648, %v2721_v51  ;;  %v2739_v3 = vadd.f32 %v2686_v15, %v554_v54 }
  0xb0   :  { %2109 = vpow2.f32 %v735_v52  ;;  %vm898_vm2 = vweird.f32 %v2718_v47  ;;  %vm1138_vm3 = vweird.f32 %v2721_v51  ;;  %v2746_v6 = vadd.f32 %v2686_v15, %v507_v57 }
  0xb1   :  { %v2100_v60 = vpop.eup %2099  ;;  %vm2749_vm4 = vcmp.eq.f32.partialorder %v902_v58, 8.507059e+37  ;;  %v905_v10 = vor.u32 1.1754944e-38, %v904_v59  ;;  %vm2755_vm6 = vcmp.eq.f32.partialorder %v1142_v61, 8.507059e+37  ;;  %v767_v16 = vmul.f32 1.442695, %v670_v62 }
  0xb2   :  { %v2102_v0 = vpop.eup %2101  ;;  %v2736_v2 = vadd.f32 1.0, %v2100_v60  ;;  %v2760_v17 = vadd.f32 %v2686_v15, %v523_v63  ;;  %v1145_v22 = vor.u32 1.1754944e-38, %v1144_v1  ;;  %v686_v23 = vsub.f32 0.0, %v2739_v3 }
  0xb3   :  { %v2104_v4 = vpop.eup %2103  ;;  %v2743_v5 = vadd.f32 1.0, %v2102_v0  ;;  %v639_v27 = vsub.f32 0.0, %v2746_v6 }
  0xb4   :  { %v2106_v7 = vpop.eup %2105  ;;  %v894_v8 = vmul.f32 %v2104_v4, %v2718_v47  ;;  %2111 = vrcp.f32 %v2736_v2  ;;  %v1382_v25 = vand.u32 2147483647, %v2736_v2  ;;  %v1384_v26 = vand.u32 2147483648, %v2736_v2 }
  0xb5   :  { %v2108_v11 = vpop.eup %2107  ;;  %v1134_v12 = vmul.f32 %v2106_v7, %v2721_v51  ;;  %2113 = vrcp.f32 %v2743_v5  ;;  %vm899_vm7 = vweird.f32 %v2104_v4  ;;  %vm1139_vm8 = vweird.f32 %v2106_v7 }
  0xb6   :  { %v2110_v18 = vpop.eup %2109  ;;  %v895_v19 = vsub.f32 1.0, %v894_v8  ;;  %v2767_v29 = vadd.f32 1.0, %v2108_v11  ;;  %2115 = vpow2.f32 %v767_v16  ;;  %v655_v32 = vsub.f32 0.0, %v2760_v17  ;;  %vm900_vm10 = vmor %vm898_vm2, %vm899_vm7 }
  0xb7   :  { %v1135_v24 = vsub.f32 1.0, %v1134_v12  ;;  %v2769_v30 = vadd.f32 1.0, %v2110_v18  ;;  %vm1378_vm9 = vweird.f32 %v2736_v2  ;;  %v1622_v39 = vand.u32 2147483647, %v2743_v5  ;;  %vm1140_vm13 = vmor %vm1138_vm3, %vm1139_vm8 }
  0xb8   :  { %v896_v28 = vmul.f32 %v2104_v4, %v895_v19  ;;  %2117 = vrcp.f32 %v2767_v29  ;;  %vm2778_vm11 = vcmp.eq.f32.partialorder %v1382_v25, 8.507059e+37  ;;  %v1385_v43 = vor.u32 1.1754944e-38, %v1384_v26 }
  0xb9   :  { %v1136_v31 = vmul.f32 %v2106_v7, %v1135_v24  ;;  %vm1618_vm12 = vweird.f32 %v2743_v5  ;;  %v1624_v46 = vand.u32 2147483648, %v2743_v5  ;;  %2119 = vrcp.f32 %v2769_v30  ;;  %v411_v24 = vpop.f32.mrf.mxu2 }
  0xba   :  { %v2112_v33 = vpop.eup %2111  ;;  %v897_v38 = vadd.f32 %v2104_v4, %v896_v28  ;;  %v799_v47 = vmul.f32 1.442695, %v686_v23  ;;  %vm2794_vm14 = vcmp.eq.f32.partialorder %v1622_v39, 8.507059e+37  ;;  %v917_v55 = vand.u32 2147483647, %v2767_v29 }
  0xbb   :  { %v1137_v40 = vadd.f32 %v2106_v7, %v1136_v31  ;;  %v1374_v41 = vmul.f32 %v2112_v33, %v2736_v2  ;;  %v2114_v44 = vpop.eup %2113  ;;  %vm1379_vm15 = vweird.f32 %v2112_v33  ;;  %vm913_vm0 = vweird.f32 %v2767_v29  ;;  %v459_v31 = vpop.f32.mrf.mxu3 }
  0xbc   :  { %v901_v45 = vsel %vm900_vm10, %v2104_v4, %v897_v38  ;;  %v1614_v52 = vmul.f32 %v2114_v44, %v2743_v5  ;;  %v2116_v57 = vpop.eup %2115  ;;  %2121 = vpow2.f32 %v799_v47  ;;  %vm1619_vm1 = vweird.f32 %v2114_v44  ;;  %vm1380_vm2 = vmor %vm1378_vm9, %vm1379_vm15 }
  0xbd   :  { %v906_v48 = vsel %vm2749_vm4, %v905_v10, %v901_v45  ;;  %v1141_v49 = vsel %vm1140_vm13, %v2106_v7, %v1137_v40  ;;  %v1375_v50 = vsub.f32 1.0, %v1374_v41  ;;  %v2805_v62 = vadd.f32 1.0, %v2116_v57  ;;  %vm1620_vm4 = vmor %vm1618_vm12, %vm1619_vm1  ;;  %v366_v57 = vpop.f32.mrf.mxu1 }
  0xbe   :  { %v1853_v53 = vmul.f32 %v906_v48, %v2691_v20  ;;  %v1146_v54 = vsel %vm2755_vm6, %v1145_v22, %v1141_v49  ;;  %v1615_v60 = vsub.f32 1.0, %v1614_v52  ;;  %v2118_v61 = vpop.eup %2117  ;;  %v1625_v20 = vor.u32 1.1754944e-38, %v1624_v46 }
  0xbf   :  { %v1869_v58 = vmul.f32 %v1146_v54, %v2694_v21  ;;  %v1376_v59 = vmul.f32 %v2112_v33, %v1375_v50  ;;  %v909_v0 = vmul.f32 %v2118_v61, %v2767_v29  ;;  %v2120_v1 = vpop.eup %2119  ;;  %vm2814_vm3 = vcmp.eq.f32.partialorder %v917_v55, 8.507059e+37 }
  0xc0   :  { %1918 = vst.msk [vmem:[%s4232_s4] sm:$0xff] %vm1917_vm5, %v1853_v53  ;;  %v1616_v63 = vmul.f32 %v2114_v44, %v1615_v60  ;;  %v919_v7 = vand.u32 2147483648, %v2767_v29  ;;  %2123 = vrcp.f32 %v2805_v62  ;;  %v705_v8 = vmul.f32 1.442695, %v639_v27 }
  0xc1   :  { %1934 = vst.msk [vmem:[%s4232_s4 + $0x80] sm:$0xff] %vm1917_vm5, %v1869_v58  ;;  %v1377_v21 = vadd.f32 %v2112_v33, %v1376_v59  ;;  %v910_v11 = vsub.f32 1.0, %v909_v0  ;;  %v1149_v12 = vmul.f32 %v2120_v1, %v2769_v30  ;;  %vm914_vm6 = vweird.f32 %v2118_v61 }
  0xc2   :  { %v1617_v10 = vadd.f32 %v2114_v44, %v1616_v63  ;;  %v1157_v2 = vand.u32 2147483647, %v2769_v30  ;;  %v1159_v16 = vand.u32 2147483648, %v2769_v30  ;;  %v2122_v25 = vpop.eup %2121  ;;  %vm1153_vm7 = vweird.f32 %v2769_v30  ;;  %vm915_vm9 = vmor %vm913_vm0, %vm914_vm6 }
  0xc3   :  { %v1381_v9 = vsel %vm1380_vm2, %v2112_v33, %v1377_v21  ;;  %v911_v22 = vmul.f32 %v2118_v61, %v910_v11  ;;  %v1150_v23 = vsub.f32 1.0, %v1149_v12  ;;  %vm1154_vm8 = vweird.f32 %v2120_v1  ;;  %v318_v33 = vpop.f32.mrf.mxu0 }
  0xc4   :  { %v1386_v13 = vsel %vm2778_vm11, %v1385_v43, %v1381_v9  ;;  %v1621_v19 = vsel %vm1620_vm4, %v2114_v44, %v1617_v10  ;;  %2125 = vpow2.f32 %v705_v8  ;;  %v2836_v28 = vadd.f32 1.0, %v2122_v25  ;;  %vm1155_vm11 = vmor %vm1153_vm7, %vm1154_vm8  ;;  %v414_v9 = vpop.f32.mrf.mxu2 }
  0xc5   :  { %v1885_v18 = vmul.f32 %v1386_v13, %v2703_v34  ;;  %v1626_v26 = vsel %vm2794_vm14, %v1625_v20, %v1621_v19  ;;  %v912_v34 = vadd.f32 %v2118_v61, %v911_v22  ;;  %v1151_v27 = vmul.f32 %v2120_v1, %v1150_v23  ;;  %v462_v19 = vpop.f32.mrf.mxu3 }
  0xc6   :  { %v1901_v5 = vmul.f32 %v1626_v26, %v2706_v35  ;;  %v2124_v38 = vpop.eup %2123  ;;  %v920_v39 = vor.u32 1.1754944e-38, %v919_v7  ;;  %vm2841_vm10 = vcmp.eq.f32.partialorder %v1157_v2, 8.507059e+37  ;;  %v737_v41 = vmul.f32 1.442695, %v655_v32 }
  0xc7   :  { %1950 = vst.msk [vmem:[%s4232_s4 + $0x100] sm:$0xff] %vm1917_vm5, %v1885_v18  ;;  %v539_v35 = vmul.f32 %v2681_v14, %v411_v24  ;;  %v916_v42 = vsel %vm915_vm9, %v2118_v61, %v912_v34  ;;  %v1152_v43 = vadd.f32 %v2120_v1, %v1151_v27  ;;  %v1160_v44 = vor.u32 1.1754944e-38, %v1159_v16 }
  0xc8   :  { %1966 = vst.msk [vmem:[%s4232_s4 + $0x180] sm:$0xff] %vm1917_vm5, %v1901_v5  ;;  %v1389_v29 = vmul.f32 %v2124_v38, %v2805_v62  ;;  %v921_v45 = vsel %vm2814_vm3, %v920_v39, %v916_v42  ;;  %2127 = vrcp.f32 %v2836_v28  ;;  %v555_v32 = vmul.f32 %v2681_v14, %v459_v31 }
  0xc9   :  { %v508_v46 = vmul.f32 %v2681_v14, %v318_v33  ;;  %v1854_v47 = vmul.f32 %v921_v45, %v2709_v36  ;;  %v1156_v48 = vsel %vm1155_vm11, %v2120_v1, %v1152_v43  ;;  %v1399_v50 = vand.u32 2147483648, %v2805_v62 }
  0xca   :  { %v1390_v49 = vsub.f32 1.0, %v1389_v29  ;;  %v2126_v52 = vpop.eup %2125  ;;  %v1161_v53 = vsel %vm2841_vm10, %v1160_v44, %v1156_v48  ;;  %v1397_v54 = vand.u32 2147483647, %v2805_v62  ;;  %2129 = vpow2.f32 %v737_v41 }
  0xcb   :  { %v2867_v30 = vadd.f32 %v2686_v15, %v539_v35  ;;  %1919 = vst.msk [vmem:[%s4232_s4 + $0x8] sm:$0xff] %vm1917_vm5, %v1854_v47  ;;  %v1870_v36 = vmul.f32 %v1161_v53, %v2712_v37  ;;  %vm1394_vm12 = vweird.f32 %v2124_v38  ;;  %v2874_v55 = vadd.f32 1.0, %v2126_v52 }
  0xcc   :  { %v1391_v51 = vmul.f32 %v2124_v38, %v1390_v49  ;;  %v2878_v59 = vadd.f32 %v2686_v15, %v555_v32  ;;  %v2881_v60 = vadd.f32 %v2686_v15, %v508_v46  ;;  %vm1393_vm13 = vweird.f32 %v2805_v62  ;;  %v321_v46 = vpop.f32.mrf.mxu0 }
  0xcd   :  { %v671_v58 = vsub.f32 0.0, %v2867_v30  ;;  %1935 = vst.msk [vmem:[%s4232_s4 + $0x88] sm:$0xff] %vm1917_vm5, %v1870_v36  ;;  %v1400_v37 = vor.u32 1.1754944e-38, %v1399_v50  ;;  %2131 = vrcp.f32 %v2874_v55  ;;  %vm1395_vm14 = vmor %vm1393_vm13, %vm1394_vm12  ;;  %v524_v1 = vmul.f32 %v2681_v14, %v366_v57 }
  0xce   :  { %v1392_v61 = vadd.f32 %v2124_v38, %v1391_v51  ;;  %v2128_v20 = vpop.eup %2127  ;;  %v687_v63 = vsub.f32 0.0, %v2878_v59  ;;  %v640_v0 = vsub.f32 0.0, %v2881_v60  ;;  %vm1398_vm15 = vcmp.eq.f32.partialorder %v1397_v54, 8.507059e+37 }
  0xcf   :  { %v769_v21 = vmul.f32 1.442695, %v671_v58  ;;  %v1629_v7 = vmul.f32 %v2128_v20, %v2836_v28  ;;  %v1637_v8 = vand.u32 2147483647, %v2836_v28  ;;  %v1639_v11 = vand.u32 2147483648, %v2836_v28 }
  0xd0   :  { %v1396_v4 = vsel %vm1395_vm14, %v2124_v38, %v1392_v61  ;;  %v2130_v62 = vpop.eup %2129  ;;  %v801_v12 = vmul.f32 1.442695, %v687_v63  ;;  %v707_v18 = vmul.f32 1.442695, %v640_v0  ;;  %v932_v22 = vand.u32 2147483647, %v2874_v55 }
  0xd1   :  { %v1401_v10 = vsel %vm1398_vm15, %v1400_v37, %v1396_v4  ;;  %2133 = vpow2.f32 %v769_v21  ;;  %v1630_v2 = vsub.f32 1.0, %v1629_v7  ;;  %v2896_v16 = vadd.f32 1.0, %v2130_v62 }
  0xd2   :  { %v1886_v13 = vmul.f32 %v1401_v10, %v2727_v56  ;;  %2135 = vpow2.f32 %v801_v12  ;;  %v2900_v23 = vadd.f32 %v2686_v15, %v524_v1  ;;  %v540_v24 = vmul.f32 %v2681_v14, %v414_v9 }
  0xd3   :  { %v2132_v25 = vpop.eup %2131  ;;  %v1631_v56 = vmul.f32 %v2128_v20, %v1630_v2  ;;  %vm1634_vm0 = vweird.f32 %v2128_v20  ;;  %v934_v26 = vand.u32 2147483648, %v2874_v55  ;;  %2137 = vrcp.f32 %v2896_v16 }
  0xd4   :  { %1951 = vst.msk [vmem:[%s4232_s4 + $0x108] sm:$0xff] %vm1917_vm5, %v1886_v13  ;;  %vm1633_vm1 = vweird.f32 %v2836_v28  ;;  %v924_v5 = vmul.f32 %v2132_v25, %v2874_v55  ;;  %2139 = vpow2.f32 %v707_v18  ;;  %v556_v34 = vmul.f32 %v2681_v14, %v462_v19  ;;  %v369_v19 = vpop.f32.mrf.mxu1  ;;  %v417_v28 = vpop.f32.mrf.mxu2 }
  0xd5   :  { %v1632_v27 = vadd.f32 %v2128_v20, %v1631_v56  ;;  %vm1638_vm2 = vcmp.eq.f32.partialorder %v1637_v8, 8.507059e+37  ;;  %v656_v31 = vsub.f32 0.0, %v2900_v23  ;;  %v2914_v33 = vadd.f32 %v2686_v15, %v540_v24  ;;  %vm1635_vm3 = vmor %vm1633_vm1, %vm1634_vm0 }
  0xd6   :  { %v1640_v39 = vor.u32 1.1754944e-38, %v1639_v11  ;;  %v925_v40 = vsub.f32 1.0, %v924_v5  ;;  %vm928_vm4 = vweird.f32 %v2874_v55  ;;  %vm2917_vm6 = vcmp.eq.f32.partialorder %v932_v22, 8.507059e+37 }
  0xd7   :  { %v2134_v38 = vpop.eup %2133  ;;  %v1636_v41 = vsel %vm1635_vm3, %v2128_v20, %v1632_v27  ;;  %v935_v35 = vor.u32 1.1754944e-38, %v934_v26  ;;  %v739_v43 = vmul.f32 1.442695, %v656_v31  ;;  %vm929_vm7 = vweird.f32 %v2132_v25 }
  0xd8   :  { %v2921_v42 = vadd.f32 1.0, %v2134_v38  ;;  %v2136_v44 = vpop.eup %2135  ;;  %v1641_v29 = vsel %vm1638_vm2, %v1640_v39, %v1636_v41  ;;  %v926_v45 = vmul.f32 %v2132_v25, %v925_v40  ;;  %v2924_v32 = vadd.f32 %v2686_v15, %v556_v34  ;;  %vm930_vm9 = vmor %vm928_vm4, %vm929_vm7 }
  0xd9   :  { %v2138_v47 = vpop.eup %2137  ;;  %v1902_v48 = vmul.f32 %v1641_v29, %v2739_v3  ;;  %vm1168_vm8 = vweird.f32 %v2896_v16  ;;  %v672_v49 = vsub.f32 0.0, %v2914_v33  ;;  %v1172_v54 = vand.u32 2147483647, %v2896_v16 }
  0xda   :  { %2141 = vrcp.f32 %v2921_v42  ;;  %v2140_v50 = vpop.eup %2139  ;;  %v927_v52 = vadd.f32 %v2132_v25, %v926_v45  ;;  %v1164_v53 = vmul.f32 %v2138_v47, %v2896_v16  ;;  %v1174_v36 = vand.u32 2147483648, %v2896_v16 }
  0xdb   :  { %1967 = vst.msk [vmem:[%s4232_s4 + $0x188] sm:$0xff] %vm1917_vm5, %v1902_v48  ;;  %v2939_v3 = vadd.f32 1.0, %v2136_v44  ;;  %v2941_v51 = vadd.f32 1.0, %v2140_v50  ;;  %2143 = vpow2.f32 %v739_v43  ;;  %v509_v57 = vmul.f32 %v2681_v14, %v321_v46 }
  0xdc   :  { %v931_v58 = vsel %vm930_vm9, %v2132_v25, %v927_v52  ;;  %v1165_v61 = vsub.f32 1.0, %v1164_v53  ;;  %v1412_v37 = vand.u32 2147483647, %v2921_v42  ;;  %v688_v20 = vsub.f32 0.0, %v2924_v32 }
  0xdd   :  { %v936_v21 = vsel %vm2917_vm6, %v935_v35, %v931_v58  ;;  %v1414_v63 = vand.u32 2147483648, %v2921_v42  ;;  %2145 = vrcp.f32 %v2939_v3  ;;  %v771_v55 = vmul.f32 1.442695, %v672_v49 }
  0xde   :  { %v1855_v0 = vmul.f32 %v936_v21, %v2746_v6  ;;  %v1166_v1 = vmul.f32 %v2138_v47, %v1165_v61  ;;  %vm1169_vm10 = vweird.f32 %v2138_v47  ;;  %2147 = vrcp.f32 %v2941_v51 }
  0xdf   :  { %vm2952_vm11 = vcmp.eq.f32.partialorder %v1172_v54, 8.507059e+37  ;;  %v1175_v8 = vor.u32 1.1754944e-38, %v1174_v36  ;;  %vm1408_vm12 = vweird.f32 %v2921_v42  ;;  %v2958_v9 = vadd.f32 %v2686_v15, %v509_v57  ;;  %vm1170_vm14 = vmor %vm1168_vm8, %vm1169_vm10 }
  0xe0   :  { %v2142_v4 = vpop.eup %2141  ;;  %1920 = vst.msk [vmem:[%s4232_s4 + $0x10] sm:$0xff] %vm1917_vm5, %v1855_v0  ;;  %v1167_v6 = vadd.f32 %v2138_v47, %v1166_v1  ;;  %vm2965_vm13 = vcmp.eq.f32.partialorder %v1412_v37, 8.507059e+37  ;;  %v1652_v11 = vand.u32 2147483647, %v2939_v3  ;;  %v1415_v13 = vor.u32 1.1754944e-38, %v1414_v63 }
  0xe1   :  { %v1404_v62 = vmul.f32 %v2142_v4, %v2921_v42  ;;  %v2144_v12 = vpop.eup %2143  ;;  %v1654_v2 = vand.u32 2147483648, %v2939_v3  ;;  %2149 = vpow2.f32 %v771_v55  ;;  %v803_v18 = vmul.f32 1.442695, %v688_v20 }
  0xe2   :  { %v1171_v22 = vsel %vm1170_vm14, %v2138_v47, %v1167_v6  ;;  %vm1648_vm15 = vweird.f32 %v2939_v3  ;;  %v947_v25 = vand.u32 2147483647, %v2941_v51  ;;  %v2975_v56 = vadd.f32 1.0, %v2144_v12 }
  0xe3   :  { %v1405_v24 = vsub.f32 1.0, %v1404_v62  ;;  %v2146_v26 = vpop.eup %2145  ;;  %v1176_v5 = vsel %vm2952_vm11, %v1175_v8, %v1171_v22  ;;  %vm1409_vm0 = vweird.f32 %v2142_v4  ;;  %2151 = vpow2.f32 %v803_v18 }
  0xe4   :  { %v641_v16 = vsub.f32 0.0, %v2958_v9  ;;  %v2148_v34 = vpop.eup %2147  ;;  %v1871_v27 = vmul.f32 %v1176_v5, %v2760_v17  ;;  %v1644_v38 = vmul.f32 %v2146_v26, %v2939_v3  ;;  %vm2982_vm1 = vcmp.eq.f32.partialorder %v1652_v11, 8.507059e+37  ;;  %vm1410_vm4 = vmor %vm1408_vm12, %vm1409_vm0 }
  0xe5   :  { %v1406_v31 = vmul.f32 %v2142_v4, %v1405_v24  ;;  %v525_v40 = vmul.f32 %v2681_v14, %v369_v19  ;;  %v939_v41 = vmul.f32 %v2148_v34, %v2941_v51  ;;  %vm943_vm2 = vweird.f32 %v2941_v51  ;;  %v324_v24 = vpop.f32.mrf.mxu0 }
  0xe6   :  { %v949_v35 = vand.u32 2147483648, %v2941_v51  ;;  %2153 = vrcp.f32 %v2975_v56  ;;  %1936 = vst.msk [vmem:[%s4232_s4 + $0x90] sm:$0xff] %vm1917_vm5, %v1871_v27  ;;  %v1645_v43 = vsub.f32 1.0, %v1644_v38  ;;  %v1655_v44 = vor.u32 1.1754944e-38, %v1654_v2  ;;  %v465_v2 = vpop.f32.mrf.mxu3 }
  0xe7   :  { %v1407_v17 = vadd.f32 %v2142_v4, %v1406_v31  ;;  %vm2995_vm3 = vcmp.eq.f32.partialorder %v947_v25, 8.507059e+37  ;;  %v2150_v45 = vpop.eup %2149  ;;  %vm1649_vm6 = vweird.f32 %v2146_v26  ;;  %v940_v46 = vsub.f32 1.0, %v939_v41 }
  0xe8   :  { %v709_v47 = vmul.f32 1.442695, %v641_v16  ;;  %v541_v48 = vmul.f32 %v2681_v14, %v417_v28  ;;  %v1646_v50 = vmul.f32 %v2146_v26, %v1645_v43  ;;  %vm944_vm7 = vweird.f32 %v2148_v34  ;;  %vm1650_vm8 = vmor %vm1648_vm15, %vm1649_vm6 }
  0xe9   :  { %v1411_v49 = vsel %vm1410_vm4, %v2142_v4, %v1407_v17  ;;  %v3004_v52 = vadd.f32 %v2686_v15, %v525_v40  ;;  %v2152_v53 = vpop.eup %2151  ;;  %v941_v36 = vmul.f32 %v2148_v34, %v940_v46  ;;  %v3008_v57 = vadd.f32 1.0, %v2150_v45  ;;  %vm945_vm10 = vmor %vm943_vm2, %vm944_vm7 }
  0xea   :  { %v1416_v54 = vsel %vm2965_vm13, %v1415_v13, %v1411_v49  ;;  %2155 = vpow2.f32 %v709_v47  ;;  %v1647_v58 = vadd.f32 %v2146_v26, %v1646_v50  ;;  %v950_v61 = vor.u32 1.1754944e-38, %v949_v35 }
  0xeb   :  { %v1887_v42 = vmul.f32 %v1416_v54, %v2867_v30  ;;  %v3011_v37 = vadd.f32 1.0, %v2152_v53  ;;  %v942_v21 = vadd.f32 %v2148_v34, %v941_v36  ;;  %vm1183_vm9 = vweird.f32 %v2975_v56 }
  0xec   :  { %v2154_v20 = vpop.eup %2153  ;;  %v1187_v63 = vand.u32 2147483647, %v2975_v56  ;;  %2157 = vrcp.f32 %v3008_v57  ;;  %v1651_v30 = vsel %vm1650_vm8, %v2146_v26, %v1647_v58  ;;  %v1189_v55 = vand.u32 2147483648, %v2975_v56 }
  0xed   :  { %1952 = vst.msk [vmem:[%s4232_s4 + $0x110] sm:$0xff] %vm1917_vm5, %v1887_v42  ;;  %v1179_v3 = vmul.f32 %v2154_v20, %v2975_v56  ;;  %v657_v0 = vsub.f32 0.0, %v3004_v52  ;;  %v1656_v1 = vsel %vm2982_vm1, %v1655_v44, %v1651_v30  ;;  %v946_v4 = vsel %vm945_vm10, %v2148_v34, %v942_v21  ;;  %v372_v44 = vpop.f32.mrf.mxu1  ;;  %v420_v30 = vpop.f32.mrf.mxu2 }
  0xee   :  { %2159 = vrcp.f32 %v3011_v37  ;;  %v3033_v7 = vadd.f32 %v2686_v15, %v541_v48  ;;  %v1903_v8 = vmul.f32 %v1656_v1, %v2878_v59  ;;  %v951_v51 = vsel %vm2995_vm3, %v950_v61, %v946_v4  ;;  %v468_v4 = vpop.f32.mrf.mxu3 }
  0xef   :  { %v1180_v6 = vsub.f32 1.0, %v1179_v3  ;;  %v1427_v62 = vand.u32 2147483647, %v3008_v57  ;;  %v1856_v11 = vmul.f32 %v951_v51, %v2881_v60  ;;  %vm1184_vm11 = vweird.f32 %v2154_v20 }
  0xf0   :  { %v2156_v10 = vpop.eup %2155  ;;  %v1429_v12 = vand.u32 2147483648, %v3008_v57  ;;  %v1667_v13 = vand.u32 2147483647, %v3011_v37  ;;  %1968 = vst.msk [vmem:[%s4232_s4 + $0x190] sm:$0xff] %vm1917_vm5, %v1903_v8  ;;  %v1669_v18 = vand.u32 2147483648, %v3011_v37  ;;  %vm3053_vm12 = vcmp.eq.f32.partialorder %v1187_v63, 8.507059e+37  ;;  %vm1185_vm15 = vmor %vm1183_vm9, %vm1184_vm11 }
  0xf1   :  { %v1181_v59 = vmul.f32 %v2154_v20, %v1180_v6  ;;  %v3047_v19 = vadd.f32 1.0, %v2156_v10  ;;  %v741_v22 = vmul.f32 1.442695, %v657_v0  ;;  %1921 = vst.msk [vmem:[%s4232_s4 + $0x18] sm:$0xff] %vm1917_vm5, %v1856_v11  ;;  %v1190_v26 = vor.u32 1.1754944e-38, %v1189_v55 }
  0xf2   :  { %v2158_v25 = vpop.eup %2157  ;;  %vm1423_vm13 = vweird.f32 %v3008_v57  ;;  %v673_v5 = vsub.f32 0.0, %v3033_v7  ;;  %vm3060_vm14 = vcmp.eq.f32.partialorder %v1427_v62, 8.507059e+37  ;;  %v557_v31 = vmul.f32 %v2681_v14, %v465_v2 }
  0xf3   :  { %v1182_v16 = vadd.f32 %v2154_v20, %v1181_v59  ;;  %v1419_v34 = vmul.f32 %v2158_v25, %v3008_v57  ;;  %2161 = vrcp.f32 %v3047_v19  ;;  %v1430_v39 = vor.u32 1.1754944e-38, %v1429_v12 }
  0xf4   :  { %v2160_v38 = vpop.eup %2159  ;;  %vm1663_vm0 = vweird.f32 %v3011_v37  ;;  %2163 = vpow2.f32 %v741_v22  ;;  %v510_v40 = vmul.f32 %v2681_v14, %v324_v24  ;;  %vm3072_vm1 = vcmp.eq.f32.partialorder %v1667_v13, 8.507059e+37  ;;  %v327_v24 = vpop.f32.mrf.mxu0 }
  0xf5   :  { %v1186_v28 = vsel %vm1185_vm15, %v2154_v20, %v1182_v16  ;;  %v1420_v41 = vsub.f32 1.0, %v1419_v34  ;;  %v1659_v35 = vmul.f32 %v2160_v38, %v3011_v37  ;;  %v1670_v43 = vor.u32 1.1754944e-38, %v1669_v18 }
  0xf6   :  { %v1191_v56 = vsel %vm3053_vm12, %v1190_v26, %v1186_v28  ;;  %vm1424_vm2 = vweird.f32 %v2158_v25  ;;  %vm958_vm3 = vweird.f32 %v3047_v19  ;;  %v773_v29 = vmul.f32 1.442695, %v673_v5 }
  0xf7   :  { %v1872_v45 = vmul.f32 %v1191_v56, %v2900_v23  ;;  %v1421_v46 = vmul.f32 %v2158_v25, %v1420_v41  ;;  %v1660_v47 = vsub.f32 1.0, %v1659_v35  ;;  %v3081_v48 = vadd.f32 %v2686_v15, %v557_v31  ;;  %vm1425_vm6 = vmor %vm1423_vm13, %vm1424_vm2 }
  0xf8   :  { %v962_v49 = vand.u32 2147483647, %v3047_v19  ;;  %2165 = vpow2.f32 %v773_v29  ;;  %v3085_v50 = vadd.f32 %v2686_v15, %v510_v40  ;;  %v526_v53 = vmul.f32 %v2681_v14, %v372_v44 }
  0xf9   :  { %v2162_v54 = vpop.eup %2161  ;;  %1937 = vst.msk [vmem:[%s4232_s4 + $0x98] sm:$0xff] %vm1917_vm5, %v1872_v45  ;;  %v1422_v23 = vadd.f32 %v2158_v25, %v1421_v46  ;;  %v1661_v36 = vmul.f32 %v2160_v38, %v1660_v47  ;;  %vm1664_vm4 = vweird.f32 %v2160_v38  ;;  %v689_v42 = vsub.f32 0.0, %v3081_v48  ;;  %v423_v46 = vpop.f32.mrf.mxu2 }
  0xfa   :  { %v2164_v58 = vpop.eup %2163  ;;  %v954_v61 = vmul.f32 %v2162_v54, %v3047_v19  ;;  %v964_v20 = vand.u32 2147483648, %v3047_v19  ;;  %v642_v21 = vsub.f32 0.0, %v3085_v50  ;;  %v3100_v63 = vadd.f32 %v2686_v15, %v526_v53  ;;  %vm1665_vm7 = vmor %vm1663_vm0, %vm1664_vm4  ;;  %v471_v47 = vpop.f32.mrf.mxu3 }
  0xfb   :  { %v1426_v3 = vsel %vm1425_vm6, %v2158_v25, %v1422_v23  ;;  %v1662_v55 = vadd.f32 %v2160_v38, %v1661_v36  ;;  %v3102_v0 = vadd.f32 1.0, %v2164_v58  ;;  %v805_v1 = vmul.f32 1.442695, %v689_v42 }
  0xfc   :  { %v1431_v57 = vsel %vm3060_vm14, %v1430_v39, %v1426_v3  ;;  %v955_v8 = vsub.f32 1.0, %v954_v61  ;;  %v711_v51 = vmul.f32 1.442695, %v642_v21  ;;  %v658_v6 = vsub.f32 0.0, %v3100_v63 }
  0xfd   :  { %v1888_v62 = vmul.f32 %v1431_v57, %v2914_v33  ;;  %v1666_v10 = vsel %vm1665_vm7, %v2160_v38, %v1662_v55  ;;  %2167 = vrcp.f32 %v3102_v0  ;;  %v542_v11 = vmul.f32 %v2681_v14, %v420_v30 }
  0xfe   :  { %v2166_v12 = vpop.eup %2165  ;;  %v1671_v13 = vsel %vm3072_vm1, %v1670_v43, %v1666_v10  ;;  %v956_v2 = vmul.f32 %v2162_v54, %v955_v8  ;;  %vm959_vm8 = vweird.f32 %v2162_v54  ;;  %v558_v37 = vmul.f32 %v2681_v14, %v468_v4  ;;  %v375_v43 = vpop.f32.mrf.mxu1 }
  0xff   :  { %1953 = vst.msk [vmem:[%s4232_s4 + $0x118] sm:$0xff] %vm1917_vm5, %v1888_v62  ;;  %v1904_v33 = vmul.f32 %v1671_v13, %v2924_v32  ;;  %v3121_v59 = vadd.f32 1.0, %v2166_v12  ;;  %2169 = vpow2.f32 %v805_v1  ;;  %v743_v18 = vmul.f32 1.442695, %v658_v6  ;;  %vm960_vm10 = vmor %vm958_vm3, %vm959_vm8 }
 0x100   :  { %v957_v22 = vadd.f32 %v2162_v54, %v956_v2  ;;  %vm963_vm9 = vcmp.eq.f32.partialorder %v962_v49, 8.507059e+37  ;;  %2171 = vpow2.f32 %v711_v51  ;;  %v965_v25 = vor.u32 1.1754944e-38, %v964_v20 }
 0x101   :  { %1969 = vst.msk [vmem:[%s4232_s4 + $0x198] sm:$0xff] %vm1917_vm5, %v1904_v33  ;;  %v1202_v60 = vand.u32 2147483647, %v3102_v0  ;;  %v1204_v32 = vand.u32 2147483648, %v3102_v0  ;;  %2173 = vrcp.f32 %v3121_v59  ;;  %v3133_v5 = vadd.f32 %v2686_v15, %v542_v11 }
 0x102   :  { %v961_v26 = vsel %vm960_vm10, %v2162_v54, %v957_v22  ;;  %2175 = vpow2.f32 %v743_v18  ;;  %v3136_v16 = vadd.f32 %v2686_v15, %v558_v37  ;;  %v1444_v19 = vand.u32 2147483648, %v3121_v59 }
 0x103   :  { %v2168_v34 = vpop.eup %2167  ;;  %v966_v27 = vsel %vm963_vm9, %v965_v25, %v961_v26  ;;  %v511_v31 = vmul.f32 %v2681_v14, %v327_v24  ;;  %v1442_v40 = vand.u32 2147483647, %v3121_v59  ;;  %v674_v28 = vsub.f32 0.0, %v3133_v5 }
 0x104   :  { %v1857_v38 = vmul.f32 %v966_v27, %v2958_v9  ;;  %v1194_v39 = vmul.f32 %v2168_v34, %v3102_v0  ;;  %vm1198_vm11 = vweird.f32 %v3102_v0  ;;  %vm3145_vm12 = vcmp.eq.f32.partialorder %v1202_v60, 8.507059e+37  ;;  %v3190_v0 = vld [vmem:[%s4230_s3] ss:$0 sm:$0xff] }
 0x105   :  { %v2170_v41 = vpop.eup %2169  ;;  %v1205_v17 = vor.u32 1.1754944e-38, %v1204_v32  ;;  %v690_v29 = vsub.f32 0.0, %v3136_v16  ;;  %v3157_v45 = vadd.f32 %v2686_v15, %v511_v31  ;;  %vm1199_vm13 = vweird.f32 %v2168_v34 }
 0x106   :  { %v2172_v44 = vpop.eup %2171  ;;  %1922 = vst.msk [vmem:[%s4232_s4 + $0x20] sm:$0xff] %vm1917_vm5, %v1857_v38  ;;  %v1195_v9 = vsub.f32 1.0, %v1194_v39  ;;  %v3153_v56 = vadd.f32 1.0, %v2170_v41  ;;  %vm1438_vm14 = vweird.f32 %v3121_v59  ;;  %v1445_v53 = vor.u32 1.1754944e-38, %v1444_v19  ;;  %vm1200_vm0 = vmor %vm1198_vm11, %vm1199_vm13 }
 0x107   :  { %v2174_v49 = vpop.eup %2173  ;;  %v3160_v54 = vadd.f32 1.0, %v2172_v44  ;;  %vm3163_vm15 = vcmp.eq.f32.partialorder %v1442_v40, 8.507059e+37  ;;  %v775_v15 = vmul.f32 1.442695, %v674_v28  ;;  %v527_v61 = vmul.f32 %v2681_v14, %v375_v43 }
 0x108   :  { %v2176_v23 = vpop.eup %2175  ;;  %v1196_v36 = vmul.f32 %v2168_v34, %v1195_v9  ;;  %v1434_v42 = vmul.f32 %v2174_v49, %v3121_v59  ;;  %2177 = vrcp.f32 %v3153_v56  ;;  %v543_v20 = vmul.f32 %v2681_v14, %v423_v46 }
 0x109   :  { %2179 = vrcp.f32 %v3160_v54  ;;  %v3172_v21 = vmul.f32 %v2681_v14, %v471_v47  ;;  %v807_v55 = vmul.f32 1.442695, %v690_v29  ;;  %v643_v1 = vsub.f32 0.0, %v3157_v45 }
 0x10a   :  { %v1197_v30 = vadd.f32 %v2168_v34, %v1196_v36  ;;  %v1435_v3 = vsub.f32 1.0, %v1434_v42  ;;  %vm1439_vm1 = vweird.f32 %v2174_v49  ;;  %v1682_v4 = vand.u32 2147483647, %v3153_v56 }
 0x10b   :  { %v1684_v57 = vand.u32 2147483648, %v3153_v56  ;;  %v3180_v8 = vadd.f32 1.0, %v2176_v23  ;;  %v977_v14 = vand.u32 2147483647, %v3160_v54  ;;  %2181 = vpow2.f32 %v775_v15  ;;  %vm1440_vm4 = vmor %vm1438_vm14, %vm1439_vm1 }
 0x10c   :  { %v1201_v51 = vsel %vm1200_vm0, %v2168_v34, %v1197_v30  ;;  %v1436_v6 = vmul.f32 %v2174_v49, %v1435_v3  ;;  %v979_v10 = vand.u32 2147483648, %v3160_v54  ;;  %v3193_v11 = vadd.f32 %v3190_v0, %v527_v61 }
 0x10d   :  { %v1206_v62 = vsel %vm3145_vm12, %v1205_v17, %v1201_v51  ;;  %2183 = vrcp.f32 %v3180_v8  ;;  %vm1678_vm2 = vweird.f32 %v3153_v56  ;;  %vm973_vm3 = vweird.f32 %v3160_v54  ;;  %v330_v17 = vpop.f32.mrf.mxu0 }
 0x10e   :  { %v2178_v12 = vpop.eup %2177  ;;  %v1873_v13 = vmul.f32 %v1206_v62, %v3004_v52  ;;  %v1437_v2 = vadd.f32 %v2174_v49, %v1436_v6  ;;  %vm3202_vm6 = vcmp.eq.f32.partialorder %v1682_v4, 8.507059e+37  ;;  %2185 = vpow2.f32 %v807_v55 }
 0x10f   :  { %v2180_v37 = vpop.eup %2179  ;;  %v1674_v33 = vmul.f32 %v2178_v12, %v3153_v56  ;;  %v713_v22 = vmul.f32 1.442695, %v643_v1  ;;  %v1685_v24 = vor.u32 1.1754944e-38, %v1684_v57  ;;  %vm3211_vm7 = vcmp.eq.f32.partialorder %v977_v14, 8.507059e+37  ;;  %v3248_v56 = vld [vmem:[%s4229_s2] ss:$0 sm:$0xff] }
 0x110   :  { %1938 = vst.msk [vmem:[%s4232_s4 + $0xa0] sm:$0xff] %vm1917_vm5, %v1873_v13  ;;  %v1441_v52 = vsel %vm1440_vm4, %v2174_v49, %v1437_v2  ;;  %v969_v25 = vmul.f32 %v2180_v37, %v3160_v54  ;;  %v980_v26 = vor.u32 1.1754944e-38, %v979_v10  ;;  %vm1213_vm8 = vweird.f32 %v3180_v8 }
 0x111   :  { %v1446_v60 = vsel %vm3163_vm15, %v1445_v53, %v1441_v52  ;;  %v1675_v32 = vsub.f32 1.0, %v1674_v33  ;;  %v2182_v34 = vpop.eup %2181  ;;  %2187 = vpow2.f32 %v713_v22  ;;  %v659_v31 = vsub.f32 0.0, %v3193_v11 }
 0x112   :  { %v1889_v27 = vmul.f32 %v1446_v60, %v3033_v7  ;;  %v970_v19 = vsub.f32 1.0, %v969_v25  ;;  %vm1679_vm9 = vweird.f32 %v2178_v12  ;;  %v3220_v40 = vadd.f32 1.0, %v2182_v34  ;;  %v378_v60 = vpop.f32.mrf.mxu1 }
 0x113   :  { %v2184_v38 = vpop.eup %2183  ;;  %v1676_v39 = vmul.f32 %v2178_v12, %v1675_v32  ;;  %v3223_v28 = vadd.f32 %v3190_v0, %v543_v20  ;;  %vm974_vm10 = vweird.f32 %v2180_v37  ;;  %v745_v35 = vmul.f32 1.442695, %v659_v31  ;;  %vm1680_vm11 = vmor %vm1678_vm2, %vm1679_vm9 }
 0x114   :  { %1954 = vst.msk [vmem:[%s4232_s4 + $0x120] sm:$0xff] %vm1917_vm5, %v1889_v27  ;;  %v971_v41 = vmul.f32 %v2180_v37, %v970_v19  ;;  %v1209_v7 = vmul.f32 %v2184_v38, %v3180_v8  ;;  %v2186_v43 = vpop.eup %2185  ;;  %v1217_v9 = vand.u32 2147483647, %v3180_v8  ;;  %v1219_v29 = vand.u32 2147483648, %v3180_v8  ;;  %vm975_vm12 = vmor %vm973_vm3, %vm974_vm10  ;;  %v426_v19 = vpop.f32.mrf.mxu2 }
 0x115   :  { %v1677_v44 = vadd.f32 %v2178_v12, %v1676_v39  ;;  %2189 = vrcp.f32 %v3220_v40  ;;  %v3235_v49 = vadd.f32 1.0, %v2186_v43  ;;  %v3239_v53 = vadd.f32 %v3190_v0, %v3172_v21 }
 0x116   :  { %v972_v46 = vadd.f32 %v2180_v37, %v971_v41  ;;  %v1210_v47 = vsub.f32 1.0, %v1209_v7  ;;  %2191 = vpow2.f32 %v745_v35  ;;  %v675_v36 = vsub.f32 0.0, %v3223_v28 }
 0x117   :  { %v1681_v23 = vsel %vm1680_vm11, %v2178_v12, %v1677_v44  ;;  %v512_v42 = vmul.f32 %v3248_v56, %v330_v17  ;;  %v2188_v58 = vpop.eup %2187  ;;  %vm1214_vm13 = vweird.f32 %v2184_v38  ;;  %2193 = vrcp.f32 %v3235_v49 }
 0x118   :  { %v1686_v15 = vsel %vm3202_vm6, %v1685_v24, %v1681_v23  ;;  %v976_v61 = vsel %vm975_vm12, %v2180_v37, %v972_v46  ;;  %v1211_v20 = vmul.f32 %v2184_v38, %v1210_v47  ;;  %v1220_v55 = vor.u32 1.1754944e-38, %v1219_v29  ;;  %vm1215_vm14 = vmor %vm1213_vm8, %vm1214_vm13 }
 0x119   :  { %v1905_v54 = vmul.f32 %v1686_v15, %v3081_v48  ;;  %v981_v21 = vsel %vm3211_vm7, %v980_v26, %v976_v61  ;;  %v1457_v1 = vand.u32 2147483647, %v3220_v40  ;;  %v3265_v48 = vadd.f32 1.0, %v2188_v58 }
 0x11a   :  { %v1858_v30 = vmul.f32 %v981_v21, %v3085_v50  ;;  %v1212_v3 = vadd.f32 %v2184_v38, %v1211_v20  ;;  %v777_v57 = vmul.f32 1.442695, %v675_v36  ;;  %v691_v51 = vsub.f32 0.0, %v3239_v53  ;;  %v474_v20 = vpop.f32.mrf.mxu3 }
 0x11b   :  { %v2190_v4 = vpop.eup %2189  ;;  %1970 = vst.msk [vmem:[%s4232_s4 + $0x1a0] sm:$0xff] %vm1917_vm5, %v1905_v54  ;;  %v3269_v50 = vadd.f32 %v3190_v0, %v512_v42  ;;  %vm1218_vm15 = vcmp.eq.f32.partialorder %v1217_v9, 8.507059e+37  ;;  %v1459_v8 = vand.u32 2147483648, %v3220_v40  ;;  %v1697_v12 = vand.u32 2147483647, %v3235_v49 }
 0x11c   :  { %1923 = vst.msk [vmem:[%s4232_s4 + $0x28] sm:$0xff] %vm1917_vm5, %v1858_v30  ;;  %v1216_v6 = vsel %vm1215_vm14, %v2184_v38, %v1212_v3  ;;  %v1449_v14 = vmul.f32 %v2190_v4, %v3220_v40  ;;  %v2192_v62 = vpop.eup %2191  ;;  %v1699_v13 = vand.u32 2147483648, %v3235_v49  ;;  %2195 = vrcp.f32 %v3265_v48 }
 0x11d   :  { %v1221_v10 = vsel %vm1218_vm15, %v1220_v55, %v1216_v6  ;;  %vm1453_vm0 = vweird.f32 %v3220_v40  ;;  %vm3282_vm1 = vcmp.eq.f32.partialorder %v1457_v1, 8.507059e+37  ;;  %v2194_v18 = vpop.eup %2193  ;;  %v3286_v22 = vadd.f32 1.0, %v2192_v62 }
 0x11e   :  { %v1874_v2 = vmul.f32 %v1221_v10, %v3100_v63  ;;  %v1450_v37 = vsub.f32 1.0, %v1449_v14  ;;  %2197 = vpow2.f32 %v777_v57  ;;  %v809_v52 = vmul.f32 1.442695, %v691_v51 }
 0x11f   :  { %v644_v24 = vsub.f32 0.0, %v3269_v50  ;;  %vm1454_vm2 = vweird.f32 %v2190_v4  ;;  %v1460_v25 = vor.u32 1.1754944e-38, %v1459_v8  ;;  %v1689_v59 = vmul.f32 %v2194_v18, %v3235_v49 }
 0x120   :  { %1939 = vst.msk [vmem:[%s4232_s4 + $0xa8] sm:$0xff] %vm1917_vm5, %v1874_v2  ;;  %v1451_v63 = vmul.f32 %v2190_v4, %v1450_v37  ;;  %vm1693_vm3 = vweird.f32 %v3235_v49  ;;  %vm3295_vm4 = vcmp.eq.f32.partialorder %v1697_v12, 8.507059e+37  ;;  %v1700_v26 = vor.u32 1.1754944e-38, %v1699_v13  ;;  %vm1455_vm7 = vmor %vm1453_vm0, %vm1454_vm2  ;;  %v333_v13 = vpop.f32.mrf.mxu0 }
 0x121   :  { %2199 = vrcp.f32 %v3286_v22  ;;  %v1690_v27 = vsub.f32 1.0, %v1689_v59  ;;  %vm988_vm6 = vweird.f32 %v3265_v48  ;;  %v992_v38 = vand.u32 2147483647, %v3265_v48 }
 0x122   :  { %v1452_v34 = vadd.f32 %v2190_v4, %v1451_v63  ;;  %2201 = vpow2.f32 %v809_v52  ;;  %v2196_v31 = vpop.eup %2195  ;;  %v994_v39 = vand.u32 2147483648, %v3265_v48  ;;  %v715_v41 = vmul.f32 1.442695, %v644_v24 }
 0x123   :  { %v528_v7 = vmul.f32 %v3248_v56, %v378_v60  ;;  %v1691_v17 = vmul.f32 %v2194_v18, %v1690_v27  ;;  %vm1694_vm8 = vweird.f32 %v2194_v18  ;;  %v984_v43 = vmul.f32 %v2196_v31, %v3265_v48  ;;  %v381_v27 = vpop.f32.mrf.mxu1 }
 0x124   :  { %v1456_v35 = vsel %vm1455_vm7, %v2190_v4, %v1452_v34  ;;  %v2198_v44 = vpop.eup %2197  ;;  %2203 = vpow2.f32 %v715_v41  ;;  %v544_v29 = vmul.f32 %v3248_v56, %v426_v19  ;;  %vm1695_vm9 = vmor %vm1693_vm3, %vm1694_vm8  ;;  %vm3318_vm10 = vcmp.eq.f32.partialorder %v992_v38, 8.507059e+37  ;;  %v429_v19 = vpop.f32.mrf.mxu2 }
 0x125   :  { %v1461_v9 = vsel %vm3282_vm1, %v1460_v25, %v1456_v35  ;;  %v3310_v40 = vadd.f32 %v3190_v0, %v528_v7  ;;  %v1692_v47 = vadd.f32 %v2194_v18, %v1691_v17  ;;  %v985_v23 = vsub.f32 1.0, %v984_v43  ;;  %v477_v41 = vpop.f32.mrf.mxu3 }
 0x126   :  { %v1890_v46 = vmul.f32 %v1461_v9, %v3133_v5  ;;  %v3314_v36 = vadd.f32 1.0, %v2198_v44  ;;  %v995_v15 = vor.u32 1.1754944e-38, %v994_v39  ;;  %vm1228_vm11 = vweird.f32 %v3286_v22 }
 0x127   :  { %v2200_v42 = vpop.eup %2199  ;;  %v1232_v61 = vand.u32 2147483647, %v3286_v22  ;;  %v1696_v5 = vsel %vm1695_vm9, %v2194_v18, %v1692_v47  ;;  %v986_v21 = vmul.f32 %v2196_v31, %v985_v23  ;;  %vm989_vm12 = vweird.f32 %v2196_v31 }
 0x128   :  { %v2202_v54 = vpop.eup %2201  ;;  %1955 = vst.msk [vmem:[%s4232_s4 + $0x128] sm:$0xff] %vm1917_vm5, %v1890_v46  ;;  %v1224_v49 = vmul.f32 %v2200_v42, %v3286_v22  ;;  %v1701_v30 = vsel %vm3295_vm4, %v1700_v26, %v1696_v5  ;;  %v1234_v3 = vand.u32 2147483648, %v3286_v22  ;;  %2205 = vrcp.f32 %v3314_v36  ;;  %vm990_vm13 = vmor %vm988_vm6, %vm989_vm12 }
 0x129   :  { %v660_v55 = vsub.f32 0.0, %v3310_v40  ;;  %v1906_v1 = vmul.f32 %v1701_v30, %v3136_v16  ;;  %v987_v4 = vadd.f32 %v2196_v31, %v986_v21  ;;  %v3336_v51 = vadd.f32 %v3190_v0, %v544_v29 }
 0x12a   :  { %v1225_v57 = vsub.f32 1.0, %v1224_v49  ;;  %v2204_v6 = vpop.eup %2203  ;;  %vm1229_vm14 = vweird.f32 %v2200_v42  ;;  %vm3340_vm15 = vcmp.eq.f32.partialorder %v1232_v61, 8.507059e+37  ;;  %v1474_v8 = vand.u32 2147483648, %v3314_v36 }
 0x12b   :  { %v3345_v62 = vadd.f32 1.0, %v2202_v54  ;;  %1971 = vst.msk [vmem:[%s4232_s4 + $0x1a8] sm:$0xff] %vm1917_vm5, %v1906_v1  ;;  %v991_v16 = vsel %vm990_vm13, %v2196_v31, %v987_v4  ;;  %v1472_v12 = vand.u32 2147483647, %v3314_v36  ;;  %v3352_v48 = vadd.f32 1.0, %v2204_v6  ;;  %vm1230_vm0 = vmor %vm1228_vm11, %vm1229_vm14 }
 0x12c   :  { %v1226_v10 = vmul.f32 %v2200_v42, %v1225_v57  ;;  %v996_v2 = vsel %vm3318_vm10, %v995_v15, %v991_v16  ;;  %v747_v37 = vmul.f32 1.442695, %v660_v55  ;;  %v560_v33 = vmul.f32 %v3248_v56, %v474_v20 }
 0x12d   :  { %2207 = vrcp.f32 %v3345_v62  ;;  %v1859_v18 = vmul.f32 %v996_v2, %v3157_v45  ;;  %v676_v24 = vsub.f32 0.0, %v3336_v51  ;;  %v1235_v25 = vor.u32 1.1754944e-38, %v1234_v3 }
 0x12e   :  { %v1227_v52 = vadd.f32 %v2200_v42, %v1226_v10  ;;  %2209 = vrcp.f32 %v3352_v48  ;;  %v2206_v63 = vpop.eup %2205  ;;  %vm1468_vm1 = vweird.f32 %v3314_v36  ;;  %v1475_v59 = vor.u32 1.1754944e-38, %v1474_v8 }
 0x12f   :  { %v513_v60 = vmul.f32 %v3248_v56, %v333_v13  ;;  %1924 = vst.msk [vmem:[%s4232_s4 + $0x30] sm:$0xff] %vm1917_vm5, %v1859_v18  ;;  %v1464_v32 = vmul.f32 %v2206_v63, %v3314_v36  ;;  %vm3371_vm2 = vcmp.eq.f32.partialorder %v1472_v12, 8.507059e+37  ;;  %v1712_v22 = vand.u32 2147483647, %v3345_v62 }
 0x130   :  { %v1231_v45 = vsel %vm1230_vm0, %v2200_v42, %v1227_v52  ;;  %v1714_v34 = vand.u32 2147483648, %v3345_v62  ;;  %vm1003_vm3 = vweird.f32 %v3352_v48  ;;  %v1007_v38 = vand.u32 2147483647, %v3352_v48 }
 0x131   :  { %v1236_v31 = vsel %vm3340_vm15, %v1235_v25, %v1231_v45  ;;  %v1009_v39 = vand.u32 2147483648, %v3352_v48  ;;  %2211 = vpow2.f32 %v747_v37  ;;  %v1465_v35 = vsub.f32 1.0, %v1464_v32 }
 0x132   :  { %v1875_v7 = vmul.f32 %v1236_v31, %v3193_v11  ;;  %vm1708_vm4 = vweird.f32 %v3345_v62  ;;  %v779_v17 = vmul.f32 1.442695, %v676_v24  ;;  %v3385_v43 = vadd.f32 %v3190_v0, %v560_v33 }
 0x133   :  { %v2208_v44 = vpop.eup %2207  ;;  %vm1469_vm6 = vweird.f32 %v2206_v63  ;;  %v3388_v9 = vadd.f32 %v3190_v0, %v513_v60  ;;  %v529_v29 = vmul.f32 %v3248_v56, %v381_v27  ;;  %v545_v46 = vmul.f32 %v3248_v56, %v429_v19 }
 0x134   :  { %v2210_v47 = vpop.eup %2209  ;;  %1940 = vst.msk [vmem:[%s4232_s4 + $0xb0] sm:$0xff] %vm1917_vm5, %v1875_v7  ;;  %v1466_v11 = vmul.f32 %v2206_v63, %v1465_v35  ;;  %v1704_v23 = vmul.f32 %v2208_v44, %v3345_v62  ;;  %vm3397_vm7 = vcmp.eq.f32.partialorder %v1712_v22, 8.507059e+37  ;;  %2213 = vpow2.f32 %v779_v17  ;;  %vm1470_vm9 = vmor %vm1468_vm1, %vm1469_vm6  ;;  %v336_v22 = vpop.f32.mrf.mxu0 }
 0x135   :  { %v561_v58 = vmul.f32 %v3248_v56, %v477_v41  ;;  %vm1709_vm8 = vweird.f32 %v2208_v44  ;;  %v999_v15 = vmul.f32 %v2210_v47, %v3352_v48  ;;  %v692_v61 = vsub.f32 0.0, %v3385_v43 }
 0x136   :  { %v645_v20 = vsub.f32 0.0, %v3388_v9  ;;  %v1467_v54 = vadd.f32 %v2206_v63, %v1466_v11  ;;  %v1705_v5 = vsub.f32 1.0, %v1704_v23  ;;  %v3406_v21 = vadd.f32 %v3190_v0, %v529_v29  ;;  %vm1710_vm11 = vmor %vm1708_vm4, %vm1709_vm8 }
 0x137   :  { %v3409_v49 = vadd.f32 %v3190_v0, %v545_v46  ;;  %v2212_v30 = vpop.eup %2211  ;;  %v1000_v3 = vsub.f32 1.0, %v999_v15  ;;  %vm1004_vm10 = vweird.f32 %v2210_v47  ;;  %v811_v55 = vmul.f32 1.442695, %v692_v61  ;;  %v384_v61 = vpop.f32.mrf.mxu1 }
 0x138   :  { %v717_v1 = vmul.f32 1.442695, %v645_v20  ;;  %v1471_v4 = vsel %vm1470_vm9, %v2206_v63, %v1467_v54  ;;  %v1706_v57 = vmul.f32 %v2208_v44, %v1705_v5  ;;  %v3414_v6 = vadd.f32 1.0, %v2212_v30  ;;  %vm1005_vm12 = vmor %vm1003_vm3, %vm1004_vm10  ;;  %v432_v20 = vpop.f32.mrf.mxu2 }
 0x139   :  { %v661_v14 = vsub.f32 0.0, %v3406_v21  ;;  %v1476_v8 = vsel %vm3371_vm2, %v1475_v59, %v1471_v4  ;;  %v1001_v16 = vmul.f32 %v2210_v47, %v1000_v3  ;;  %2215 = vpow2.f32 %v811_v55 }
 0x13a   :  { %v677_v10 = vsub.f32 0.0, %v3409_v49  ;;  %v2214_v12 = vpop.eup %2213  ;;  %v1891_v36 = vmul.f32 %v1476_v8, %v3223_v28  ;;  %v1707_v13 = vadd.f32 %v2208_v44, %v1706_v57  ;;  %v1715_v2 = vor.u32 1.1754944e-38, %v1714_v34 }
 0x13b   :  { %2217 = vrcp.f32 %v3414_v6  ;;  %v1002_v37 = vadd.f32 %v2210_v47, %v1001_v16  ;;  %v1010_v33 = vor.u32 1.1754944e-38, %v1009_v39  ;;  %v3425_v18 = vadd.f32 1.0, %v2214_v12 }
 0x13c   :  { %v3428_v52 = vadd.f32 %v3190_v0, %v561_v58  ;;  %1956 = vst.msk [vmem:[%s4232_s4 + $0x130] sm:$0xff] %vm1917_vm5, %v1891_v36  ;;  %v1711_v28 = vsel %vm1710_vm11, %v2208_v44, %v1707_v13  ;;  %2219 = vpow2.f32 %v717_v1  ;;  %v749_v62 = vmul.f32 1.442695, %v661_v14 }
 0x13d   :  { %v781_v24 = vmul.f32 1.442695, %v677_v10  ;;  %v1716_v63 = vsel %vm3397_vm7, %v1715_v2, %v1711_v28  ;;  %v1006_v25 = vsel %vm1005_vm12, %v2210_v47, %v1002_v37  ;;  %vm1008_vm13 = vcmp.eq.f32.partialorder %v1007_v38, 8.507059e+37 }
 0x13e   :  { %v1907_v59 = vmul.f32 %v1716_v63, %v3239_v53  ;;  %v1011_v60 = vsel %vm1008_vm13, %v1010_v33, %v1006_v25  ;;  %2221 = vrcp.f32 %v3425_v18  ;;  %v1247_v26 = vand.u32 2147483647, %v3414_v6 }
 0x13f   :  { %v2216_v45 = vpop.eup %2215  ;;  %v1860_v32 = vmul.f32 %v1011_v60, %v3269_v50  ;;  %v1249_v48 = vand.u32 2147483648, %v3414_v6  ;;  %2223 = vpow2.f32 %v749_v62  ;;  %v1489_v53 = vand.u32 2147483648, %v3425_v18 }
 0x140   :  { %1972 = vst.msk [vmem:[%s4232_s4 + $0x1b0] sm:$0xff] %vm1917_vm5, %v1907_v59  ;;  %v3449_v27 = vadd.f32 1.0, %v2216_v45  ;;  %2225 = vpow2.f32 %v781_v24  ;;  %v693_v19 = vsub.f32 0.0, %v3428_v52  ;;  %v1487_v31 = vand.u32 2147483647, %v3425_v18 }
 0x141   :  { %v2218_v34 = vpop.eup %2217  ;;  %1925 = vst.msk [vmem:[%s4232_s4 + $0x38] sm:$0xff] %vm1917_vm5, %v1860_v32  ;;  %vm1243_vm14 = vweird.f32 %v3414_v6  ;;  %v514_v41 = vmul.f32 %v3248_v56, %v336_v22  ;;  %vm3462_vm15 = vcmp.eq.f32.partialorder %v1247_v26, 8.507059e+37  ;;  %v1250_v46 = vor.u32 1.1754944e-38, %v1249_v48 }
 0x142   :  { %v1239_v50 = vmul.f32 %v2218_v34, %v3414_v6  ;;  %v2220_v38 = vpop.eup %2219  ;;  %2227 = vrcp.f32 %v3449_v27  ;;  %v1729_v39 = vand.u32 2147483648, %v3449_v27  ;;  %v813_v44 = vmul.f32 1.442695, %v693_v19 }
 0x143   :  { %v3466_v17 = vadd.f32 1.0, %v2220_v38  ;;  %vm1244_vm0 = vweird.f32 %v2218_v34  ;;  %vm1483_vm1 = vweird.f32 %v3425_v18  ;;  %v1490_v47 = vor.u32 1.1754944e-38, %v1489_v53 }
 0x144   :  { %v1240_v7 = vsub.f32 1.0, %v1239_v50  ;;  %v2222_v29 = vpop.eup %2221  ;;  %vm3470_vm2 = vcmp.eq.f32.partialorder %v1487_v31, 8.507059e+37  ;;  %v1727_v15 = vand.u32 2147483647, %v3449_v27  ;;  %v3476_v5 = vor.u32 1.1754944e-38, %v1729_v39  ;;  %vm1245_vm4 = vmor %vm1243_vm14, %vm1244_vm0  ;;  %v480_v39 = vpop.f32.mrf.mxu3 }
 0x145   :  { %v2224_v11 = vpop.eup %2223  ;;  %v1479_v42 = vmul.f32 %v2222_v29, %v3425_v18  ;;  %2229 = vrcp.f32 %v3466_v17  ;;  %v1024_v30 = vand.u32 2147483648, %v3466_v17  ;;  %v3482_v55 = vadd.f32 %v3190_v0, %v514_v41 }
 0x146   :  { %v1241_v23 = vmul.f32 %v2218_v34, %v1240_v7  ;;  %v2226_v54 = vpop.eup %2225  ;;  %v3479_v3 = vadd.f32 1.0, %v2224_v11  ;;  %vm1723_vm3 = vweird.f32 %v3449_v27  ;;  %2231 = vpow2.f32 %v813_v44 }
 0x147   :  { %v1480_v4 = vsub.f32 1.0, %v1479_v42  ;;  %v3485_v57 = vadd.f32 1.0, %v2226_v54  ;;  %v1022_v8 = vand.u32 2147483647, %v3466_v17  ;;  %v530_v16 = vmul.f32 %v3248_v56, %v384_v61 }
 0x148   :  { %v1242_v1 = vadd.f32 %v2218_v34, %v1241_v23  ;;  %v2228_v14 = vpop.eup %2227  ;;  %2233 = vrcp.f32 %v3479_v3  ;;  %v3494_v10 = vmul.f32 %v3248_v56, %v432_v20  ;;  %vm1484_vm6 = vweird.f32 %v2222_v29 }
 0x149   :  { %v1481_v36 = vmul.f32 %v2222_v29, %v1480_v4  ;;  %v1719_v13 = vmul.f32 %v2228_v14, %v3449_v27  ;;  %vm3497_vm7 = vcmp.eq.f32.partialorder %v1727_v15, 8.507059e+37  ;;  %vm1018_vm8 = vweird.f32 %v3466_v17  ;;  %vm1485_vm9 = vmor %vm1483_vm1, %vm1484_vm6 }
 0x14a   :  { %v1246_v12 = vsel %vm1245_vm4, %v2218_v34, %v1242_v1  ;;  %v1025_v37 = vor.u32 1.1754944e-38, %v1024_v30  ;;  %2235 = vrcp.f32 %v3485_v57  ;;  %v1262_v63 = vand.u32 2147483647, %v3479_v3 }
 0x14b   :  { %v1251_v6 = vsel %vm3462_vm15, %v1250_v46, %v1246_v12  ;;  %v2230_v33 = vpop.eup %2229  ;;  %v1482_v62 = vadd.f32 %v2222_v29, %v1481_v36  ;;  %v1720_v24 = vsub.f32 1.0, %v1719_v13  ;;  %vm1724_vm10 = vweird.f32 %v2228_v14  ;;  %v339_v12 = vpop.f32.mrf.mxu0 }
 0x14c   :  { %v1876_v28 = vmul.f32 %v1251_v6, %v3310_v40  ;;  %v1014_v25 = vmul.f32 %v2230_v33, %v3466_v17  ;;  %vm3510_vm11 = vcmp.eq.f32.partialorder %v1022_v8, 8.507059e+37  ;;  %vm1258_vm12 = vweird.f32 %v3479_v3  ;;  %v2232_v45 = vpop.eup %2231  ;;  %vm1725_vm0 = vmor %vm1723_vm3, %vm1724_vm10 }
 0x14d   :  { %v1264_v60 = vand.u32 2147483648, %v3479_v3  ;;  %v1486_v40 = vsel %vm1485_vm9, %v2222_v29, %v1482_v62  ;;  %v1721_v18 = vmul.f32 %v2228_v14, %v1720_v24  ;;  %vm1019_vm13 = vweird.f32 %v2230_v33 }
 0x14e   :  { %1941 = vst.msk [vmem:[%s4232_s4 + $0xb8] sm:$0xff] %vm1917_vm5, %v1876_v28  ;;  %v1502_v32 = vand.u32 2147483647, %v3485_v57  ;;  %v2234_v26 = vpop.eup %2233  ;;  %v1491_v48 = vsel %vm3470_vm2, %v1490_v47, %v1486_v40  ;;  %v1015_v22 = vsub.f32 1.0, %v1014_v25  ;;  %v1504_v34 = vand.u32 2147483648, %v3485_v57  ;;  %vm1020_vm3 = vmor %vm1018_vm8, %vm1019_vm13  ;;  %v483_v25 = vpop.f32.mrf.mxu3 }
 0x14f   :  { %v3524_v53 = vadd.f32 1.0, %v2232_v45  ;;  %v1892_v19 = vmul.f32 %v1491_v48, %v3336_v51  ;;  %v1722_v50 = vadd.f32 %v2228_v14, %v1721_v18  ;;  %v1254_v31 = vmul.f32 %v2234_v26, %v3479_v3 }
 0x150   :  { %vm3528_vm14 = vcmp.eq.f32.partialorder %v1262_v63, 8.507059e+37  ;;  %vm1498_vm15 = vweird.f32 %v3485_v57  ;;  %v2236_v41 = vpop.eup %2235  ;;  %v1016_v7 = vmul.f32 %v2230_v33, %v1015_v22  ;;  %v1265_v35 = vor.u32 1.1754944e-38, %v1264_v60  ;;  %v435_v63 = vpop.f32.mrf.mxu2 }
 0x151   :  { %2237 = vrcp.f32 %v3524_v53  ;;  %v646_v51 = vsub.f32 0.0, %v3482_v55  ;;  %1957 = vst.msk [vmem:[%s4232_s4 + $0x138] sm:$0xff] %vm1917_vm5, %v1892_v19  ;;  %v1726_v44 = vsel %vm1725_vm0, %v2228_v14, %v1722_v50  ;;  %v1255_v29 = vsub.f32 1.0, %v1254_v31 }
 0x152   :  { %vm1259_vm1 = vweird.f32 %v2234_v26  ;;  %v1494_v46 = vmul.f32 %v2236_v41, %v3485_v57  ;;  %v1731_v27 = vsel %vm3497_vm7, %v3476_v5, %v1726_v44  ;;  %v1017_v47 = vadd.f32 %v2230_v33, %v1016_v7 }
 0x153   :  { %vm3546_vm2 = vcmp.eq.f32.partialorder %v1502_v32, 8.507059e+37  ;;  %v1505_v23 = vor.u32 1.1754944e-38, %v1504_v34  ;;  %v1908_v42 = vmul.f32 %v1731_v27, %v3385_v43  ;;  %v1256_v58 = vmul.f32 %v2234_v26, %v1255_v29  ;;  %vm1260_vm7 = vmor %vm1258_vm12, %vm1259_vm1  ;;  %v342_v44 = vpop.f32.mrf.mxu0 }
 0x154   :  { %v1495_v15 = vsub.f32 1.0, %v1494_v46  ;;  %vm1499_vm4 = vweird.f32 %v2236_v41  ;;  %v1021_v61 = vsel %vm1020_vm3, %v2230_v33, %v1017_v47  ;;  %v1742_v20 = vand.u32 2147483647, %v3524_v53 }
 0x155   :  { %v719_v54 = vmul.f32 1.442695, %v646_v51  ;;  %v3556_v5 = vadd.f32 %v3190_v0, %v530_v16  ;;  %1973 = vst.msk [vmem:[%s4232_s4 + $0x1b8] sm:$0xff] %vm1917_vm5, %v1908_v42  ;;  %v1026_v43 = vsel %vm3510_vm11, %v1025_v37, %v1021_v61  ;;  %v1257_v17 = vadd.f32 %v2234_v26, %v1256_v58  ;;  %vm1500_vm9 = vmor %vm1498_vm15, %vm1499_vm4  ;;  %v387_v37 = vpop.f32.mrf.mxu1 }
 0x156   :  { %v1496_v30 = vmul.f32 %v2236_v41, %v1495_v15  ;;  %vm1738_vm6 = vweird.f32 %v3524_v53  ;;  %v1744_v1 = vand.u32 2147483648, %v3524_v53  ;;  %v1861_v14 = vmul.f32 %v1026_v43, %v3388_v9 }
 0x157   :  { %v2238_v4 = vpop.eup %2237  ;;  %2239 = vpow2.f32 %v719_v54  ;;  %v662_v8 = vsub.f32 0.0, %v3556_v5  ;;  %v3573_v16 = vadd.f32 %v3190_v0, %v3494_v10  ;;  %v1261_v36 = vsel %vm1260_vm7, %v2234_v26, %v1257_v17 }
 0x158   :  { %v1497_v13 = vadd.f32 %v2236_v41, %v1496_v30  ;;  %v1734_v2 = vmul.f32 %v2238_v4, %v3524_v53  ;;  %vm1739_vm8 = vweird.f32 %v2238_v4  ;;  %1926 = vst.msk [vmem:[%s4232_s4 + $0x40] sm:$0xff] %vm1917_vm5, %v1861_v14  ;;  %v1266_v9 = vsel %vm3528_vm14, %v1265_v35, %v1261_v36 }
 0x159   :  { %v751_v3 = vmul.f32 1.442695, %v662_v8  ;;  %v678_v10 = vsub.f32 0.0, %v3573_v16  ;;  %v562_v6 = vmul.f32 %v3248_v56, %v480_v39  ;;  %v1877_v33 = vmul.f32 %v1266_v9, %v3406_v21  ;;  %vm1740_vm10 = vmor %vm1738_vm6, %vm1739_vm8 }
 0x15a   :  { %v1501_v28 = vsel %vm1500_vm9, %v2236_v41, %v1497_v13  ;;  %v1735_v62 = vsub.f32 1.0, %v1734_v2  ;;  %v515_v24 = vmul.f32 %v3248_v56, %v339_v12  ;;  %v531_v18 = vmul.f32 %v3248_v56, %v387_v37 }
 0x15b   :  { %v1506_v59 = vsel %vm3546_vm2, %v1505_v23, %v1501_v28  ;;  %2241 = vpow2.f32 %v751_v3  ;;  %v783_v57 = vmul.f32 1.442695, %v678_v10  ;;  %v3592_v60 = vadd.f32 %v3190_v0, %v562_v6  ;;  %1942 = vst.msk [vmem:[%s4232_s4 + $0xc0] sm:$0xff] %vm1917_vm5, %v1877_v33 }
 0x15c   :  { %v1893_v21 = vmul.f32 %v1506_v59, %v3409_v49  ;;  %v1736_v45 = vmul.f32 %v2238_v4, %v1735_v62  ;;  %v3600_v40 = vadd.f32 %v3190_v0, %v515_v24  ;;  %v547_v48 = vmul.f32 %v3248_v56, %v435_v63 }
 0x15d   :  { %v2240_v32 = vpop.eup %2239  ;;  %2243 = vpow2.f32 %v783_v57  ;;  %v694_v26 = vsub.f32 0.0, %v3592_v60  ;;  %v563_v22 = vmul.f32 %v3248_v56, %v483_v25  ;;  %v3614_v50 = vadd.f32 %v3190_v0, %v531_v18  ;;  %v390_v54 = vpop.f32.mrf.mxu1 }
 0x15e   :  { %1958 = vst.msk [vmem:[%s4232_s4 + $0x140] sm:$0xff] %vm1917_vm5, %v1893_v21  ;;  %v1737_v49 = vadd.f32 %v2238_v4, %v1736_v45  ;;  %v3610_v34 = vadd.f32 1.0, %v2240_v32  ;;  %v647_v19 = vsub.f32 0.0, %v3600_v40  ;;  %v1745_v31 = vor.u32 1.1754944e-38, %v1744_v1 }
 0x15f   :  { %v815_v38 = vmul.f32 1.442695, %v694_v26  ;;  %v3620_v39 = vadd.f32 %v3190_v0, %v547_v48  ;;  %vm1743_vm11 = vcmp.eq.f32.partialorder %v1742_v20, 8.507059e+37  ;;  %v663_v53 = vsub.f32 0.0, %v3614_v50 }
 0x160   :  { %v1741_v41 = vsel %vm1740_vm10, %v2238_v4, %v1737_v49  ;;  %2245 = vrcp.f32 %v3610_v34  ;;  %v721_v51 = vmul.f32 1.442695, %v647_v19  ;;  %v3628_v27 = vadd.f32 %v3190_v0, %v563_v22 }
 0x161   :  { %v2242_v7 = vpop.eup %2241  ;;  %v1746_v35 = vsel %vm1743_vm11, %v1745_v31, %v1741_v41  ;;  %2247 = vpow2.f32 %v815_v38  ;;  %v1037_v11 = vand.u32 2147483647, %v3610_v34  ;;  %v679_v23 = vsub.f32 0.0, %v3620_v39 }
 0x162   :  { %v1909_v29 = vmul.f32 %v1746_v35, %v3428_v52  ;;  %v3624_v46 = vadd.f32 1.0, %v2242_v7  ;;  %2249 = vpow2.f32 %v721_v51  ;;  %v516_v52 = vmul.f32 %v3248_v56, %v342_v44 }
 0x163   :  { %v2244_v47 = vpop.eup %2243  ;;  %v1039_v42 = vand.u32 2147483648, %v3610_v34  ;;  %v753_v15 = vmul.f32 1.442695, %v663_v53  ;;  %vm1033_vm12 = vweird.f32 %v3610_v34  ;;  %v695_v20 = vsub.f32 0.0, %v3628_v27 }
 0x164   :  { %1974 = vst.msk [vmem:[%s4232_s4 + $0x1c0] sm:$0xff] %vm1917_vm5, %v1909_v29  ;;  %2251 = vrcp.f32 %v3624_v46  ;;  %v3639_v58 = vadd.f32 1.0, %v2244_v47  ;;  %vm3644_vm13 = vcmp.eq.f32.partialorder %v1037_v11, 8.507059e+37  ;;  %v1277_v1 = vand.u32 2147483647, %v3624_v46 }
 0x165   :  { %v785_v4 = vmul.f32 1.442695, %v679_v23  ;;  %v1279_v14 = vand.u32 2147483648, %v3624_v46  ;;  %v3654_v12 = vadd.f32 %v3190_v0, %v516_v52  ;;  %v1040_v2 = vor.u32 1.1754944e-38, %v1039_v42 }
 0x166   :  { %v2246_v61 = vpop.eup %2245  ;;  %2253 = vrcp.f32 %v3639_v58  ;;  %vm1273_vm14 = vweird.f32 %v3624_v46  ;;  %v532_v9 = vmul.f32 %v3248_v56, %v390_v54  ;;  %v1517_v10 = vand.u32 2147483647, %v3639_v58 }
 0x167   :  { %v2248_v43 = vpop.eup %2247  ;;  %v1029_v17 = vmul.f32 %v2246_v61, %v3610_v34  ;;  %2255 = vpow2.f32 %v753_v15  ;;  %v1519_v6 = vand.u32 2147483648, %v3639_v58  ;;  %v817_v37 = vmul.f32 1.442695, %v695_v20 }
 0x168   :  { %v3651_v8 = vadd.f32 1.0, %v2248_v43  ;;  %v2250_v36 = vpop.eup %2249  ;;  %vm1034_vm15 = vweird.f32 %v2246_v61  ;;  %vm3662_vm0 = vcmp.eq.f32.partialorder %v1277_v1, 8.507059e+37  ;;  %v1280_v24 = vor.u32 1.1754944e-38, %v1279_v14 }
 0x169   :  { %v1030_v13 = vsub.f32 1.0, %v1029_v17  ;;  %vm1513_vm1 = vweird.f32 %v3639_v58  ;;  %v3667_v56 = vadd.f32 1.0, %v2250_v36  ;;  %v648_v63 = vsub.f32 0.0, %v3654_v12  ;;  %vm1035_vm2 = vmor %vm1033_vm12, %vm1034_vm15 }
 0x16a   :  { %v2252_v3 = vpop.eup %2251  ;;  %2257 = vrcp.f32 %v3651_v8  ;;  %v1757_v21 = vand.u32 2147483647, %v3651_v8  ;;  %v3672_v45 = vadd.f32 %v3190_v0, %v532_v9  ;;  %vm3677_vm4 = vcmp.eq.f32.partialorder %v1517_v10, 8.507059e+37 }
 0x16b   :  { %v1031_v33 = vmul.f32 %v2246_v61, %v1030_v13  ;;  %v1269_v28 = vmul.f32 %v2252_v3, %v3624_v46  ;;  %2259 = vpow2.f32 %v785_v4  ;;  %vm1274_vm3 = vweird.f32 %v2252_v3 }
 0x16c   :  { %v2254_v25 = vpop.eup %2253  ;;  %v1520_v48 = vor.u32 1.1754944e-38, %v1519_v6  ;;  %2261 = vrcp.f32 %v3667_v56  ;;  %vm1753_vm6 = vweird.f32 %v3651_v8  ;;  %v1759_v0 = vand.u32 2147483648, %v3651_v8  ;;  %vm1275_vm9 = vmor %vm1273_vm14, %vm1274_vm3 }
 0x16d   :  { %v1032_v59 = vadd.f32 %v2246_v61, %v1031_v33  ;;  %v1270_v57 = vsub.f32 1.0, %v1269_v28  ;;  %v2256_v18 = vpop.eup %2255  ;;  %v1509_v32 = vmul.f32 %v2254_v25, %v3639_v58  ;;  %2263 = vpow2.f32 %v817_v37 }
 0x16e   :  { %v3686_v38 = vadd.f32 1.0, %v2256_v18  ;;  %v723_v41 = vmul.f32 1.442695, %v648_v63  ;;  %vm1514_vm7 = vweird.f32 %v2254_v25  ;;  %vm3690_vm8 = vcmp.eq.f32.partialorder %v1757_v21, 8.507059e+37 }
 0x16f   :  { %v1036_v22 = vsel %vm1035_vm2, %v2246_v61, %v1032_v59  ;;  %v1271_v49 = vmul.f32 %v2252_v3, %v1270_v57  ;;  %v1510_v31 = vsub.f32 1.0, %v1509_v32  ;;  %v1052_v47 = vand.u32 2147483647, %v3667_v56  ;;  %vm1515_vm11 = vmor %vm1513_vm1, %vm1514_vm7 }
 0x170   :  { %v2258_v19 = vpop.eup %2257  ;;  %v1041_v34 = vsel %vm3644_vm13, %v1040_v2, %v1036_v22  ;;  %v1054_v11 = vand.u32 2147483648, %v3667_v56  ;;  %2265 = vrcp.f32 %v3686_v38  ;;  %v1760_v52 = vor.u32 1.1754944e-38, %v1759_v0  ;;  %v438_v2 = vpop.f32.mrf.mxu2 }
 0x171   :  { %v2260_v7 = vpop.eup %2259  ;;  %v1862_v35 = vmul.f32 %v1041_v34, %v3482_v55  ;;  %v1272_v51 = vadd.f32 %v2252_v3, %v1271_v49  ;;  %v1749_v44 = vmul.f32 %v2258_v19, %v3651_v8  ;;  %v1511_v53 = vmul.f32 %v2254_v25, %v1510_v31  ;;  %v345_v22 = vpop.f32.mrf.mxu0 }
 0x172   :  { %v664_v42 = vsub.f32 0.0, %v3672_v45  ;;  %v2262_v15 = vpop.eup %2261  ;;  %vm1048_vm10 = vweird.f32 %v3667_v56  ;;  %v3708_v20 = vadd.f32 1.0, %v2260_v7  ;;  %vm1754_vm12 = vweird.f32 %v2258_v19  ;;  %v3768_v7 = vld [vmem:[%s4229_s2] ss:$0 sm:$0xff] }
 0x173   :  { %1927 = vst.msk [vmem:[%s4232_s4 + $0x48] sm:$0xff] %vm1917_vm5, %v1862_v35  ;;  %v1276_v55 = vsel %vm1275_vm9, %v2252_v3, %v1272_v51  ;;  %v1750_v23 = vsub.f32 1.0, %v1749_v44  ;;  %v1512_v61 = vadd.f32 %v2254_v25, %v1511_v53  ;;  %v2264_v54 = vpop.eup %2263  ;;  %v1044_v30 = vmul.f32 %v2262_v15, %v3667_v56  ;;  %vm1755_vm14 = vmor %vm1753_vm6, %vm1754_vm12 }
 0x174   :  { %v1281_v46 = vsel %vm3662_vm0, %v1280_v24, %v1276_v55  ;;  %vm3715_vm13 = vcmp.eq.f32.partialorder %v1052_v47, 8.507059e+37  ;;  %v1055_v14 = vor.u32 1.1754944e-38, %v1054_v11  ;;  %2267 = vrcp.f32 %v3708_v20 }
 0x175   :  { %v1878_v43 = vmul.f32 %v1281_v46, %v3556_v5  ;;  %v1751_v17 = vmul.f32 %v2258_v19, %v1750_v23  ;;  %v1516_v1 = vsel %vm1515_vm11, %v2254_v25, %v1512_v61  ;;  %v1045_v36 = vsub.f32 1.0, %v1044_v30 }
 0x176   :  { %v1521_v5 = vsel %vm3677_vm4, %v1520_v48, %v1516_v1  ;;  %v1292_v13 = vand.u32 2147483647, %v3686_v38  ;;  %v2266_v9 = vpop.eup %2265  ;;  %vm1288_vm15 = vweird.f32 %v3686_v38  ;;  %v1294_v10 = vand.u32 2147483648, %v3686_v38  ;;  %v486_v48 = vpop.f32.mrf.mxu3 }
 0x177   :  { %1943 = vst.msk [vmem:[%s4232_s4 + $0xc8] sm:$0xff] %vm1917_vm5, %v1878_v43  ;;  %v1752_v58 = vadd.f32 %v2258_v19, %v1751_v17  ;;  %v1894_v3 = vmul.f32 %v1521_v5, %v3573_v16  ;;  %v3732_v6 = vadd.f32 1.0, %v2264_v54  ;;  %v1046_v33 = vmul.f32 %v2262_v15, %v1045_v36 }
 0x178   :  { %vm1049_vm0 = vweird.f32 %v2262_v15  ;;  %v1284_v28 = vmul.f32 %v2266_v9, %v3686_v38  ;;  %v1532_v8 = vand.u32 2147483647, %v3708_v20  ;;  %v1534_v62 = vand.u32 2147483648, %v3708_v20  ;;  %v441_v38 = vpop.f32.mrf.mxu2 }
 0x179   :  { %v1756_v37 = vsel %vm1755_vm14, %v2258_v19, %v1752_v58  ;;  %1959 = vst.msk [vmem:[%s4232_s4 + $0x148] sm:$0xff] %vm1917_vm5, %v1894_v3  ;;  %2269 = vrcp.f32 %v3732_v6  ;;  %v1047_v63 = vadd.f32 %v2262_v15, %v1046_v33  ;;  %vm3745_vm1 = vcmp.eq.f32.partialorder %v1292_v13, 8.507059e+37  ;;  %vm1050_vm2 = vmor %vm1048_vm10, %vm1049_vm0  ;;  %v393_v19 = vpop.f32.mrf.mxu1  ;;  %v348_v49 = vpop.f32.mrf.mxu0 }
 0x17a   :  { %v1761_v16 = vsel %vm3690_vm8, %v1760_v52, %v1756_v37  ;;  %v1285_v25 = vsub.f32 1.0, %v1284_v28  ;;  %v2268_v57 = vpop.eup %2267  ;;  %v1295_v21 = vor.u32 1.1754944e-38, %v1294_v10  ;;  %vm1528_vm3 = vweird.f32 %v3708_v20 }
 0x17b   :  { %v1910_v24 = vmul.f32 %v1761_v16, %v3592_v60  ;;  %2271 = vpow2.f32 %v723_v41  ;;  %v755_v18 = vmul.f32 1.442695, %v664_v42  ;;  %v1051_v60 = vsel %vm1050_vm2, %v2262_v15, %v1047_v63  ;;  %v3788_v42 = vld [vmem:[%s4230_s3] ss:$0 sm:$0xff] }
 0x17c   :  { %v1286_v32 = vmul.f32 %v2266_v9, %v1285_v25  ;;  %vm1289_vm4 = vweird.f32 %v2266_v9  ;;  %v1524_v26 = vmul.f32 %v2268_v57, %v3708_v20  ;;  %v1056_v56 = vsel %vm3715_vm13, %v1055_v14, %v1051_v60 }
 0x17d   :  { %1975 = vst.msk [vmem:[%s4232_s4 + $0x1c8] sm:$0xff] %vm1917_vm5, %v1910_v24  ;;  %vm3759_vm6 = vcmp.eq.f32.partialorder %v1532_v8, 8.507059e+37  ;;  %v1535_v0 = vor.u32 1.1754944e-38, %v1534_v62  ;;  %2273 = vpow2.f32 %v755_v18  ;;  %v1863_v34 = vmul.f32 %v1056_v56, %v3600_v40  ;;  %vm1290_vm8 = vmor %vm1288_vm15, %vm1289_vm4 }
 0x17e   :  { %v1287_v31 = vadd.f32 %v2266_v9, %v1286_v32  ;;  %v1525_v41 = vsub.f32 1.0, %v1524_v26  ;;  %vm1768_vm7 = vweird.f32 %v3732_v6  ;;  %v548_v35 = vmul.f32 %v3768_v7, %v438_v2  ;;  %v489_v28 = vpop.f32.mrf.mxu3 }
 0x17f   :  { %v2270_v51 = vpop.eup %2269  ;;  %vm1529_vm9 = vweird.f32 %v2268_v57  ;;  %v1772_v44 = vand.u32 2147483647, %v3732_v6  ;;  %v564_v40 = vmul.f32 %v3768_v7, %v486_v48  ;;  %v517_v29 = vmul.f32 %v3768_v7, %v345_v22  ;;  %1928 = vst.msk [vmem:[%s4232_s4 + $0x50] sm:$0xff] %vm1917_vm5, %v1863_v34 }
 0x180   :  { %v1291_v53 = vsel %vm1290_vm8, %v2266_v9, %v1287_v31  ;;  %v1526_v47 = vmul.f32 %v2268_v57, %v1525_v41  ;;  %v1764_v11 = vmul.f32 %v2270_v51, %v3732_v6  ;;  %v533_v55 = vmul.f32 %v3768_v7, %v393_v19  ;;  %vm1530_vm10 = vmor %vm1528_vm3, %vm1529_vm9 }
 0x181   :  { %v2272_v23 = vpop.eup %2271  ;;  %v1296_v52 = vsel %vm3745_vm1, %v1295_v21, %v1291_v53  ;;  %v3791_v15 = vadd.f32 %v3788_v42, %v548_v35  ;;  %v3794_v46 = vadd.f32 %v3788_v42, %v564_v40  ;;  %v3797_v61 = vadd.f32 %v3788_v42, %v517_v29  ;;  %v396_v35 = vpop.f32.mrf.mxu1 }
 0x182   :  { %v1879_v54 = vmul.f32 %v1296_v52, %v3614_v50  ;;  %v1527_v43 = vadd.f32 %v2268_v57, %v1526_v47  ;;  %v1765_v17 = vsub.f32 1.0, %v1764_v11  ;;  %v3800_v30 = vadd.f32 1.0, %v2272_v23 }
 0x183   :  { %v2274_v1 = vpop.eup %2273  ;;  %v1774_v4 = vand.u32 2147483648, %v3732_v6  ;;  %v680_v14 = vsub.f32 0.0, %v3791_v15  ;;  %v696_v5 = vsub.f32 0.0, %v3794_v46  ;;  %v549_v58 = vmul.f32 %v3768_v7, %v441_v38 }
 0x184   :  { %1944 = vst.msk [vmem:[%s4232_s4 + $0xd0] sm:$0xff] %vm1917_vm5, %v1879_v54  ;;  %v1531_v50 = vsel %vm1530_vm10, %v2268_v57, %v1527_v43  ;;  %v1766_v36 = vmul.f32 %v2270_v51, %v1765_v17  ;;  %vm1769_vm11 = vweird.f32 %v2270_v51  ;;  %2275 = vrcp.f32 %v3800_v30 }
 0x185   :  { %v1536_v20 = vsel %vm3759_vm6, %v1535_v0, %v1531_v50  ;;  %v3816_v13 = vadd.f32 1.0, %v2274_v1  ;;  %v649_v2 = vsub.f32 0.0, %v3797_v61  ;;  %v3820_v9 = vadd.f32 %v3788_v42, %v533_v55  ;;  %vm1770_vm12 = vmor %vm1768_vm7, %vm1769_vm11 }
 0x186   :  { %v1895_v3 = vmul.f32 %v1536_v20, %v3620_v39  ;;  %v1767_v10 = vadd.f32 %v2270_v51, %v1766_v36  ;;  %v787_v37 = vmul.f32 1.442695, %v680_v14  ;;  %v819_v33 = vmul.f32 1.442695, %v696_v5  ;;  %v492_v38 = vpop.f32.mrf.mxu3 }
 0x187   :  { %vm1773_vm13 = vcmp.eq.f32.partialorder %v1772_v44, 8.507059e+37  ;;  %v1775_v16 = vor.u32 1.1754944e-38, %v1774_v4  ;;  %2277 = vrcp.f32 %v3816_v13  ;;  %v1067_v62 = vand.u32 2147483647, %v3800_v30 }
 0x188   :  { %1960 = vst.msk [vmem:[%s4232_s4 + $0x150] sm:$0xff] %vm1917_vm5, %v1895_v3  ;;  %v1771_v8 = vsel %vm1770_vm12, %v2270_v51, %v1767_v10  ;;  %v1069_v39 = vand.u32 2147483648, %v3800_v30  ;;  %2279 = vpow2.f32 %v787_v37  ;;  %v725_v63 = vmul.f32 1.442695, %v649_v2  ;;  %v444_v51 = vpop.f32.mrf.mxu2 }
 0x189   :  { %v1776_v24 = vsel %vm1773_vm13, %v1775_v16, %v1771_v8  ;;  %2281 = vpow2.f32 %v819_v33  ;;  %v665_v6 = vsub.f32 0.0, %v3820_v9  ;;  %v1307_v57 = vand.u32 2147483647, %v3816_v13 }
 0x18a   :  { %v2276_v25 = vpop.eup %2275  ;;  %v1911_v59 = vmul.f32 %v1776_v24, %v3628_v27  ;;  %v3836_v21 = vadd.f32 %v3788_v42, %v549_v58  ;;  %v1309_v60 = vand.u32 2147483648, %v3816_v13  ;;  %2283 = vpow2.f32 %v725_v63 }
 0x18b   :  { %v1059_v18 = vmul.f32 %v2276_v25, %v3800_v30  ;;  %v757_v32 = vmul.f32 1.442695, %v665_v6  ;;  %vm1063_vm14 = vweird.f32 %v3800_v30  ;;  %vm3845_vm15 = vcmp.eq.f32.partialorder %v1067_v62, 8.507059e+37 }
 0x18c   :  { %1976 = vst.msk [vmem:[%s4232_s4 + $0x1d0] sm:$0xff] %vm1917_vm5, %v1911_v59  ;;  %v681_v26 = vsub.f32 0.0, %v3836_v21  ;;  %v1070_v56 = vor.u32 1.1754944e-38, %v1069_v39  ;;  %vm1303_vm0 = vweird.f32 %v3816_v13  ;;  %vm3852_vm1 = vcmp.eq.f32.partialorder %v1307_v57, 8.507059e+37 }
 0x18d   :  { %v2278_v48 = vpop.eup %2277  ;;  %v1060_v22 = vsub.f32 1.0, %v1059_v18  ;;  %2285 = vpow2.f32 %v757_v32  ;;  %v565_v41 = vmul.f32 %v3768_v7, %v489_v28  ;;  %vm1064_vm2 = vweird.f32 %v2276_v25 }
 0x18e   :  { %v2280_v0 = vpop.eup %2279  ;;  %v1299_v19 = vmul.f32 %v2278_v48, %v3816_v13  ;;  %v789_v31 = vmul.f32 1.442695, %v681_v26  ;;  %v1310_v29 = vor.u32 1.1754944e-38, %v1309_v60  ;;  %v518_v55 = vmul.f32 %v3768_v7, %v348_v49  ;;  %vm1065_vm3 = vmor %vm1063_vm14, %vm1064_vm2 }
 0x18f   :  { %v2282_v44 = vpop.eup %2281  ;;  %v1061_v40 = vmul.f32 %v2276_v25, %v1060_v22  ;;  %v3857_v53 = vadd.f32 1.0, %v2280_v0  ;;  %v534_v54 = vmul.f32 %v3768_v7, %v396_v35  ;;  %v3865_v43 = vmul.f32 %v3768_v7, %v444_v51 }
 0x190   :  { %v1300_v47 = vsub.f32 1.0, %v1299_v19  ;;  %v3859_v11 = vadd.f32 1.0, %v2282_v44  ;;  %2287 = vpow2.f32 %v789_v31  ;;  %v2284_v23 = vpop.eup %2283  ;;  %vm1304_vm4 = vweird.f32 %v2278_v48 }
 0x191   :  { %v1062_v52 = vadd.f32 %v2276_v25, %v1061_v40  ;;  %2289 = vrcp.f32 %v3857_v53  ;;  %v3871_v1 = vadd.f32 %v3788_v42, %v565_v41  ;;  %v1547_v5 = vand.u32 2147483647, %v3857_v53  ;;  %vm1305_vm6 = vmor %vm1303_vm0, %vm1304_vm4 }
 0x192   :  { %v1301_v17 = vmul.f32 %v2278_v48, %v1300_v47  ;;  %2291 = vrcp.f32 %v3859_v11  ;;  %v1549_v58 = vand.u32 2147483648, %v3857_v53  ;;  %v3876_v50 = vmul.f32 %v3768_v7, %v492_v38 }
 0x193   :  { %v2286_v4 = vpop.eup %2285  ;;  %v1066_v14 = vsel %vm1065_vm3, %v2276_v25, %v1062_v52  ;;  %v1789_v20 = vand.u32 2147483648, %v3859_v11  ;;  %v3881_v2 = vadd.f32 1.0, %v2284_v23  ;;  %v1787_v10 = vand.u32 2147483647, %v3859_v11 }
 0x194   :  { %v1071_v30 = vsel %vm3845_vm15, %v1070_v56, %v1066_v14  ;;  %v1302_v36 = vadd.f32 %v2278_v48, %v1301_v17  ;;  %v3887_v37 = vadd.f32 1.0, %v2286_v4  ;;  %v3890_v33 = vadd.f32 %v3788_v42, %v518_v55 }
 0x195   :  { %v1864_v3 = vmul.f32 %v1071_v30, %v3654_v12  ;;  %2293 = vrcp.f32 %v3881_v2  ;;  %v697_v8 = vsub.f32 0.0, %v3871_v1  ;;  %v3895_v62 = vadd.f32 %v3788_v42, %v534_v54 }
 0x196   :  { %v2288_v28 = vpop.eup %2287  ;;  %v1306_v16 = vsel %vm1305_vm6, %v2278_v48, %v1302_v36  ;;  %vm1543_vm7 = vweird.f32 %v3857_v53  ;;  %vm1783_vm8 = vweird.f32 %v3859_v11  ;;  %2295 = vrcp.f32 %v3887_v37 }
 0x197   :  { %v2290_v12 = vpop.eup %2289  ;;  %1929 = vst.msk [vmem:[%s4232_s4 + $0x58] sm:$0xff] %vm1917_vm5, %v1864_v3  ;;  %v1311_v13 = vsel %vm3852_vm1, %v1310_v29, %v1306_v16  ;;  %vm3908_vm9 = vcmp.eq.f32.partialorder %v1547_v5, 8.507059e+37  ;;  %v1550_v25 = vor.u32 1.1754944e-38, %v1549_v58  ;;  %v1790_v59 = vor.u32 1.1754944e-38, %v1789_v20 }
 0x198   :  { %v2292_v39 = vpop.eup %2291  ;;  %v1880_v24 = vmul.f32 %v1311_v13, %v3672_v45  ;;  %v1539_v63 = vmul.f32 %v2290_v12, %v3857_v53  ;;  %vm3913_vm10 = vcmp.eq.f32.partialorder %v1787_v10, 8.507059e+37  ;;  %vm1078_vm11 = vweird.f32 %v3881_v2  ;;  %v351_v10 = vpop.f32.mrf.mxu0 }
 0x199   :  { %v1779_v57 = vmul.f32 %v2292_v39, %v3859_v11  ;;  %v1082_v60 = vand.u32 2147483647, %v3881_v2  ;;  %v1084_v45 = vand.u32 2147483648, %v3881_v2  ;;  %v1322_v27 = vand.u32 2147483647, %v3887_v37  ;;  %v399_v11 = vpop.f32.mrf.mxu1 }
 0x19a   :  { %1945 = vst.msk [vmem:[%s4232_s4 + $0xd8] sm:$0xff] %vm1917_vm5, %v1880_v24  ;;  %v1540_v32 = vsub.f32 1.0, %v1539_v63  ;;  %v1324_v26 = vand.u32 2147483648, %v3887_v37  ;;  %v3926_v48 = vadd.f32 1.0, %v2288_v28  ;;  %vm1544_vm12 = vweird.f32 %v2290_v12 }
 0x19b   :  { %v1780_v22 = vsub.f32 1.0, %v1779_v57  ;;  %vm1318_vm13 = vweird.f32 %v3887_v37  ;;  %v821_v56 = vmul.f32 1.442695, %v697_v8  ;;  %v2294_v49 = vpop.eup %2293  ;;  %vm1784_vm14 = vweird.f32 %v2292_v39  ;;  %vm1545_vm2 = vmor %vm1543_vm7, %vm1544_vm12 }
 0x19c   :  { %v1541_v0 = vmul.f32 %v2290_v12, %v1540_v32  ;;  %2297 = vrcp.f32 %v3926_v48  ;;  %v650_v19 = vsub.f32 0.0, %v3890_v33  ;;  %v2296_v34 = vpop.eup %2295  ;;  %v1074_v41 = vmul.f32 %v2294_v49, %v3881_v2  ;;  %vm1785_vm3 = vmor %vm1783_vm8, %vm1784_vm14 }
 0x19d   :  { %v1781_v31 = vmul.f32 %v2292_v39, %v1780_v22  ;;  %vm3932_vm15 = vcmp.eq.f32.partialorder %v1082_v60, 8.507059e+37  ;;  %v1085_v51 = vor.u32 1.1754944e-38, %v1084_v45  ;;  %v666_v44 = vsub.f32 0.0, %v3895_v62 }
 0x19e   :  { %v1542_v40 = vadd.f32 %v2290_v12, %v1541_v0  ;;  %vm1079_vm0 = vweird.f32 %v2294_v49  ;;  %v1314_v29 = vmul.f32 %v2296_v34, %v3887_v37  ;;  %vm3938_vm1 = vcmp.eq.f32.partialorder %v1322_v27, 8.507059e+37 }
 0x19f   :  { %v1325_v55 = vor.u32 1.1754944e-38, %v1324_v26  ;;  %v1782_v38 = vadd.f32 %v2292_v39, %v1781_v31  ;;  %v1075_v23 = vsub.f32 1.0, %v1074_v41  ;;  %v1562_v52 = vand.u32 2147483647, %v3926_v48  ;;  %vm1080_vm6 = vmor %vm1078_vm11, %vm1079_vm0 }
 0x1a0   :  { %2299 = vpow2.f32 %v821_v56  ;;  %v1546_v54 = vsel %vm1545_vm2, %v2290_v12, %v1542_v40  ;;  %v1315_v17 = vsub.f32 1.0, %v1314_v29  ;;  %vm1319_vm4 = vweird.f32 %v2296_v34  ;;  %v447_v40 = vpop.f32.mrf.mxu2 }
 0x1a1   :  { %v727_v4 = vmul.f32 1.442695, %v650_v19  ;;  %v1551_v14 = vsel %vm3908_vm9, %v1550_v25, %v1546_v54  ;;  %v1786_v5 = vsel %vm1785_vm3, %v2292_v39, %v1782_v38  ;;  %v1076_v58 = vmul.f32 %v2294_v49, %v1075_v23  ;;  %vm1320_vm7 = vmor %vm1318_vm13, %vm1319_vm4 }
 0x1a2   :  { %v759_v53 = vmul.f32 1.442695, %v666_v44  ;;  %v2298_v30 = vpop.eup %2297  ;;  %v1896_v36 = vmul.f32 %v1551_v14, %v3791_v15  ;;  %v1791_v20 = vsel %vm3913_vm10, %v1790_v59, %v1786_v5  ;;  %v1316_v3 = vmul.f32 %v2296_v34, %v1315_v17  ;;  %v495_v5 = vpop.f32.mrf.mxu3 }
 0x1a3   :  { %2301 = vpow2.f32 %v727_v4  ;;  %v1912_v28 = vmul.f32 %v1791_v20, %v3794_v46  ;;  %v1077_v16 = vadd.f32 %v2294_v49, %v1076_v58  ;;  %v1554_v8 = vmul.f32 %v2298_v30, %v3926_v48 }
 0x1a4   :  { %v1564_v12 = vand.u32 2147483648, %v3926_v48  ;;  %1961 = vst.msk [vmem:[%s4232_s4 + $0x158] sm:$0xff] %vm1917_vm5, %v1896_v36  ;;  %v1317_v15 = vadd.f32 %v2296_v34, %v1316_v3  ;;  %2303 = vpow2.f32 %v759_v53  ;;  %v3966_v13 = vadd.f32 %v3788_v42, %v3865_v43 }
 0x1a5   :  { %v3970_v46 = vadd.f32 %v3788_v42, %v3876_v50  ;;  %1977 = vst.msk [vmem:[%s4232_s4 + $0x1d8] sm:$0xff] %vm1917_vm5, %v1912_v28  ;;  %v1081_v24 = vsel %vm1080_vm6, %v2294_v49, %v1077_v16  ;;  %v1555_v2 = vsub.f32 1.0, %v1554_v8  ;;  %v519_v63 = vmul.f32 %v3768_v7, %v351_v10 }
 0x1a6   :  { %v2300_v39 = vpop.eup %2299  ;;  %v535_v43 = vmul.f32 %v3768_v7, %v399_v11  ;;  %v1086_v50 = vsel %vm3932_vm15, %v1085_v51, %v1081_v24  ;;  %v1321_v6 = vsel %vm1320_vm7, %v2296_v34, %v1317_v15  ;;  %v682_v59 = vsub.f32 0.0, %v3966_v13 }
 0x1a7   :  { %v3983_v25 = vadd.f32 1.0, %v2300_v39  ;;  %v1865_v57 = vmul.f32 %v1086_v50, %v3797_v61  ;;  %v1326_v18 = vsel %vm3938_vm1, %v1325_v55, %v1321_v6  ;;  %v1556_v37 = vmul.f32 %v2298_v30, %v1555_v2 }
 0x1a8   :  { %vm1559_vm8 = vweird.f32 %v2298_v30  ;;  %v1881_v45 = vmul.f32 %v1326_v18, %v3820_v9  ;;  %v698_v32 = vsub.f32 0.0, %v3970_v46  ;;  %vm1558_vm9 = vweird.f32 %v3926_v48 }
 0x1a9   :  { %v2302_v60 = vpop.eup %2301  ;;  %2305 = vrcp.f32 %v3983_v25  ;;  %1930 = vst.msk [vmem:[%s4232_s4 + $0x60] sm:$0xff] %vm1917_vm5, %v1865_v57  ;;  %v1557_v27 = vadd.f32 %v2298_v30, %v1556_v37  ;;  %v791_v26 = vmul.f32 1.442695, %v682_v59  ;;  %vm1560_vm10 = vmor %vm1558_vm9, %vm1559_vm8  ;;  %v1565_v9 = vor.u32 1.1754944e-38, %v1564_v12  ;;  %v354_v57 = vpop.f32.mrf.mxu0 }
 0x1aa   :  { %v3997_v61 = vadd.f32 1.0, %v2302_v60  ;;  %v2304_v22 = vpop.eup %2303  ;;  %1946 = vst.msk [vmem:[%s4232_s4 + $0xe0] sm:$0xff] %vm1917_vm5, %v1881_v45  ;;  %v4004_v56 = vadd.f32 %v3788_v42, %v519_v63  ;;  %v4007_v49 = vadd.f32 %v3788_v42, %v535_v43  ;;  %vm1563_vm11 = vcmp.eq.f32.partialorder %v1562_v52, 8.507059e+37 }
 0x1ab   :  { %v1561_v0 = vsel %vm1560_vm10, %v2298_v30, %v1557_v27  ;;  %v1802_v48 = vand.u32 2147483647, %v3983_v25  ;;  %v1804_v34 = vand.u32 2147483648, %v3983_v25  ;;  %v4012_v31 = vadd.f32 1.0, %v2304_v22 }
 0x1ac   :  { %2307 = vrcp.f32 %v3997_v61  ;;  %v1566_v19 = vsel %vm1563_vm11, %v1565_v9, %v1561_v0  ;;  %v823_v41 = vmul.f32 1.442695, %v698_v32  ;;  %v651_v51 = vsub.f32 0.0, %v4004_v56 }
 0x1ad   :  { %v1897_v35 = vmul.f32 %v1566_v19, %v3836_v21  ;;  %2309 = vpow2.f32 %v791_v26  ;;  %v667_v44 = vsub.f32 0.0, %v4007_v49  ;;  %v1097_v47 = vand.u32 2147483647, %v3997_v61 }
 0x1ae   :  { %2311 = vrcp.f32 %v4012_v31  ;;  %vm1798_vm12 = vweird.f32 %v3983_v25  ;;  %vm4025_vm13 = vcmp.eq.f32.partialorder %v1802_v48, 8.507059e+37  ;;  %v729_v38 = vmul.f32 1.442695, %v651_v51 }
 0x1af   :  { %v2306_v29 = vpop.eup %2305  ;;  %1962 = vst.msk [vmem:[%s4232_s4 + $0x160] sm:$0xff] %vm1917_vm5, %v1897_v35  ;;  %2313 = vpow2.f32 %v823_v41  ;;  %v761_v23 = vmul.f32 1.442695, %v667_v44  ;;  %v551_v52 = vmul.f32 %v3768_v7, %v447_v40  ;;  %v1805_v4 = vor.u32 1.1754944e-38, %v1804_v34  ;;  %v402_v41 = vpop.f32.mrf.mxu1 }
 0x1b0   :  { %v1794_v55 = vmul.f32 %v2306_v29, %v3983_v25  ;;  %vm1093_vm14 = vweird.f32 %v3997_v61  ;;  %v1099_v14 = vand.u32 2147483648, %v3997_v61  ;;  %vm4033_vm15 = vcmp.eq.f32.partialorder %v1097_v47, 8.507059e+37 }
 0x1b1   :  { %2315 = vpow2.f32 %v729_v38  ;;  %v4038_v30 = vadd.f32 %v3788_v42, %v551_v52  ;;  %vm1799_vm0 = vweird.f32 %v2306_v29  ;;  %v1337_v3 = vand.u32 2147483647, %v4012_v31 }
 0x1b2   :  { %v2308_v54 = vpop.eup %2307  ;;  %v1795_v17 = vsub.f32 1.0, %v1794_v55  ;;  %2317 = vpow2.f32 %v761_v23  ;;  %v567_v8 = vmul.f32 %v3768_v7, %v495_v5  ;;  %v1100_v15 = vor.u32 1.1754944e-38, %v1099_v14  ;;  %vm1800_vm2 = vmor %vm1798_vm12, %vm1799_vm0 }
 0x1b3   :  { %v1089_v58 = vmul.f32 %v2308_v54, %v3997_v61  ;;  %v2310_v36 = vpop.eup %2309  ;;  %v683_v16 = vsub.f32 0.0, %v4038_v30  ;;  %vm1333_vm1 = vweird.f32 %v4012_v31  ;;  %vm1094_vm3 = vweird.f32 %v2308_v54 }
 0x1b4   :  { %v1796_v20 = vmul.f32 %v2306_v29, %v1795_v17  ;;  %v2312_v10 = vpop.eup %2311  ;;  %v4041_v28 = vadd.f32 1.0, %v2310_v36  ;;  %v1339_v63 = vand.u32 2147483648, %v4012_v31  ;;  %vm4051_vm4 = vcmp.eq.f32.partialorder %v1337_v3, 8.507059e+37  ;;  %vm1095_vm6 = vmor %vm1093_vm14, %vm1094_vm3 }
 0x1b5   :  { %v1090_v11 = vsub.f32 1.0, %v1089_v58  ;;  %v1329_v39 = vmul.f32 %v2312_v10, %v4012_v31  ;;  %v2314_v24 = vpop.eup %2313  ;;  %v793_v60 = vmul.f32 1.442695, %v683_v16  ;;  %v4060_v45 = vadd.f32 %v3788_v42, %v567_v8 }
 0x1b6   :  { %v1797_v12 = vadd.f32 %v2306_v29, %v1796_v20  ;;  %2319 = vrcp.f32 %v4041_v28  ;;  %v4055_v59 = vadd.f32 1.0, %v2314_v24  ;;  %vm1334_vm7 = vweird.f32 %v2312_v10 }
 0x1b7   :  { %v1091_v2 = vmul.f32 %v2308_v54, %v1090_v11  ;;  %v1330_v50 = vsub.f32 1.0, %v1329_v39  ;;  %v2316_v18 = vpop.eup %2315  ;;  %v1340_v9 = vor.u32 1.1754944e-38, %v1339_v63  ;;  %v1577_v0 = vand.u32 2147483647, %v4041_v28  ;;  %vm1335_vm8 = vmor %vm1333_vm1, %vm1334_vm7 }
 0x1b8   :  { %v1801_v43 = vsel %vm1800_vm2, %v2306_v29, %v1797_v12  ;;  %v2318_v32 = vpop.eup %2317  ;;  %2321 = vrcp.f32 %v4055_v59  ;;  %v520_v48 = vmul.f32 %v3768_v7, %v354_v57  ;;  %v4075_v19 = vadd.f32 1.0, %v2316_v18 }
 0x1b9   :  { %v1806_v25 = vsel %vm4025_vm13, %v1805_v4, %v1801_v43  ;;  %v1092_v37 = vadd.f32 %v2308_v54, %v1091_v2  ;;  %v1331_v26 = vmul.f32 %v2312_v10, %v1330_v50  ;;  %v4077_v34 = vadd.f32 1.0, %v2318_v32 }
 0x1ba   :  { %v1913_v27 = vmul.f32 %v1806_v25, %v3871_v1  ;;  %v1579_v44 = vand.u32 2147483648, %v4041_v28  ;;  %2323 = vpow2.f32 %v793_v60  ;;  %v699_v40 = vsub.f32 0.0, %v4060_v45 }
 0x1bb   :  { %v1096_v22 = vsel %vm1095_vm6, %v2308_v54, %v1092_v37  ;;  %v1332_v61 = vadd.f32 %v2312_v10, %v1331_v26  ;;  %v1817_v55 = vand.u32 2147483647, %v4055_v59  ;;  %2325 = vrcp.f32 %v4075_v19 }
 0x1bc   :  { %1978 = vst.msk [vmem:[%s4232_s4 + $0x1e0] sm:$0xff] %vm1917_vm5, %v1913_v27  ;;  %v1101_v1 = vsel %vm4033_vm15, %v1100_v15, %v1096_v22  ;;  %v2320_v35 = vpop.eup %2319  ;;  %vm1573_vm9 = vweird.f32 %v4041_v28  ;;  %v1819_v31 = vand.u32 2147483648, %v4055_v59  ;;  %v536_v21 = vmul.f32 %v3768_v7, %v402_v41 }
 0x1bd   :  { %v1866_v51 = vmul.f32 %v1101_v1, %v3890_v33  ;;  %v1336_v29 = vsel %vm1335_vm8, %v2312_v10, %v1332_v61  ;;  %v1569_v47 = vmul.f32 %v2320_v35, %v4041_v28  ;;  %vm4097_vm10 = vcmp.eq.f32.partialorder %v1577_v0, 8.507059e+37  ;;  %v450_v10 = vpop.f32.mrf.mxu2 }
 0x1be   :  { %v1341_v33 = vsel %vm4051_vm4, %v1340_v9, %v1336_v29  ;;  %v2322_v38 = vpop.eup %2321  ;;  %2327 = vrcp.f32 %v4077_v34  ;;  %v1580_v17 = vor.u32 1.1754944e-38, %v1579_v44  ;;  %vm1813_vm11 = vweird.f32 %v4055_v59 }
 0x1bf   :  { %1931 = vst.msk [vmem:[%s4232_s4 + $0x68] sm:$0xff] %vm1917_vm5, %v1866_v51  ;;  %v1882_v23 = vmul.f32 %v1341_v33, %v3895_v62  ;;  %v1570_v52 = vsub.f32 1.0, %v1569_v47  ;;  %v1809_v4 = vmul.f32 %v2322_v38, %v4055_v59  ;;  %v1112_v14 = vand.u32 2147483647, %v4075_v19 }
 0x1c0   :  { %vm1574_vm12 = vweird.f32 %v2320_v35  ;;  %vm4109_vm13 = vcmp.eq.f32.partialorder %v1817_v55, 8.507059e+37  ;;  %v825_v58 = vmul.f32 1.442695, %v699_v40  ;;  %v2324_v53 = vpop.eup %2323  ;;  %v1820_v20 = vor.u32 1.1754944e-38, %v1819_v31 }
 0x1c1   :  { %1947 = vst.msk [vmem:[%s4232_s4 + $0xe8] sm:$0xff] %vm1917_vm5, %v1882_v23  ;;  %v1571_v62 = vmul.f32 %v2320_v35, %v1570_v52  ;;  %v1810_v36 = vsub.f32 1.0, %v1809_v4  ;;  %vm1108_vm14 = vweird.f32 %v4075_v19  ;;  %v1114_v3 = vand.u32 2147483648, %v4075_v19  ;;  %v2326_v11 = vpop.eup %2325  ;;  %vm1575_vm1 = vmor %vm1573_vm9, %vm1574_vm12 }
 0x1c2   :  { %vm1814_vm15 = vweird.f32 %v2322_v38  ;;  %vm1348_vm0 = vweird.f32 %v4077_v34  ;;  %v4116_v8 = vadd.f32 1.0, %v2324_v53  ;;  %v1104_v15 = vmul.f32 %v2326_v11, %v4075_v19 }
 0x1c3   :  { %v1572_v16 = vadd.f32 %v2320_v35, %v1571_v62  ;;  %v1811_v12 = vmul.f32 %v2322_v38, %v1810_v36  ;;  %vm4121_vm2 = vcmp.eq.f32.partialorder %v1112_v14, 8.507059e+37  ;;  %2329 = vpow2.f32 %v825_v58  ;;  %vm1815_vm3 = vmor %vm1813_vm11, %vm1814_vm15 }
 0x1c4   :  { %v4126_v24 = vadd.f32 %v3788_v42, %v520_v48  ;;  %v2328_v2 = vpop.eup %2327  ;;  %2331 = vrcp.f32 %v4116_v8  ;;  %v4130_v43 = vadd.f32 %v3788_v42, %v536_v21  ;;  %v552_v28 = vmul.f32 %v3768_v7, %v450_v10 }
 0x1c5   :  { %v1576_v63 = vsel %vm1575_vm1, %v2320_v35, %v1572_v16  ;;  %v1812_v6 = vadd.f32 %v2322_v38, %v1811_v12  ;;  %v1105_v57 = vsub.f32 1.0, %v1104_v15  ;;  %v1344_v18 = vmul.f32 %v2328_v2, %v4077_v34  ;;  %v498_v35 = vpop.f32.mrf.mxu3 }
 0x1c6   :  { %v1581_v50 = vsel %vm4097_vm10, %v1580_v17, %v1576_v63  ;;  %vm1109_vm4 = vweird.f32 %v2326_v11  ;;  %v1115_v37 = vor.u32 1.1754944e-38, %v1114_v3  ;;  %v1352_v60 = vand.u32 2147483647, %v4077_v34 }
 0x1c7   :  { %v1898_v25 = vmul.f32 %v1581_v50, %v3966_v13  ;;  %v1816_v32 = vsel %vm1815_vm3, %v2322_v38, %v1812_v6  ;;  %v1106_v27 = vmul.f32 %v2326_v11, %v1105_v57  ;;  %v1345_v26 = vsub.f32 1.0, %v1344_v18  ;;  %vm1110_vm7 = vmor %vm1108_vm14, %vm1109_vm4 }
 0x1c8   :  { %v652_v22 = vsub.f32 0.0, %v4126_v24  ;;  %v1821_v13 = vsel %vm4109_vm13, %v1820_v20, %v1816_v32  ;;  %v1354_v59 = vand.u32 2147483648, %v4077_v34  ;;  %v668_v9 = vsub.f32 0.0, %v4130_v43 }
 0x1c9   :  { %1963 = vst.msk [vmem:[%s4232_s4 + $0x168] sm:$0xff] %vm1917_vm5, %v1898_v25  ;;  %v4151_v0 = vadd.f32 %v3788_v42, %v552_v28  ;;  %v2330_v48 = vpop.eup %2329  ;;  %v1914_v1 = vmul.f32 %v1821_v13, %v3970_v46  ;;  %v1107_v61 = vadd.f32 %v2326_v11, %v1106_v27  ;;  %v1346_v41 = vmul.f32 %v2328_v2, %v1345_v26 }
 0x1ca   :  { %vm1349_vm6 = vweird.f32 %v2328_v2  ;;  %v2332_v51 = vpop.eup %2331  ;;  %vm4157_vm8 = vcmp.eq.f32.partialorder %v1352_v60, 8.507059e+37  ;;  %v891_v40 = vadd.f32 1.0, %v2330_v48  ;;  %v731_v29 = vmul.f32 1.442695, %v652_v22 }
 0x1cb   :  { %v684_v47 = vsub.f32 0.0, %v4151_v0  ;;  %1979 = vst.msk [vmem:[%s4232_s4 + $0x1e8] sm:$0xff] %vm1917_vm5, %v1914_v1  ;;  %v1111_v46 = vsel %vm1110_vm7, %v2326_v11, %v1107_v61  ;;  %v1347_v55 = vadd.f32 %v2328_v2, %v1346_v41  ;;  %v1584_v33 = vmul.f32 %v2332_v51, %v4116_v8  ;;  %vm1350_vm9 = vmor %vm1348_vm0, %vm1349_vm6 }
 0x1cc   :  { %v763_v31 = vmul.f32 1.442695, %v668_v9  ;;  %v1116_v19 = vsel %vm4121_vm2, %v1115_v37, %v1111_v46  ;;  %v1355_v21 = vor.u32 1.1754944e-38, %v1354_v59  ;;  %2333 = vrcp.f32 %v891_v40 }
 0x1cd   :  { %v568_v38 = vmul.f32 %v3768_v7, %v498_v35  ;;  %v1867_v23 = vmul.f32 %v1116_v19, %v4004_v56  ;;  %v1351_v52 = vsel %vm1350_vm9, %v2328_v2, %v1347_v55  ;;  %v1585_v54 = vsub.f32 1.0, %v1584_v33 }
 0x1ce   :  { %v1592_v17 = vand.u32 2147483647, %v4116_v8  ;;  %v1356_v4 = vsel %vm4157_vm8, %v1355_v21, %v1351_v52  ;;  %v1594_v14 = vand.u32 2147483648, %v4116_v8  ;;  %2335 = vpow2.f32 %v731_v29 }
 0x1cf   :  { %v795_v62 = vmul.f32 1.442695, %v684_v47  ;;  %1932 = vst.msk [vmem:[%s4232_s4 + $0x70] sm:$0xff] %vm1917_vm5, %v1867_v23  ;;  %v1883_v7 = vmul.f32 %v1356_v4, %v4007_v49  ;;  %v1586_v34 = vmul.f32 %v2332_v51, %v1585_v54  ;;  %vm1589_vm10 = vweird.f32 %v2332_v51 }
 0x1d0   :  { %2337 = vpow2.f32 %v763_v31  ;;  %v4183_v56 = vadd.f32 %v3788_v42, %v568_v38  ;;  %vm1588_vm11 = vweird.f32 %v4116_v8  ;;  %v1595_v53 = vor.u32 1.1754944e-38, %v1594_v14 }
 0x1d1   :  { %2339 = vpow2.f32 %v795_v62  ;;  %1948 = vst.msk [vmem:[%s4232_s4 + $0xf0] sm:$0xff] %vm1917_vm5, %v1883_v7  ;;  %v1587_v5 = vadd.f32 %v2332_v51, %v1586_v34  ;;  %vm1590_vm12 = vmor %vm1588_vm11, %vm1589_vm10  ;;  %vm1593_vm13 = vcmp.eq.f32.partialorder %v1592_v17, 8.507059e+37  ;;  %v1834_v2 = vand.u32 2147483648, %v891_v40 }
 0x1d2   :  { %v2334_v58 = vpop.eup %2333  ;;  %v700_v49 = vsub.f32 0.0, %v4183_v56  ;;  %v1832_v28 = vand.u32 2147483647, %v891_v40  ;;  %vm1828_vm15 = vweird.f32 %v891_v40 }
 0x1d3   :  { %v1591_v36 = vsel %vm1590_vm12, %v2332_v51, %v1587_v5  ;;  %v1824_v20 = vmul.f32 %v2334_v58, %v891_v40  ;;  %vm1829_vm14 = vweird.f32 %v2334_v58 }
 0x1d4   :  { %v2336_v3 = vpop.eup %2335  ;;  %v1596_v10 = vsel %vm1593_vm13, %v1595_v53, %v1591_v36  ;;  %v827_v42 = vmul.f32 1.442695, %v700_v49  ;;  %vm1830_vm0 = vmor %vm1828_vm15, %vm1829_vm14  ;;  %vm1833_vm1 = vcmp.eq.f32.partialorder %v1832_v28, 8.507059e+37 }
 0x1d5   :  { %v1899_v16 = vmul.f32 %v1596_v10, %v4038_v30  ;;  %v1825_v12 = vsub.f32 1.0, %v1824_v20  ;;  %v844_v15 = vadd.f32 1.0, %v2336_v3  ;;  %v1835_v30 = vor.u32 1.1754944e-38, %v1834_v2 }
 0x1d6   :  { %v2338_v11 = vpop.eup %2337  ;;  %2341 = vpow2.f32 %v827_v42 }
 0x1d7   :  { %v2340_v39 = vpop.eup %2339  ;;  %v860_v63 = vadd.f32 1.0, %v2338_v11  ;;  %1964 = vst.msk [vmem:[%s4232_s4 + $0x170] sm:$0xff] %vm1917_vm5, %v1899_v16  ;;  %v1826_v8 = vmul.f32 %v2334_v58, %v1825_v12  ;;  %2343 = vrcp.f32 %v844_v15  ;;  %v1127_v59 = vand.u32 2147483647, %v844_v15 }
 0x1d8   :  { %v876_v6 = vadd.f32 1.0, %v2340_v39  ;;  %v1129_v9 = vand.u32 2147483648, %v844_v15  ;;  %vm1123_vm2 = vweird.f32 %v844_v15 }
 0x1d9   :  { %2345 = vrcp.f32 %v860_v63  ;;  %v1827_v50 = vadd.f32 %v2334_v58, %v1826_v8  ;;  %v1369_v61 = vand.u32 2147483648, %v860_v63  ;;  %vm1363_vm4 = vweird.f32 %v860_v63 }
 0x1da   :  { %2347 = vrcp.f32 %v876_v6  ;;  %v1367_v51 = vand.u32 2147483647, %v860_v63  ;;  %vm1128_vm7 = vcmp.eq.f32.partialorder %v1127_v59, 8.507059e+37  ;;  %v1130_v40 = vor.u32 1.1754944e-38, %v1129_v9 }
 0x1db   :  { %v1831_v57 = vsel %vm1830_vm0, %v2334_v58, %v1827_v50  ;;  %v1370_v55 = vor.u32 1.1754944e-38, %v1369_v61  ;;  %v1607_v33 = vand.u32 2147483647, %v876_v6  ;;  %v1609_v31 = vand.u32 2147483648, %v876_v6 }
 0x1dc   :  { %v2342_v18 = vpop.eup %2341  ;;  %v1836_v25 = vsel %vm1833_vm1, %v1835_v30, %v1831_v57  ;;  %vm1368_vm11 = vcmp.eq.f32.partialorder %v1367_v51, 8.507059e+37  ;;  %vm1603_vm12 = vweird.f32 %v876_v6 }
 0x1dd   :  { %v2344_v37 = vpop.eup %2343  ;;  %v1915_v60 = vmul.f32 %v1836_v25, %v4060_v45  ;;  %v4197_v32 = vadd.f32 1.0, %v2342_v18  ;;  %vm1608_vm14 = vcmp.eq.f32.partialorder %v1607_v33, 8.507059e+37  ;;  %v1610_v7 = vor.u32 1.1754944e-38, %v1609_v31 }
 0x1de   :  { %v1119_v26 = vmul.f32 %v2344_v37, %v844_v15  ;;  %vm1124_vm3 = vweird.f32 %v2344_v37 }
 0x1df   :  { %v2346_v27 = vpop.eup %2345  ;;  %1980 = vst.msk [vmem:[%s4232_s4 + $0x1f0] sm:$0xff] %vm1917_vm5, %v1915_v60  ;;  %2349 = vrcp.f32 %v4197_v32  ;;  %vm1125_vm8 = vmor %vm1123_vm2, %vm1124_vm3  ;;  %v1849_v34 = vand.u32 2147483648, %v4197_v32  ;;  %vm1843_vm0 = vweird.f32 %v4197_v32 }
 0x1e0   :  { %v1359_v22 = vmul.f32 %v2346_v27, %v860_v63  ;;  %v1120_v13 = vsub.f32 1.0, %v1119_v26  ;;  %v2348_v48 = vpop.eup %2347  ;;  %vm1364_vm6 = vweird.f32 %v2346_v27 }
 0x1e1   :  { %v1599_v45 = vmul.f32 %v2348_v48, %v876_v6  ;;  %vm1365_vm9 = vmor %vm1363_vm4, %vm1364_vm6  ;;  %vm1604_vm10 = vweird.f32 %v2348_v48  ;;  %v1850_v36 = vor.u32 1.1754944e-38, %v1849_v34 }
 0x1e2   :  { %v1360_v1 = vsub.f32 1.0, %v1359_v22  ;;  %v1121_v41 = vmul.f32 %v2344_v37, %v1120_v13  ;;  %vm1605_vm13 = vmor %vm1603_vm12, %vm1604_vm10 }
 0x1e3   :  { %v1600_v29 = vsub.f32 1.0, %v1599_v45 }
 0x1e4   :  { %v1361_v35 = vmul.f32 %v2346_v27, %v1360_v1  ;;  %v1122_v44 = vadd.f32 %v2344_v37, %v1121_v41 }
 0x1e5   :  { %v2350_v47 = vpop.eup %2349  ;;  %v1601_v21 = vmul.f32 %v2348_v48, %v1600_v29 }
 0x1e6   :  { %v1362_v46 = vadd.f32 %v2346_v27, %v1361_v35  ;;  %v1126_v19 = vsel %vm1125_vm8, %v2344_v37, %v1122_v44  ;;  %v1839_v38 = vmul.f32 %v2350_v47, %v4197_v32  ;;  %vm1844_vm15 = vweird.f32 %v2350_v47 }
 0x1e7   :  { %v1131_v23 = vsel %vm1128_vm7, %v1130_v40, %v1126_v19  ;;  %v1602_v4 = vadd.f32 %v2348_v48, %v1601_v21  ;;  %vm1845_vm1 = vmor %vm1843_vm0, %vm1844_vm15 }
 0x1e8   :  { %v1366_v52 = vsel %vm1365_vm9, %v2346_v27, %v1362_v46  ;;  %v1868_v54 = vmul.f32 %v1131_v23, %v4126_v24  ;;  %v1840_v14 = vsub.f32 1.0, %v1839_v38  ;;  %v1847_v24 = vand.u32 2147483647, %v4197_v32 }
 0x1e9   :  { %v1371_v17 = vsel %vm1368_vm11, %v1370_v55, %v1366_v52  ;;  %v1606_v5 = vsel %vm1605_vm13, %v2348_v48, %v1602_v4 }
 0x1ea   :  { %v1884_v62 = vmul.f32 %v1371_v17, %v4130_v43  ;;  %1933 = vst.msk [vmem:[%s4232_s4 + $0x78] sm:$0xff] %vm1917_vm5, %v1868_v54  ;;  %v1841_v58 = vmul.f32 %v2350_v47, %v1840_v14  ;;  %v1611_v43 = vsel %vm1608_vm14, %v1610_v7, %v1606_v5  ;;  %vm1848_vm2 = vcmp.eq.f32.partialorder %v1847_v24, 8.507059e+37 }
 0x1eb   :  { %v1900_v53 = vmul.f32 %v1611_v43, %v4151_v0 }
 0x1ec   :  { %1949 = vst.msk [vmem:[%s4232_s4 + $0xf8] sm:$0xff] %vm1917_vm5, %v1884_v62  ;;  %v1842_v49 = vadd.f32 %v2350_v47, %v1841_v58 }
 0x1ed   :  { %1965 = vst.msk [vmem:[%s4232_s4 + $0x178] sm:$0xff] %vm1917_vm5, %v1900_v53 }
 0x1ee   :  { %v1846_v20 = vsel %vm1845_vm1, %v2350_v47, %v1842_v49 }
 0x1ef   :  { %v1851_v3 = vsel %vm1848_vm2, %v1850_v36, %v1846_v20 }
 0x1f0   :  { %v1916_v10 = vmul.f32 %v1851_v3, %v4183_v56 }
 0x1f2   :  { %1981 = vst.msk [vmem:[%s4232_s4 + $0x1f8] sm:$0xff] %vm1917_vm5, %v1916_v10 }

</bundles_post_ra>
